<compile_context>
chip_gen: v5e
topology: v5e:2x2
jax: 0.10.0
libtpu: 0.0.40
codegen_flags: <defaults>
</compile_context>

<pallas_src>
import functools
import math

import jax
import jax.numpy as jnp
import numpy as np
from jax import lax
from jax.experimental import pallas as pl
from jax.experimental.pallas import tpu as pltpu


def _round_up(x, m):
    return ((x + m - 1) // m) * m


def _vmem_budget():
    """Returns (vmem_limit_bytes, per-grid-step VMEM budget)."""
    try:
        cap = int(pltpu.get_tpu_info().vmem_capacity_bytes)
    except Exception:
        cap = 64 << 20                 # conservative default (v7x per-TC VMEM)
    limit = min(int(cap * 0.75), 100 << 20)
    return limit, int(limit * 0.8)


def _pick_chunk(T, B, D, H_pad, G_pad, cd_bytes, budget, max_chunk=16):
    """Largest chunk <= max_chunk whose per-step VMEM footprint fits budget."""
    max_chunk = max(1, min(max_chunk, T))
    resident = (2 * (D * G_pad + H_pad * G_pad) * cd_bytes   # weights (x2 buf)
                + 2 * G_pad * 4                              # bias  (x2 buf)
                + 2 * B * H_pad * 4)                         # h/c state scratch
    best = 1
    for cand in range(1, max_chunk + 1):
        per = (2 * cand * B * D * cd_bytes         # x block, double-buffered
               + 2 * cand * B * H_pad * cd_bytes   # out block, double-buffered
               + cand * B * G_pad * 4              # gates_x scratch (f32)
               + resident)
        if per <= budget:
            best = cand
    return best


# ----------------------------------------------------------------------------
# Fused per-layer kernel.
# grid = (num_dirs, num_chunks). Each grid step:
#   1. One MXU matmul: gates_x = x_chunk @ W_ih^T + (b_ih + b_hh)   (f32 acc)
#   2. Statically unrolled recurrence over the chunk; only h@W_hh^T on the
#      serial path. Backward direction walks the chunk in reverse (static).
# h/c state lives in VMEM scratch, re-initialized when a new direction starts.
# ----------------------------------------------------------------------------
def _lstm_fused_kernel(x_ref, wih_ref, whh_ref, b_ref, out_ref,
                       gx_scr, h_scr, c_scr, *,
                       hidden_pad, chunk, batch, num_dirs, num_chunks,
                       t_real, needs_mask):
    Hp = hidden_pad
    d_id = pl.program_id(0)
    c_id = pl.program_id(1)

    @pl.when(c_id == 0)
    def _():
        h_scr[...] = jnp.zeros_like(h_scr)
        c_scr[...] = jnp.zeros_like(c_scr)

    # (1) fused input projection + bias for the whole chunk: one MXU matmul.
    gx_scr[...] = (jnp.dot(x_ref[...], wih_ref[...],
                           preferred_element_type=jnp.float32) + b_ref[...])

    def run_chunk(reverse):
        h = h_scr[...]                 # (B, H_pad) f32
        c = c_scr[...]
        c_blk = (num_chunks - 1 - c_id) if reverse else c_id
        steps = range(chunk - 1, -1, -1) if reverse else range(chunk)
        for s in steps:                # static unroll, static offsets
            r0 = s * batch
            gates = gx_scr[r0:r0 + batch, :] + jnp.dot(
                h.astype(whh_ref.dtype), whh_ref[...],
                preferred_element_type=jnp.float32)          # (B, 4*H_pad)
            # gate order [i, f, o, g]: one wide sigmoid + one tanh.
            sig = jax.nn.sigmoid(gates[:, :3 * Hp])
            i_g = sig[:, 0 * Hp:1 * Hp]
            f_g = sig[:, 1 * Hp:2 * Hp]
            o_g = sig[:, 2 * Hp:3 * Hp]
            g_g = jnp.tanh(gates[:, 3 * Hp:])
            c_new = f_g * c + i_g * g_g
            h_new = o_g * jnp.tanh(c_new)
            if needs_mask and reverse:
                # Padded steps (t >= t_real) are processed FIRST on the
                # backward pass; keep h/c at their previous (zero) value.
                valid = (c_blk * chunk + s) < t_real
                c_new = jnp.where(valid, c_new, c)
                h_new = jnp.where(valid, h_new, h)
            c, h = c_new, h_new
            out_ref[r0:r0 + batch, :] = h.astype(out_ref.dtype)
        h_scr[...] = h
        c_scr[...] = c

    if num_dirs == 1:
        run_chunk(False)
    else:
        @pl.when(d_id == 0)
        def _():
            run_chunk(False)

        @pl.when(d_id == 1)
        def _():
            run_chunk(True)


# ----------------------------------------------------------------------------
# Weight preparation: gate reorder [i,f,g,o] -> [i,f,o,g], pad each gate (and
# the recurrent input dim) to H_pad (multiple of 128), fold the two biases.
# Padded gate columns have zero weight/bias -> padded h columns stay exactly 0.
# ----------------------------------------------------------------------------
def _prep_dir_weights(p, H, H_pad, compute_dtype):
    w_ih, w_hh, b_ih, b_hh = p
    perm = jnp.array((0, 1, 3, 2))     # [i, f, g, o] -> [i, f, o, g]
    pad_h = H_pad - H

    def reorder_pad(w):                # (4H, X) -> (4*H_pad, X)
        w4 = w.reshape(4, H, -1)[perm]
        return jnp.pad(w4, ((0, 0), (0, pad_h), (0, 0))).reshape(4 * H_pad, -1)

    wih = reorder_pad(w_ih)                                   # (G_pad, D_in)
    whh = jnp.pad(reorder_pad(w_hh), ((0, 0), (0, pad_h)))    # (G_pad, H_pad)
    b = jnp.pad((b_ih + b_hh).reshape(4, H)[perm],
                ((0, 0), (0, pad_h))).reshape(1, 4 * H_pad)
    return (jnp.transpose(wih).astype(compute_dtype),
            jnp.transpose(whh).astype(compute_dtype),
            b.astype(jnp.float32))


# ----------------------------------------------------------------------------
# One LSTM layer (both directions fused into a single pallas_call).
# x_tbd: (T, B, D) time-major. Returns (T, B, H * num_dirs) in compute_dtype.
# ----------------------------------------------------------------------------
def _lstm_layer(x_tbd, layer_params, *, bidirectional, compute_dtype):
    T, B, D = x_tbd.shape
    num_dirs = 2 if bidirectional else 1
    H = layer_params[0][1].shape[1]                 # w_hh is (4H, H)
    H_pad = _round_up(H, 128)                       # lane-dense gates/output
    G_pad = 4 * H_pad

    prepped = [_prep_dir_weights(p, H, H_pad, compute_dtype)
               for p in layer_params]
    wih_t = jnp.stack([p[0] for p in prepped])      # (nd, D,     G_pad)
    whh_t = jnp.stack([p[1] for p in prepped])      # (nd, H_pad, G_pad)
    bias = jnp.stack([p[2] for p in prepped])       # (nd, 1,     G_pad)

    vmem_limit, budget = _vmem_budget()
    cd_bytes = jnp.dtype(compute_dtype).itemsize
    chunk = _pick_chunk(T, B, D, H_pad, G_pad, cd_bytes, budget)
    T_pad = _round_up(T, chunk)
    nc = T_pad // chunk

    x = x_tbd.astype(compute_dtype)                 # cast once, wrapper-side
    if T_pad != T:
        x = jnp.pad(x, ((0, T_pad - T), (0, 0), (0, 0)))
    x = x.reshape(nc, chunk * B, D)                 # contiguous (free) reshape

    kernel = functools.partial(
        _lstm_fused_kernel, hidden_pad=H_pad, chunk=chunk, batch=B,
        num_dirs=num_dirs, num_chunks=nc, t_real=T, needs_mask=(T_pad != T))

    def x_map(d, c):        # backward direction walks chunks in reverse order
        return (c + d * (nc - 1 - 2 * c), 0, 0)

    def w_map(d, c):
        return (d, 0, 0)

    def o_map(d, c):
        return (d, c + d * (nc - 1 - 2 * c), 0, 0)

    out = pl.pallas_call(
        kernel,
        out_shape=jax.ShapeDtypeStruct((num_dirs, nc, chunk * B, H_pad),
                                       compute_dtype),
        grid=(num_dirs, nc),
        in_specs=[
            pl.BlockSpec((None, chunk * B, D), x_map),
            pl.BlockSpec((None, D, G_pad), w_map),
            pl.BlockSpec((None, H_pad, G_pad), w_map),
            pl.BlockSpec((None, 1, G_pad), w_map),
        ],
        out_specs=pl.BlockSpec((None, None, chunk * B, H_pad), o_map),
        scratch_shapes=[
            pltpu.VMEM((chunk * B, G_pad), jnp.float32),   # gates_x (f32)
            pltpu.VMEM((B, H_pad), jnp.float32),           # h state
            pltpu.VMEM((B, H_pad), jnp.float32),           # c state
        ],
        compiler_params=pltpu.CompilerParams(
            dimension_semantics=("parallel", "arbitrary"),
            vmem_limit_bytes=vmem_limit),
    )(x, wih_t, whh_t, bias)

    out = out.reshape(num_dirs, T_pad, B, H_pad)[:, :T, :, :H]
    if num_dirs == 1:
        return out[0]
    return jnp.concatenate([out[0], out[1]], axis=-1)


# ----------------------------------------------------------------------------
# Full module forward (multi-layer, optionally bidirectional).
# ----------------------------------------------------------------------------
def lstm_forward(x_btd, params, *, num_layers, hidden_dim, bidirectional,
                 compute_dtype=jnp.float32):
    """x_btd: (B, T, D) batch_first, like the PyTorch module.
    Returns (B, T, hidden_dim * num_directions) float32."""
    del hidden_dim  # implied by params
    num_dirs = 2 if bidirectional else 1
    layer_in = jnp.transpose(x_btd, (1, 0, 2))               # (T, B, D)
    for layer in range(num_layers):
        layer_params = [params[(layer, d)] for d in range(num_dirs)]
        layer_in = _lstm_layer(layer_in, layer_params,
                               bidirectional=bidirectional,
                               compute_dtype=compute_dtype)
    return jnp.transpose(layer_in, (1, 0, 2)).astype(jnp.float32)


def init_lstm_params(key, *, latent_dim, hidden_dim, num_layers, bidirectional):
    """PyTorch-shaped params: W_ih (4H, D_in), W_hh (4H, H), b_ih/b_hh (4H,),
    uniform(-1/sqrt(H), 1/sqrt(H))."""
    num_dirs = 2 if bidirectional else 1
    bound = 1.0 / math.sqrt(hidden_dim)
    params = {}
    for layer in range(num_layers):
        d_in = latent_dim if layer == 0 else hidden_dim * num_dirs
        for d in range(num_dirs):
            key, k1, k2, k3, k4 = jax.random.split(key, 5)
            params[(layer, d)] = (
                jax.random.uniform(k1, (4 * hidden_dim, d_in),
                                   jnp.float32, -bound, bound),
                jax.random.uniform(k2, (4 * hidden_dim, hidden_dim),
                                   jnp.float32, -bound, bound),
                jax.random.uniform(k3, (4 * hidden_dim,),
                                   jnp.float32, -bound, bound),
                jax.random.uniform(k4, (4 * hidden_dim,),
                                   jnp.float32, -bound, bound),
            )
    return params


# ----------------------------------------------------------------------------
# Pure-JAX reference (lax.scan) for correctness checking.
# ----------------------------------------------------------------------------
def _ref_direction(x_tbd, w_ih, w_hh, bias, reverse):
    T, B, D = x_tbd.shape
    H = w_hh.shape[1]
    xs = x_tbd[::-1] if reverse else x_tbd

    def step(carry, x_t):
        h, c = carry
        gates = x_t @ w_ih.T + h @ w_hh.T + bias
        i = jax.nn.sigmoid(gates[:, 0 * H:1 * H])
        f = jax.nn.sigmoid(gates[:, 1 * H:2 * H])
        g = jnp.tanh(gates[:, 2 * H:3 * H])
        o = jax.nn.sigmoid(gates[:, 3 * H:4 * H])
        c = f * c + i * g
        h = o * jnp.tanh(c)
        return (h, c), h

    h0 = jnp.zeros((B, H), jnp.float32)
    (_, _), hs = lax.scan(step, (h0, h0), xs)
    return hs[::-1] if reverse else hs


def lstm_forward_ref(x_btd, params, *, num_layers, hidden_dim, bidirectional):
    num_dirs = 2 if bidirectional else 1
    layer_in = jnp.transpose(x_btd, (1, 0, 2))
    for layer in range(num_layers):
        outs = []
        for d in range(num_dirs):
            w_ih, w_hh, b_ih, b_hh = params[(layer, d)]
            outs.append(_ref_direction(layer_in, w_ih, w_hh, b_ih + b_hh,
                                       reverse=(d == 1)))
        layer_in = outs[0] if num_dirs == 1 else jnp.concatenate(outs, axis=-1)
    return jnp.transpose(layer_in, (1, 0, 2))


if __name__ == "__main__":
    def check(B, T, latent, hidden, layers, bidir, key, cd, rtol, atol):
        kx, kp = jax.random.split(key)
        x = jax.random.normal(kx, (B, T, latent), jnp.float32)
        params = init_lstm_params(kp, latent_dim=latent, hidden_dim=hidden,
                                  num_layers=layers, bidirectional=bidir)
        ref = lstm_forward_ref(x, params, num_layers=layers,
                               hidden_dim=hidden, bidirectional=bidir)
        out = jax.block_until_ready(
            lstm_forward(x, params, num_layers=layers, hidden_dim=hidden,
                         bidirectional=bidir, compute_dtype=cd))
        expected_feat = hidden * (2 if bidir else 1)
        assert out.shape == (B, T, expected_feat), out.shape
        np.testing.assert_allclose(np.asarray(out), np.asarray(ref),
                                   rtol=rtol, atol=atol)

    key = jax.random.PRNGKey(0)
    k1, k2, k3, k4 = jax.random.split(key, 4)

    # Small shapes consistent with LSTM(latent_dim, num_layers, hidden_dim,
    # bidirectional); x is (batch, seq, latent_dim).
    # 1) f32 weight path: must match the lax.scan reference tightly.
    check(2, 8, 32, 32, 2, True, k1, jnp.float32, 1e-4, 1e-4)
    # 2) bf16 weights / activations (f32 state + f32 accumulation): loose.
    check(2, 8, 32, 32, 2, True, k2, jnp.bfloat16, 5e-2, 5e-2)
    # 3) Non-divisor T (exercises T padding + backward-direction masking).
    check(2, 19, 32, 32, 1, True, k3, jnp.float32, 1e-4, 1e-4)
    # 4) Unidirectional path.
    check(2, 19, 32, 32, 1, False, k4, jnp.float32, 1e-4, 1e-4)

    print("KERNEL_OK")
</pallas_src>

<mosaic_0001>
module attributes {stable_mosaic.version = 11 : i64} {
  func.func @_lstm_fused_kernel(%arg0: i32, %arg1: i32, %arg2: memref<1x16x32xf32, #tpu.memory_space<vmem>>, %arg3: memref<1x32x512xf32, #tpu.memory_space<vmem>>, %arg4: memref<1x128x512xf32, #tpu.memory_space<vmem>>, %arg5: memref<1x1x512xf32, #tpu.memory_space<vmem>>, %arg6: memref<1x1x16x128xf32, #tpu.memory_space<vmem>>, %arg7: memref<16x512xf32, #tpu.memory_space<vmem>>, %arg8: memref<2x128xf32, #tpu.memory_space<vmem>>, %arg9: memref<2x128xf32, #tpu.memory_space<vmem>>) attributes {dimension_semantics = [#tpu.dimension_semantics<parallel>, #tpu.dimension_semantics<arbitrary>], iteration_bounds = array<i64: 2, 1>, scalar_prefetch = 0 : i64, scratch_operands = 3 : i64, tpu.core_type = #tpu.core_type<tc>, window_params = [{transform_indices = @transform_0, window_bounds = array<i64: 1, 16, 32>}, {transform_indices = @transform_1, window_bounds = array<i64: 1, 32, 512>}, {transform_indices = @transform_2, window_bounds = array<i64: 1, 128, 512>}, {transform_indices = @transform_3, window_bounds = array<i64: 1, 1, 512>}, {transform_indices = @transform_4, window_bounds = array<i64: 1, 1, 16, 128>}]} {
    %c0_i32 = arith.constant 0 : i32
    %0 = arith.cmpi eq, %arg1, %c0_i32 : i32
    %1 = arith.extui %0 : i1 to i32
    %c0_i32_0 = arith.constant 0 : i32
    %2 = arith.cmpi ne, %1, %c0_i32_0 : i32
    scf.if %2 {
      %cst_14 = arith.constant 0.000000e+00 : f32
      %19 = vector.broadcast %cst_14 : f32 to vector<2x128xf32>
      %c0_15 = arith.constant 0 : index
      %c0_16 = arith.constant 0 : index
      %20 = vector.load %arg8[%c0_15, %c0_16] : memref<2x128xf32, #tpu.memory_space<vmem>>, vector<2x128xf32>
      tpu.vector_store %arg8[%c0_15, %c0_16], %19 {strides = array<i32>} : memref<2x128xf32, #tpu.memory_space<vmem>>, vector<2x128xf32>,
      %cst_17 = arith.constant 0.000000e+00 : f32
      %21 = vector.broadcast %cst_17 : f32 to vector<2x128xf32>
      %c0_18 = arith.constant 0 : index
      %c0_19 = arith.constant 0 : index
      %22 = vector.load %arg9[%c0_18, %c0_19] : memref<2x128xf32, #tpu.memory_space<vmem>>, vector<2x128xf32>
      tpu.vector_store %arg9[%c0_18, %c0_19], %21 {strides = array<i32>} : memref<2x128xf32, #tpu.memory_space<vmem>>, vector<2x128xf32>,
    } else {
    }
    %c0 = arith.constant 0 : index
    %c0_1 = arith.constant 0 : index
    %c0_2 = arith.constant 0 : index
    %3 = vector.load %arg2[%c0, %c0_1, %c0_2] : memref<1x16x32xf32, #tpu.memory_space<vmem>>, vector<1x16x32xf32>
    %4 = vector.shape_cast %3 : vector<1x16x32xf32> to vector<16x32xf32>
    %c0_3 = arith.constant 0 : index
    %c0_4 = arith.constant 0 : index
    %c0_5 = arith.constant 0 : index
    %5 = vector.load %arg3[%c0_3, %c0_4, %c0_5] : memref<1x32x512xf32, #tpu.memory_space<vmem>>, vector<1x32x512xf32>
    %6 = vector.shape_cast %5 : vector<1x32x512xf32> to vector<32x512xf32>
    %cst = arith.constant dense<0.000000e+00> : vector<16x512xf32>
    %7 = tpu.matmul %4, %6, %cst {dimension_numbers = #tpu.dot_dimension_numbers<[1], [0], [0], [1], [0, 0, 1, 1], [], []>} : vector<16x32xf32>, vector<32x512xf32>, vector<16x512xf32> -> vector<16x512xf32>
    %c0_6 = arith.constant 0 : index
    %c0_7 = arith.constant 0 : index
    %c0_8 = arith.constant 0 : index
    %8 = vector.load %arg5[%c0_6, %c0_7, %c0_8] : memref<1x1x512xf32, #tpu.memory_space<vmem>>, vector<1x1x512xf32>
    %9 = vector.shape_cast %8 : vector<1x1x512xf32> to vector<1x512xf32>
    %10 = vector.broadcast %9 : vector<1x512xf32> to vector<16x512xf32>
    %11 = arith.addf %7, %10 : vector<16x512xf32>
    %c0_9 = arith.constant 0 : index
    %c0_10 = arith.constant 0 : index
    %12 = vector.load %arg7[%c0_9, %c0_10] : memref<16x512xf32, #tpu.memory_space<vmem>>, vector<16x512xf32>
    tpu.vector_store %arg7[%c0_9, %c0_10], %11 {strides = array<i32>} : memref<16x512xf32, #tpu.memory_space<vmem>>, vector<16x512xf32>,
    %c0_i32_11 = arith.constant 0 : i32
    %13 = arith.cmpi eq, %arg0, %c0_i32_11 : i32
    %14 = arith.extui %13 : i1 to i32
    %c0_i32_12 = arith.constant 0 : i32
    %15 = arith.cmpi ne, %14, %c0_i32_12 : i32
    scf.if %15 {
      %c0_14 = arith.constant 0 : index
      %c0_15 = arith.constant 0 : index
      %19 = vector.load %arg8[%c0_14, %c0_15] : memref<2x128xf32, #tpu.memory_space<vmem>>, vector<2x128xf32>
      %c0_16 = arith.constant 0 : index
      %c0_17 = arith.constant 0 : index
      %20 = vector.load %arg9[%c0_16, %c0_17] : memref<2x128xf32, #tpu.memory_space<vmem>>, vector<2x128xf32>
      %c0_18 = arith.constant 0 : index
      %c0_19 = arith.constant 0 : index
      %21 = vector.load %arg7[%c0_18, %c0_19] : memref<16x512xf32, #tpu.memory_space<vmem>>, vector<2x512xf32>
      %c0_20 = arith.constant 0 : index
      %c0_21 = arith.constant 0 : index
      %c0_22 = arith.constant 0 : index
      %22 = vector.load %arg4[%c0_20, %c0_21, %c0_22] : memref<1x128x512xf32, #tpu.memory_space<vmem>>, vector<1x128x512xf32>
      %23 = vector.shape_cast %22 : vector<1x128x512xf32> to vector<128x512xf32>
      %cst_23 = arith.constant dense<0.000000e+00> : vector<2x512xf32>
      %24 = tpu.matmul %19, %23, %cst_23 {dimension_numbers = #tpu.dot_dimension_numbers<[1], [0], [0], [1], [0, 0, 1, 1], [], []>} : vector<2x128xf32>, vector<128x512xf32>, vector<2x512xf32> -> vector<2x512xf32>
      %25 = arith.addf %21, %24 : vector<2x512xf32>
      %26 = vector.extract_strided_slice %25 {offsets = [0, 0], sizes = [2, 384], strides = [1, 1]} : vector<2x512xf32> to vector<2x384xf32>
      %27 = arith.negf %26 : vector<2x384xf32>
      %28 = math.exp %27 : vector<2x384xf32>
      %cst_24 = arith.constant 1.000000e+00 : f32
      %29 = vector.broadcast %cst_24 : f32 to vector<2x384xf32>
      %30 = arith.addf %29, %28 : vector<2x384xf32>
      %31 = arith.divf %29, %30 : vector<2x384xf32>
      %32 = vector.extract_strided_slice %31 {offsets = [0, 0], sizes = [2, 128], strides = [1, 1]} : vector<2x384xf32> to vector<2x128xf32>
      %33 = vector.extract_strided_slice %31 {offsets = [0, 128], sizes = [2, 128], strides = [1, 1]} : vector<2x384xf32> to vector<2x128xf32>
      %34 = vector.extract_strided_slice %31 {offsets = [0, 256], sizes = [2, 128], strides = [1, 1]} : vector<2x384xf32> to vector<2x128xf32>
      %35 = vector.extract_strided_slice %25 {offsets = [0, 384], sizes = [2, 128], strides = [1, 1]} : vector<2x512xf32> to vector<2x128xf32>
      %36 = math.tanh %35 : vector<2x128xf32>
      %37 = arith.mulf %33, %20 : vector<2x128xf32>
      %38 = arith.mulf %32, %36 : vector<2x128xf32>
      %39 = arith.addf %37, %38 : vector<2x128xf32>
      %40 = math.tanh %39 : vector<2x128xf32>
      %41 = arith.mulf %34, %40 : vector<2x128xf32>
      %c0_25 = arith.constant 0 : index
      %c0_26 = arith.constant 0 : index
      %c0_27 = arith.constant 0 : index
      %c0_28 = arith.constant 0 : index
      %42 = vector.load %arg6[%c0_25, %c0_26, %c0_27, %c0_28] : memref<1x1x16x128xf32, #tpu.memory_space<vmem>>, vector<1x1x2x128xf32>
      %43 = vector.shape_cast %42 : vector<1x1x2x128xf32> to vector<2x128xf32>
      %44 = vector.shape_cast %41 : vector<2x128xf32> to vector<1x1x2x128xf32>
      tpu.vector_store %arg6[%c0_25, %c0_26, %c0_27, %c0_28], %44 {strides = array<i32>} : memref<1x1x16x128xf32, #tpu.memory_space<vmem>>, vector<1x1x2x128xf32>,
      %c2 = arith.constant 2 : index
      %c0_29 = arith.constant 0 : index
      %45 = vector.load %arg7[%c2, %c0_29] : memref<16x512xf32, #tpu.memory_space<vmem>>, vector<2x512xf32>
      %c0_30 = arith.constant 0 : index
      %c0_31 = arith.constant 0 : index
      %c0_32 = arith.constant 0 : index
      %46 = vector.load %arg4[%c0_30, %c0_31, %c0_32] : memref<1x128x512xf32, #tpu.memory_space<vmem>>, vector<1x128x512xf32>
      %47 = vector.shape_cast %46 : vector<1x128x512xf32> to vector<128x512xf32>
      %cst_33 = arith.constant dense<0.000000e+00> : vector<2x512xf32>
      %48 = tpu.matmul %41, %47, %cst_33 {dimension_numbers = #tpu.dot_dimension_numbers<[1], [0], [0], [1], [0, 0, 1, 1], [], []>} : vector<2x128xf32>, vector<128x512xf32>, vector<2x512xf32> -> vector<2x512xf32>
      %49 = arith.addf %45, %48 : vector<2x512xf32>
      %50 = vector.extract_strided_slice %49 {offsets = [0, 0], sizes = [2, 384], strides = [1, 1]} : vector<2x512xf32> to vector<2x384xf32>
      %51 = arith.negf %50 : vector<2x384xf32>
      %52 = math.exp %51 : vector<2x384xf32>
      %cst_34 = arith.constant 1.000000e+00 : f32
      %53 = vector.broadcast %cst_34 : f32 to vector<2x384xf32>
      %54 = arith.addf %53, %52 : vector<2x384xf32>
      %55 = arith.divf %53, %54 : vector<2x384xf32>
      %56 = vector.extract_strided_slice %55 {offsets = [0, 0], sizes = [2, 128], strides = [1, 1]} : vector<2x384xf32> to vector<2x128xf32>
      %57 = vector.extract_strided_slice %55 {offsets = [0, 128], sizes = [2, 128], strides = [1, 1]} : vector<2x384xf32> to vector<2x128xf32>
      %58 = vector.extract_strided_slice %55 {offsets = [0, 256], sizes = [2, 128], strides = [1, 1]} : vector<2x384xf32> to vector<2x128xf32>
      %59 = vector.extract_strided_slice %49 {offsets = [0, 384], sizes = [2, 128], strides = [1, 1]} : vector<2x512xf32> to vector<2x128xf32>
      %60 = math.tanh %59 : vector<2x128xf32>
      %61 = arith.mulf %57, %39 : vector<2x128xf32>
      %62 = arith.mulf %56, %60 : vector<2x128xf32>
      %63 = arith.addf %61, %62 : vector<2x128xf32>
      %64 = math.tanh %63 : vector<2x128xf32>
      %65 = arith.mulf %58, %64 : vector<2x128xf32>
      %c0_35 = arith.constant 0 : index
      %c0_36 = arith.constant 0 : index
      %c2_37 = arith.constant 2 : index
      %c0_38 = arith.constant 0 : index
      %66 = vector.load %arg6[%c0_35, %c0_36, %c2_37, %c0_38] : memref<1x1x16x128xf32, #tpu.memory_space<vmem>>, vector<1x1x2x128xf32>
      %67 = vector.shape_cast %66 : vector<1x1x2x128xf32> to vector<2x128xf32>
      %68 = vector.shape_cast %65 : vector<2x128xf32> to vector<1x1x2x128xf32>
      tpu.vector_store %arg6[%c0_35, %c0_36, %c2_37, %c0_38], %68 {strides = array<i32>} : memref<1x1x16x128xf32, #tpu.memory_space<vmem>>, vector<1x1x2x128xf32>,
      %c4 = arith.constant 4 : index
      %c0_39 = arith.constant 0 : index
      %69 = vector.load %arg7[%c4, %c0_39] : memref<16x512xf32, #tpu.memory_space<vmem>>, vector<2x512xf32>
      %c0_40 = arith.constant 0 : index
      %c0_41 = arith.constant 0 : index
      %c0_42 = arith.constant 0 : index
      %70 = vector.load %arg4[%c0_40, %c0_41, %c0_42] : memref<1x128x512xf32, #tpu.memory_space<vmem>>, vector<1x128x512xf32>
      %71 = vector.shape_cast %70 : vector<1x128x512xf32> to vector<128x512xf32>
      %cst_43 = arith.constant dense<0.000000e+00> : vector<2x512xf32>
      %72 = tpu.matmul %65, %71, %cst_43 {dimension_numbers = #tpu.dot_dimension_numbers<[1], [0], [0], [1], [0, 0, 1, 1], [], []>} : vector<2x128xf32>, vector<128x512xf32>, vector<2x512xf32> -> vector<2x512xf32>
      %73 = arith.addf %69, %72 : vector<2x512xf32>
      %74 = vector.extract_strided_slice %73 {offsets = [0, 0], sizes = [2, 384], strides = [1, 1]} : vector<2x512xf32> to vector<2x384xf32>
      %75 = arith.negf %74 : vector<2x384xf32>
      %76 = math.exp %75 : vector<2x384xf32>
      %cst_44 = arith.constant 1.000000e+00 : f32
      %77 = vector.broadcast %cst_44 : f32 to vector<2x384xf32>
      %78 = arith.addf %77, %76 : vector<2x384xf32>
      %79 = arith.divf %77, %78 : vector<2x384xf32>
      %80 = vector.extract_strided_slice %79 {offsets = [0, 0], sizes = [2, 128], strides = [1, 1]} : vector<2x384xf32> to vector<2x128xf32>
      %81 = vector.extract_strided_slice %79 {offsets = [0, 128], sizes = [2, 128], strides = [1, 1]} : vector<2x384xf32> to vector<2x128xf32>
      %82 = vector.extract_strided_slice %79 {offsets = [0, 256], sizes = [2, 128], strides = [1, 1]} : vector<2x384xf32> to vector<2x128xf32>
      %83 = vector.extract_strided_slice %73 {offsets = [0, 384], sizes = [2, 128], strides = [1, 1]} : vector<2x512xf32> to vector<2x128xf32>
      %84 = math.tanh %83 : vector<2x128xf32>
      %85 = arith.mulf %81, %63 : vector<2x128xf32>
      %86 = arith.mulf %80, %84 : vector<2x128xf32>
      %87 = arith.addf %85, %86 : vector<2x128xf32>
      %88 = math.tanh %87 : vector<2x128xf32>
      %89 = arith.mulf %82, %88 : vector<2x128xf32>
      %c0_45 = arith.constant 0 : index
      %c0_46 = arith.constant 0 : index
      %c4_47 = arith.constant 4 : index
      %c0_48 = arith.constant 0 : index
      %90 = vector.load %arg6[%c0_45, %c0_46, %c4_47, %c0_48] : memref<1x1x16x128xf32, #tpu.memory_space<vmem>>, vector<1x1x2x128xf32>
      %91 = vector.shape_cast %90 : vector<1x1x2x128xf32> to vector<2x128xf32>
      %92 = vector.shape_cast %89 : vector<2x128xf32> to vector<1x1x2x128xf32>
      tpu.vector_store %arg6[%c0_45, %c0_46, %c4_47, %c0_48], %92 {strides = array<i32>} : memref<1x1x16x128xf32, #tpu.memory_space<vmem>>, vector<1x1x2x128xf32>,
      %c6 = arith.constant 6 : index
      %c0_49 = arith.constant 0 : index
      %93 = vector.load %arg7[%c6, %c0_49] : memref<16x512xf32, #tpu.memory_space<vmem>>, vector<2x512xf32>
      %c0_50 = arith.constant 0 : index
      %c0_51 = arith.constant 0 : index
      %c0_52 = arith.constant 0 : index
      %94 = vector.load %arg4[%c0_50, %c0_51, %c0_52] : memref<1x128x512xf32, #tpu.memory_space<vmem>>, vector<1x128x512xf32>
      %95 = vector.shape_cast %94 : vector<1x128x512xf32> to vector<128x512xf32>
      %cst_53 = arith.constant dense<0.000000e+00> : vector<2x512xf32>
      %96 = tpu.matmul %89, %95, %cst_53 {dimension_numbers = #tpu.dot_dimension_numbers<[1], [0], [0], [1], [0, 0, 1, 1], [], []>} : vector<2x128xf32>, vector<128x512xf32>, vector<2x512xf32> -> vector<2x512xf32>
      %97 = arith.addf %93, %96 : vector<2x512xf32>
      %98 = vector.extract_strided_slice %97 {offsets = [0, 0], sizes = [2, 384], strides = [1, 1]} : vector<2x512xf32> to vector<2x384xf32>
      %99 = arith.negf %98 : vector<2x384xf32>
      %100 = math.exp %99 : vector<2x384xf32>
      %cst_54 = arith.constant 1.000000e+00 : f32
      %101 = vector.broadcast %cst_54 : f32 to vector<2x384xf32>
      %102 = arith.addf %101, %100 : vector<2x384xf32>
      %103 = arith.divf %101, %102 : vector<2x384xf32>
      %104 = vector.extract_strided_slice %103 {offsets = [0, 0], sizes = [2, 128], strides = [1, 1]} : vector<2x384xf32> to vector<2x128xf32>
      %105 = vector.extract_strided_slice %103 {offsets = [0, 128], sizes = [2, 128], strides = [1, 1]} : vector<2x384xf32> to vector<2x128xf32>
      %106 = vector.extract_strided_slice %103 {offsets = [0, 256], sizes = [2, 128], strides = [1, 1]} : vector<2x384xf32> to vector<2x128xf32>
      %107 = vector.extract_strided_slice %97 {offsets = [0, 384], sizes = [2, 128], strides = [1, 1]} : vector<2x512xf32> to vector<2x128xf32>
      %108 = math.tanh %107 : vector<2x128xf32>
      %109 = arith.mulf %105, %87 : vector<2x128xf32>
      %110 = arith.mulf %104, %108 : vector<2x128xf32>
      %111 = arith.addf %109, %110 : vector<2x128xf32>
      %112 = math.tanh %111 : vector<2x128xf32>
      %113 = arith.mulf %106, %112 : vector<2x128xf32>
      %c0_55 = arith.constant 0 : index
      %c0_56 = arith.constant 0 : index
      %c6_57 = arith.constant 6 : index
      %c0_58 = arith.constant 0 : index
      %114 = vector.load %arg6[%c0_55, %c0_56, %c6_57, %c0_58] : memref<1x1x16x128xf32, #tpu.memory_space<vmem>>, vector<1x1x2x128xf32>
      %115 = vector.shape_cast %114 : vector<1x1x2x128xf32> to vector<2x128xf32>
      %116 = vector.shape_cast %113 : vector<2x128xf32> to vector<1x1x2x128xf32>
      tpu.vector_store %arg6[%c0_55, %c0_56, %c6_57, %c0_58], %116 {strides = array<i32>} : memref<1x1x16x128xf32, #tpu.memory_space<vmem>>, vector<1x1x2x128xf32>,
      %c8 = arith.constant 8 : index
      %c0_59 = arith.constant 0 : index
      %117 = vector.load %arg7[%c8, %c0_59] : memref<16x512xf32, #tpu.memory_space<vmem>>, vector<2x512xf32>
      %c0_60 = arith.constant 0 : index
      %c0_61 = arith.constant 0 : index
      %c0_62 = arith.constant 0 : index
      %118 = vector.load %arg4[%c0_60, %c0_61, %c0_62] : memref<1x128x512xf32, #tpu.memory_space<vmem>>, vector<1x128x512xf32>
      %119 = vector.shape_cast %118 : vector<1x128x512xf32> to vector<128x512xf32>
      %cst_63 = arith.constant dense<0.000000e+00> : vector<2x512xf32>
      %120 = tpu.matmul %113, %119, %cst_63 {dimension_numbers = #tpu.dot_dimension_numbers<[1], [0], [0], [1], [0, 0, 1, 1], [], []>} : vector<2x128xf32>, vector<128x512xf32>, vector<2x512xf32> -> vector<2x512xf32>
      %121 = arith.addf %117, %120 : vector<2x512xf32>
      %122 = vector.extract_strided_slice %121 {offsets = [0, 0], sizes = [2, 384], strides = [1, 1]} : vector<2x512xf32> to vector<2x384xf32>
      %123 = arith.negf %122 : vector<2x384xf32>
      %124 = math.exp %123 : vector<2x384xf32>
      %cst_64 = arith.constant 1.000000e+00 : f32
      %125 = vector.broadcast %cst_64 : f32 to vector<2x384xf32>
      %126 = arith.addf %125, %124 : vector<2x384xf32>
      %127 = arith.divf %125, %126 : vector<2x384xf32>
      %128 = vector.extract_strided_slice %127 {offsets = [0, 0], sizes = [2, 128], strides = [1, 1]} : vector<2x384xf32> to vector<2x128xf32>
      %129 = vector.extract_strided_slice %127 {offsets = [0, 128], sizes = [2, 128], strides = [1, 1]} : vector<2x384xf32> to vector<2x128xf32>
      %130 = vector.extract_strided_slice %127 {offsets = [0, 256], sizes = [2, 128], strides = [1, 1]} : vector<2x384xf32> to vector<2x128xf32>
      %131 = vector.extract_strided_slice %121 {offsets = [0, 384], sizes = [2, 128], strides = [1, 1]} : vector<2x512xf32> to vector<2x128xf32>
      %132 = math.tanh %131 : vector<2x128xf32>
      %133 = arith.mulf %129, %111 : vector<2x128xf32>
      %134 = arith.mulf %128, %132 : vector<2x128xf32>
      %135 = arith.addf %133, %134 : vector<2x128xf32>
      %136 = math.tanh %135 : vector<2x128xf32>
      %137 = arith.mulf %130, %136 : vector<2x128xf32>
      %c0_65 = arith.constant 0 : index
      %c0_66 = arith.constant 0 : index
      %c8_67 = arith.constant 8 : index
      %c0_68 = arith.constant 0 : index
      %138 = vector.load %arg6[%c0_65, %c0_66, %c8_67, %c0_68] : memref<1x1x16x128xf32, #tpu.memory_space<vmem>>, vector<1x1x2x128xf32>
      %139 = vector.shape_cast %138 : vector<1x1x2x128xf32> to vector<2x128xf32>
      %140 = vector.shape_cast %137 : vector<2x128xf32> to vector<1x1x2x128xf32>
      tpu.vector_store %arg6[%c0_65, %c0_66, %c8_67, %c0_68], %140 {strides = array<i32>} : memref<1x1x16x128xf32, #tpu.memory_space<vmem>>, vector<1x1x2x128xf32>,
      %c10 = arith.constant 10 : index
      %c0_69 = arith.constant 0 : index
      %141 = vector.load %arg7[%c10, %c0_69] : memref<16x512xf32, #tpu.memory_space<vmem>>, vector<2x512xf32>
      %c0_70 = arith.constant 0 : index
      %c0_71 = arith.constant 0 : index
      %c0_72 = arith.constant 0 : index
      %142 = vector.load %arg4[%c0_70, %c0_71, %c0_72] : memref<1x128x512xf32, #tpu.memory_space<vmem>>, vector<1x128x512xf32>
      %143 = vector.shape_cast %142 : vector<1x128x512xf32> to vector<128x512xf32>
      %cst_73 = arith.constant dense<0.000000e+00> : vector<2x512xf32>
      %144 = tpu.matmul %137, %143, %cst_73 {dimension_numbers = #tpu.dot_dimension_numbers<[1], [0], [0], [1], [0, 0, 1, 1], [], []>} : vector<2x128xf32>, vector<128x512xf32>, vector<2x512xf32> -> vector<2x512xf32>
      %145 = arith.addf %141, %144 : vector<2x512xf32>
      %146 = vector.extract_strided_slice %145 {offsets = [0, 0], sizes = [2, 384], strides = [1, 1]} : vector<2x512xf32> to vector<2x384xf32>
      %147 = arith.negf %146 : vector<2x384xf32>
      %148 = math.exp %147 : vector<2x384xf32>
      %cst_74 = arith.constant 1.000000e+00 : f32
      %149 = vector.broadcast %cst_74 : f32 to vector<2x384xf32>
      %150 = arith.addf %149, %148 : vector<2x384xf32>
      %151 = arith.divf %149, %150 : vector<2x384xf32>
      %152 = vector.extract_strided_slice %151 {offsets = [0, 0], sizes = [2, 128], strides = [1, 1]} : vector<2x384xf32> to vector<2x128xf32>
      %153 = vector.extract_strided_slice %151 {offsets = [0, 128], sizes = [2, 128], strides = [1, 1]} : vector<2x384xf32> to vector<2x128xf32>
      %154 = vector.extract_strided_slice %151 {offsets = [0, 256], sizes = [2, 128], strides = [1, 1]} : vector<2x384xf32> to vector<2x128xf32>
      %155 = vector.extract_strided_slice %145 {offsets = [0, 384], sizes = [2, 128], strides = [1, 1]} : vector<2x512xf32> to vector<2x128xf32>
      %156 = math.tanh %155 : vector<2x128xf32>
      %157 = arith.mulf %153, %135 : vector<2x128xf32>
      %158 = arith.mulf %152, %156 : vector<2x128xf32>
      %159 = arith.addf %157, %158 : vector<2x128xf32>
      %160 = math.tanh %159 : vector<2x128xf32>
      %161 = arith.mulf %154, %160 : vector<2x128xf32>
      %c0_75 = arith.constant 0 : index
      %c0_76 = arith.constant 0 : index
      %c10_77 = arith.constant 10 : index
      %c0_78 = arith.constant 0 : index
      %162 = vector.load %arg6[%c0_75, %c0_76, %c10_77, %c0_78] : memref<1x1x16x128xf32, #tpu.memory_space<vmem>>, vector<1x1x2x128xf32>
      %163 = vector.shape_cast %162 : vector<1x1x2x128xf32> to vector<2x128xf32>
      %164 = vector.shape_cast %161 : vector<2x128xf32> to vector<1x1x2x128xf32>
      tpu.vector_store %arg6[%c0_75, %c0_76, %c10_77, %c0_78], %164 {strides = array<i32>} : memref<1x1x16x128xf32, #tpu.memory_space<vmem>>, vector<1x1x2x128xf32>,
      %c12 = arith.constant 12 : index
      %c0_79 = arith.constant 0 : index
      %165 = vector.load %arg7[%c12, %c0_79] : memref<16x512xf32, #tpu.memory_space<vmem>>, vector<2x512xf32>
      %c0_80 = arith.constant 0 : index
      %c0_81 = arith.constant 0 : index
      %c0_82 = arith.constant 0 : index
      %166 = vector.load %arg4[%c0_80, %c0_81, %c0_82] : memref<1x128x512xf32, #tpu.memory_space<vmem>>, vector<1x128x512xf32>
      %167 = vector.shape_cast %166 : vector<1x128x512xf32> to vector<128x512xf32>
      %cst_83 = arith.constant dense<0.000000e+00> : vector<2x512xf32>
      %168 = tpu.matmul %161, %167, %cst_83 {dimension_numbers = #tpu.dot_dimension_numbers<[1], [0], [0], [1], [0, 0, 1, 1], [], []>} : vector<2x128xf32>, vector<128x512xf32>, vector<2x512xf32> -> vector<2x512xf32>
      %169 = arith.addf %165, %168 : vector<2x512xf32>
      %170 = vector.extract_strided_slice %169 {offsets = [0, 0], sizes = [2, 384], strides = [1, 1]} : vector<2x512xf32> to vector<2x384xf32>
      %171 = arith.negf %170 : vector<2x384xf32>
      %172 = math.exp %171 : vector<2x384xf32>
      %cst_84 = arith.constant 1.000000e+00 : f32
      %173 = vector.broadcast %cst_84 : f32 to vector<2x384xf32>
      %174 = arith.addf %173, %172 : vector<2x384xf32>
      %175 = arith.divf %173, %174 : vector<2x384xf32>
      %176 = vector.extract_strided_slice %175 {offsets = [0, 0], sizes = [2, 128], strides = [1, 1]} : vector<2x384xf32> to vector<2x128xf32>
      %177 = vector.extract_strided_slice %175 {offsets = [0, 128], sizes = [2, 128], strides = [1, 1]} : vector<2x384xf32> to vector<2x128xf32>
      %178 = vector.extract_strided_slice %175 {offsets = [0, 256], sizes = [2, 128], strides = [1, 1]} : vector<2x384xf32> to vector<2x128xf32>
      %179 = vector.extract_strided_slice %169 {offsets = [0, 384], sizes = [2, 128], strides = [1, 1]} : vector<2x512xf32> to vector<2x128xf32>
      %180 = math.tanh %179 : vector<2x128xf32>
      %181 = arith.mulf %177, %159 : vector<2x128xf32>
      %182 = arith.mulf %176, %180 : vector<2x128xf32>
      %183 = arith.addf %181, %182 : vector<2x128xf32>
      %184 = math.tanh %183 : vector<2x128xf32>
      %185 = arith.mulf %178, %184 : vector<2x128xf32>
      %c0_85 = arith.constant 0 : index
      %c0_86 = arith.constant 0 : index
      %c12_87 = arith.constant 12 : index
      %c0_88 = arith.constant 0 : index
      %186 = vector.load %arg6[%c0_85, %c0_86, %c12_87, %c0_88] : memref<1x1x16x128xf32, #tpu.memory_space<vmem>>, vector<1x1x2x128xf32>
      %187 = vector.shape_cast %186 : vector<1x1x2x128xf32> to vector<2x128xf32>
      %188 = vector.shape_cast %185 : vector<2x128xf32> to vector<1x1x2x128xf32>
      tpu.vector_store %arg6[%c0_85, %c0_86, %c12_87, %c0_88], %188 {strides = array<i32>} : memref<1x1x16x128xf32, #tpu.memory_space<vmem>>, vector<1x1x2x128xf32>,
      %c14 = arith.constant 14 : index
      %c0_89 = arith.constant 0 : index
      %189 = vector.load %arg7[%c14, %c0_89] : memref<16x512xf32, #tpu.memory_space<vmem>>, vector<2x512xf32>
      %c0_90 = arith.constant 0 : index
      %c0_91 = arith.constant 0 : index
      %c0_92 = arith.constant 0 : index
      %190 = vector.load %arg4[%c0_90, %c0_91, %c0_92] : memref<1x128x512xf32, #tpu.memory_space<vmem>>, vector<1x128x512xf32>
      %191 = vector.shape_cast %190 : vector<1x128x512xf32> to vector<128x512xf32>
      %cst_93 = arith.constant dense<0.000000e+00> : vector<2x512xf32>
      %192 = tpu.matmul %185, %191, %cst_93 {dimension_numbers = #tpu.dot_dimension_numbers<[1], [0], [0], [1], [0, 0, 1, 1], [], []>} : vector<2x128xf32>, vector<128x512xf32>, vector<2x512xf32> -> vector<2x512xf32>
      %193 = arith.addf %189, %192 : vector<2x512xf32>
      %194 = vector.extract_strided_slice %193 {offsets = [0, 0], sizes = [2, 384], strides = [1, 1]} : vector<2x512xf32> to vector<2x384xf32>
      %195 = arith.negf %194 : vector<2x384xf32>
      %196 = math.exp %195 : vector<2x384xf32>
      %cst_94 = arith.constant 1.000000e+00 : f32
      %197 = vector.broadcast %cst_94 : f32 to vector<2x384xf32>
      %198 = arith.addf %197, %196 : vector<2x384xf32>
      %199 = arith.divf %197, %198 : vector<2x384xf32>
      %200 = vector.extract_strided_slice %199 {offsets = [0, 0], sizes = [2, 128], strides = [1, 1]} : vector<2x384xf32> to vector<2x128xf32>
      %201 = vector.extract_strided_slice %199 {offsets = [0, 128], sizes = [2, 128], strides = [1, 1]} : vector<2x384xf32> to vector<2x128xf32>
      %202 = vector.extract_strided_slice %199 {offsets = [0, 256], sizes = [2, 128], strides = [1, 1]} : vector<2x384xf32> to vector<2x128xf32>
      %203 = vector.extract_strided_slice %193 {offsets = [0, 384], sizes = [2, 128], strides = [1, 1]} : vector<2x512xf32> to vector<2x128xf32>
      %204 = math.tanh %203 : vector<2x128xf32>
      %205 = arith.mulf %201, %183 : vector<2x128xf32>
      %206 = arith.mulf %200, %204 : vector<2x128xf32>
      %207 = arith.addf %205, %206 : vector<2x128xf32>
      %208 = math.tanh %207 : vector<2x128xf32>
      %209 = arith.mulf %202, %208 : vector<2x128xf32>
      %c0_95 = arith.constant 0 : index
      %c0_96 = arith.constant 0 : index
      %c14_97 = arith.constant 14 : index
      %c0_98 = arith.constant 0 : index
      %210 = vector.load %arg6[%c0_95, %c0_96, %c14_97, %c0_98] : memref<1x1x16x128xf32, #tpu.memory_space<vmem>>, vector<1x1x2x128xf32>
      %211 = vector.shape_cast %210 : vector<1x1x2x128xf32> to vector<2x128xf32>
      %212 = vector.shape_cast %209 : vector<2x128xf32> to vector<1x1x2x128xf32>
      tpu.vector_store %arg6[%c0_95, %c0_96, %c14_97, %c0_98], %212 {strides = array<i32>} : memref<1x1x16x128xf32, #tpu.memory_space<vmem>>, vector<1x1x2x128xf32>,
      %c0_99 = arith.constant 0 : index
      %c0_100 = arith.constant 0 : index
      %213 = vector.load %arg8[%c0_99, %c0_100] : memref<2x128xf32, #tpu.memory_space<vmem>>, vector<2x128xf32>
      tpu.vector_store %arg8[%c0_99, %c0_100], %209 {strides = array<i32>} : memref<2x128xf32, #tpu.memory_space<vmem>>, vector<2x128xf32>,
      %c0_101 = arith.constant 0 : index
      %c0_102 = arith.constant 0 : index
      %214 = vector.load %arg9[%c0_101, %c0_102] : memref<2x128xf32, #tpu.memory_space<vmem>>, vector<2x128xf32>
      tpu.vector_store %arg9[%c0_101, %c0_102], %207 {strides = array<i32>} : memref<2x128xf32, #tpu.memory_space<vmem>>, vector<2x128xf32>,
    } else {
    }
    %c1_i32 = arith.constant 1 : i32
    %16 = arith.cmpi eq, %arg0, %c1_i32 : i32
    %17 = arith.extui %16 : i1 to i32
    %c0_i32_13 = arith.constant 0 : i32
    %18 = arith.cmpi ne, %17, %c0_i32_13 : i32
    scf.if %18 {
      %c0_14 = arith.constant 0 : index
      %c0_15 = arith.constant 0 : index
      %19 = vector.load %arg8[%c0_14, %c0_15] : memref<2x128xf32, #tpu.memory_space<vmem>>, vector<2x128xf32>
      %c0_16 = arith.constant 0 : index
      %c0_17 = arith.constant 0 : index
      %20 = vector.load %arg9[%c0_16, %c0_17] : memref<2x128xf32, #tpu.memory_space<vmem>>, vector<2x128xf32>
      %c14 = arith.constant 14 : index
      %c0_18 = arith.constant 0 : index
      %21 = vector.load %arg7[%c14, %c0_18] : memref<16x512xf32, #tpu.memory_space<vmem>>, vector<2x512xf32>
      %c0_19 = arith.constant 0 : index
      %c0_20 = arith.constant 0 : index
      %c0_21 = arith.constant 0 : index
      %22 = vector.load %arg4[%c0_19, %c0_20, %c0_21] : memref<1x128x512xf32, #tpu.memory_space<vmem>>, vector<1x128x512xf32>
      %23 = vector.shape_cast %22 : vector<1x128x512xf32> to vector<128x512xf32>
      %cst_22 = arith.constant dense<0.000000e+00> : vector<2x512xf32>
      %24 = tpu.matmul %19, %23, %cst_22 {dimension_numbers = #tpu.dot_dimension_numbers<[1], [0], [0], [1], [0, 0, 1, 1], [], []>} : vector<2x128xf32>, vector<128x512xf32>, vector<2x512xf32> -> vector<2x512xf32>
      %25 = arith.addf %21, %24 : vector<2x512xf32>
      %26 = vector.extract_strided_slice %25 {offsets = [0, 0], sizes = [2, 384], strides = [1, 1]} : vector<2x512xf32> to vector<2x384xf32>
      %27 = arith.negf %26 : vector<2x384xf32>
      %28 = math.exp %27 : vector<2x384xf32>
      %cst_23 = arith.constant 1.000000e+00 : f32
      %29 = vector.broadcast %cst_23 : f32 to vector<2x384xf32>
      %30 = arith.addf %29, %28 : vector<2x384xf32>
      %31 = arith.divf %29, %30 : vector<2x384xf32>
      %32 = vector.extract_strided_slice %31 {offsets = [0, 0], sizes = [2, 128], strides = [1, 1]} : vector<2x384xf32> to vector<2x128xf32>
      %33 = vector.extract_strided_slice %31 {offsets = [0, 128], sizes = [2, 128], strides = [1, 1]} : vector<2x384xf32> to vector<2x128xf32>
      %34 = vector.extract_strided_slice %31 {offsets = [0, 256], sizes = [2, 128], strides = [1, 1]} : vector<2x384xf32> to vector<2x128xf32>
      %35 = vector.extract_strided_slice %25 {offsets = [0, 384], sizes = [2, 128], strides = [1, 1]} : vector<2x512xf32> to vector<2x128xf32>
      %36 = math.tanh %35 : vector<2x128xf32>
      %37 = arith.mulf %33, %20 : vector<2x128xf32>
      %38 = arith.mulf %32, %36 : vector<2x128xf32>
      %39 = arith.addf %37, %38 : vector<2x128xf32>
      %40 = math.tanh %39 : vector<2x128xf32>
      %41 = arith.mulf %34, %40 : vector<2x128xf32>
      %c0_24 = arith.constant 0 : index
      %c0_25 = arith.constant 0 : index
      %c14_26 = arith.constant 14 : index
      %c0_27 = arith.constant 0 : index
      %42 = vector.load %arg6[%c0_24, %c0_25, %c14_26, %c0_27] : memref<1x1x16x128xf32, #tpu.memory_space<vmem>>, vector<1x1x2x128xf32>
      %43 = vector.shape_cast %42 : vector<1x1x2x128xf32> to vector<2x128xf32>
      %44 = vector.shape_cast %41 : vector<2x128xf32> to vector<1x1x2x128xf32>
      tpu.vector_store %arg6[%c0_24, %c0_25, %c14_26, %c0_27], %44 {strides = array<i32>} : memref<1x1x16x128xf32, #tpu.memory_space<vmem>>, vector<1x1x2x128xf32>,
      %c12 = arith.constant 12 : index
      %c0_28 = arith.constant 0 : index
      %45 = vector.load %arg7[%c12, %c0_28] : memref<16x512xf32, #tpu.memory_space<vmem>>, vector<2x512xf32>
      %c0_29 = arith.constant 0 : index
      %c0_30 = arith.constant 0 : index
      %c0_31 = arith.constant 0 : index
      %46 = vector.load %arg4[%c0_29, %c0_30, %c0_31] : memref<1x128x512xf32, #tpu.memory_space<vmem>>, vector<1x128x512xf32>
      %47 = vector.shape_cast %46 : vector<1x128x512xf32> to vector<128x512xf32>
      %cst_32 = arith.constant dense<0.000000e+00> : vector<2x512xf32>
      %48 = tpu.matmul %41, %47, %cst_32 {dimension_numbers = #tpu.dot_dimension_numbers<[1], [0], [0], [1], [0, 0, 1, 1], [], []>} : vector<2x128xf32>, vector<128x512xf32>, vector<2x512xf32> -> vector<2x512xf32>
      %49 = arith.addf %45, %48 : vector<2x512xf32>
      %50 = vector.extract_strided_slice %49 {offsets = [0, 0], sizes = [2, 384], strides = [1, 1]} : vector<2x512xf32> to vector<2x384xf32>
      %51 = arith.negf %50 : vector<2x384xf32>
      %52 = math.exp %51 : vector<2x384xf32>
      %cst_33 = arith.constant 1.000000e+00 : f32
      %53 = vector.broadcast %cst_33 : f32 to vector<2x384xf32>
      %54 = arith.addf %53, %52 : vector<2x384xf32>
      %55 = arith.divf %53, %54 : vector<2x384xf32>
      %56 = vector.extract_strided_slice %55 {offsets = [0, 0], sizes = [2, 128], strides = [1, 1]} : vector<2x384xf32> to vector<2x128xf32>
      %57 = vector.extract_strided_slice %55 {offsets = [0, 128], sizes = [2, 128], strides = [1, 1]} : vector<2x384xf32> to vector<2x128xf32>
      %58 = vector.extract_strided_slice %55 {offsets = [0, 256], sizes = [2, 128], strides = [1, 1]} : vector<2x384xf32> to vector<2x128xf32>
      %59 = vector.extract_strided_slice %49 {offsets = [0, 384], sizes = [2, 128], strides = [1, 1]} : vector<2x512xf32> to vector<2x128xf32>
      %60 = math.tanh %59 : vector<2x128xf32>
      %61 = arith.mulf %57, %39 : vector<2x128xf32>
      %62 = arith.mulf %56, %60 : vector<2x128xf32>
      %63 = arith.addf %61, %62 : vector<2x128xf32>
      %64 = math.tanh %63 : vector<2x128xf32>
      %65 = arith.mulf %58, %64 : vector<2x128xf32>
      %c0_34 = arith.constant 0 : index
      %c0_35 = arith.constant 0 : index
      %c12_36 = arith.constant 12 : index
      %c0_37 = arith.constant 0 : index
      %66 = vector.load %arg6[%c0_34, %c0_35, %c12_36, %c0_37] : memref<1x1x16x128xf32, #tpu.memory_space<vmem>>, vector<1x1x2x128xf32>
      %67 = vector.shape_cast %66 : vector<1x1x2x128xf32> to vector<2x128xf32>
      %68 = vector.shape_cast %65 : vector<2x128xf32> to vector<1x1x2x128xf32>
      tpu.vector_store %arg6[%c0_34, %c0_35, %c12_36, %c0_37], %68 {strides = array<i32>} : memref<1x1x16x128xf32, #tpu.memory_space<vmem>>, vector<1x1x2x128xf32>,
      %c10 = arith.constant 10 : index
      %c0_38 = arith.constant 0 : index
      %69 = vector.load %arg7[%c10, %c0_38] : memref<16x512xf32, #tpu.memory_space<vmem>>, vector<2x512xf32>
      %c0_39 = arith.constant 0 : index
      %c0_40 = arith.constant 0 : index
      %c0_41 = arith.constant 0 : index
      %70 = vector.load %arg4[%c0_39, %c0_40, %c0_41] : memref<1x128x512xf32, #tpu.memory_space<vmem>>, vector<1x128x512xf32>
      %71 = vector.shape_cast %70 : vector<1x128x512xf32> to vector<128x512xf32>
      %cst_42 = arith.constant dense<0.000000e+00> : vector<2x512xf32>
      %72 = tpu.matmul %65, %71, %cst_42 {dimension_numbers = #tpu.dot_dimension_numbers<[1], [0], [0], [1], [0, 0, 1, 1], [], []>} : vector<2x128xf32>, vector<128x512xf32>, vector<2x512xf32> -> vector<2x512xf32>
      %73 = arith.addf %69, %72 : vector<2x512xf32>
      %74 = vector.extract_strided_slice %73 {offsets = [0, 0], sizes = [2, 384], strides = [1, 1]} : vector<2x512xf32> to vector<2x384xf32>
      %75 = arith.negf %74 : vector<2x384xf32>
      %76 = math.exp %75 : vector<2x384xf32>
      %cst_43 = arith.constant 1.000000e+00 : f32
      %77 = vector.broadcast %cst_43 : f32 to vector<2x384xf32>
      %78 = arith.addf %77, %76 : vector<2x384xf32>
      %79 = arith.divf %77, %78 : vector<2x384xf32>
      %80 = vector.extract_strided_slice %79 {offsets = [0, 0], sizes = [2, 128], strides = [1, 1]} : vector<2x384xf32> to vector<2x128xf32>
      %81 = vector.extract_strided_slice %79 {offsets = [0, 128], sizes = [2, 128], strides = [1, 1]} : vector<2x384xf32> to vector<2x128xf32>
      %82 = vector.extract_strided_slice %79 {offsets = [0, 256], sizes = [2, 128], strides = [1, 1]} : vector<2x384xf32> to vector<2x128xf32>
      %83 = vector.extract_strided_slice %73 {offsets = [0, 384], sizes = [2, 128], strides = [1, 1]} : vector<2x512xf32> to vector<2x128xf32>
      %84 = math.tanh %83 : vector<2x128xf32>
      %85 = arith.mulf %81, %63 : vector<2x128xf32>
      %86 = arith.mulf %80, %84 : vector<2x128xf32>
      %87 = arith.addf %85, %86 : vector<2x128xf32>
      %88 = math.tanh %87 : vector<2x128xf32>
      %89 = arith.mulf %82, %88 : vector<2x128xf32>
      %c0_44 = arith.constant 0 : index
      %c0_45 = arith.constant 0 : index
      %c10_46 = arith.constant 10 : index
      %c0_47 = arith.constant 0 : index
      %90 = vector.load %arg6[%c0_44, %c0_45, %c10_46, %c0_47] : memref<1x1x16x128xf32, #tpu.memory_space<vmem>>, vector<1x1x2x128xf32>
      %91 = vector.shape_cast %90 : vector<1x1x2x128xf32> to vector<2x128xf32>
      %92 = vector.shape_cast %89 : vector<2x128xf32> to vector<1x1x2x128xf32>
      tpu.vector_store %arg6[%c0_44, %c0_45, %c10_46, %c0_47], %92 {strides = array<i32>} : memref<1x1x16x128xf32, #tpu.memory_space<vmem>>, vector<1x1x2x128xf32>,
      %c8 = arith.constant 8 : index
      %c0_48 = arith.constant 0 : index
      %93 = vector.load %arg7[%c8, %c0_48] : memref<16x512xf32, #tpu.memory_space<vmem>>, vector<2x512xf32>
      %c0_49 = arith.constant 0 : index
      %c0_50 = arith.constant 0 : index
      %c0_51 = arith.constant 0 : index
      %94 = vector.load %arg4[%c0_49, %c0_50, %c0_51] : memref<1x128x512xf32, #tpu.memory_space<vmem>>, vector<1x128x512xf32>
      %95 = vector.shape_cast %94 : vector<1x128x512xf32> to vector<128x512xf32>
      %cst_52 = arith.constant dense<0.000000e+00> : vector<2x512xf32>
      %96 = tpu.matmul %89, %95, %cst_52 {dimension_numbers = #tpu.dot_dimension_numbers<[1], [0], [0], [1], [0, 0, 1, 1], [], []>} : vector<2x128xf32>, vector<128x512xf32>, vector<2x512xf32> -> vector<2x512xf32>
      %97 = arith.addf %93, %96 : vector<2x512xf32>
      %98 = vector.extract_strided_slice %97 {offsets = [0, 0], sizes = [2, 384], strides = [1, 1]} : vector<2x512xf32> to vector<2x384xf32>
      %99 = arith.negf %98 : vector<2x384xf32>
      %100 = math.exp %99 : vector<2x384xf32>
      %cst_53 = arith.constant 1.000000e+00 : f32
      %101 = vector.broadcast %cst_53 : f32 to vector<2x384xf32>
      %102 = arith.addf %101, %100 : vector<2x384xf32>
      %103 = arith.divf %101, %102 : vector<2x384xf32>
      %104 = vector.extract_strided_slice %103 {offsets = [0, 0], sizes = [2, 128], strides = [1, 1]} : vector<2x384xf32> to vector<2x128xf32>
      %105 = vector.extract_strided_slice %103 {offsets = [0, 128], sizes = [2, 128], strides = [1, 1]} : vector<2x384xf32> to vector<2x128xf32>
      %106 = vector.extract_strided_slice %103 {offsets = [0, 256], sizes = [2, 128], strides = [1, 1]} : vector<2x384xf32> to vector<2x128xf32>
      %107 = vector.extract_strided_slice %97 {offsets = [0, 384], sizes = [2, 128], strides = [1, 1]} : vector<2x512xf32> to vector<2x128xf32>
      %108 = math.tanh %107 : vector<2x128xf32>
      %109 = arith.mulf %105, %87 : vector<2x128xf32>
      %110 = arith.mulf %104, %108 : vector<2x128xf32>
      %111 = arith.addf %109, %110 : vector<2x128xf32>
      %112 = math.tanh %111 : vector<2x128xf32>
      %113 = arith.mulf %106, %112 : vector<2x128xf32>
      %c0_54 = arith.constant 0 : index
      %c0_55 = arith.constant 0 : index
      %c8_56 = arith.constant 8 : index
      %c0_57 = arith.constant 0 : index
      %114 = vector.load %arg6[%c0_54, %c0_55, %c8_56, %c0_57] : memref<1x1x16x128xf32, #tpu.memory_space<vmem>>, vector<1x1x2x128xf32>
      %115 = vector.shape_cast %114 : vector<1x1x2x128xf32> to vector<2x128xf32>
      %116 = vector.shape_cast %113 : vector<2x128xf32> to vector<1x1x2x128xf32>
      tpu.vector_store %arg6[%c0_54, %c0_55, %c8_56, %c0_57], %116 {strides = array<i32>} : memref<1x1x16x128xf32, #tpu.memory_space<vmem>>, vector<1x1x2x128xf32>,
      %c6 = arith.constant 6 : index
      %c0_58 = arith.constant 0 : index
      %117 = vector.load %arg7[%c6, %c0_58] : memref<16x512xf32, #tpu.memory_space<vmem>>, vector<2x512xf32>
      %c0_59 = arith.constant 0 : index
      %c0_60 = arith.constant 0 : index
      %c0_61 = arith.constant 0 : index
      %118 = vector.load %arg4[%c0_59, %c0_60, %c0_61] : memref<1x128x512xf32, #tpu.memory_space<vmem>>, vector<1x128x512xf32>
      %119 = vector.shape_cast %118 : vector<1x128x512xf32> to vector<128x512xf32>
      %cst_62 = arith.constant dense<0.000000e+00> : vector<2x512xf32>
      %120 = tpu.matmul %113, %119, %cst_62 {dimension_numbers = #tpu.dot_dimension_numbers<[1], [0], [0], [1], [0, 0, 1, 1], [], []>} : vector<2x128xf32>, vector<128x512xf32>, vector<2x512xf32> -> vector<2x512xf32>
      %121 = arith.addf %117, %120 : vector<2x512xf32>
      %122 = vector.extract_strided_slice %121 {offsets = [0, 0], sizes = [2, 384], strides = [1, 1]} : vector<2x512xf32> to vector<2x384xf32>
      %123 = arith.negf %122 : vector<2x384xf32>
      %124 = math.exp %123 : vector<2x384xf32>
      %cst_63 = arith.constant 1.000000e+00 : f32
      %125 = vector.broadcast %cst_63 : f32 to vector<2x384xf32>
      %126 = arith.addf %125, %124 : vector<2x384xf32>
      %127 = arith.divf %125, %126 : vector<2x384xf32>
      %128 = vector.extract_strided_slice %127 {offsets = [0, 0], sizes = [2, 128], strides = [1, 1]} : vector<2x384xf32> to vector<2x128xf32>
      %129 = vector.extract_strided_slice %127 {offsets = [0, 128], sizes = [2, 128], strides = [1, 1]} : vector<2x384xf32> to vector<2x128xf32>
      %130 = vector.extract_strided_slice %127 {offsets = [0, 256], sizes = [2, 128], strides = [1, 1]} : vector<2x384xf32> to vector<2x128xf32>
      %131 = vector.extract_strided_slice %121 {offsets = [0, 384], sizes = [2, 128], strides = [1, 1]} : vector<2x512xf32> to vector<2x128xf32>
      %132 = math.tanh %131 : vector<2x128xf32>
      %133 = arith.mulf %129, %111 : vector<2x128xf32>
      %134 = arith.mulf %128, %132 : vector<2x128xf32>
      %135 = arith.addf %133, %134 : vector<2x128xf32>
      %136 = math.tanh %135 : vector<2x128xf32>
      %137 = arith.mulf %130, %136 : vector<2x128xf32>
      %c0_64 = arith.constant 0 : index
      %c0_65 = arith.constant 0 : index
      %c6_66 = arith.constant 6 : index
      %c0_67 = arith.constant 0 : index
      %138 = vector.load %arg6[%c0_64, %c0_65, %c6_66, %c0_67] : memref<1x1x16x128xf32, #tpu.memory_space<vmem>>, vector<1x1x2x128xf32>
      %139 = vector.shape_cast %138 : vector<1x1x2x128xf32> to vector<2x128xf32>
      %140 = vector.shape_cast %137 : vector<2x128xf32> to vector<1x1x2x128xf32>
      tpu.vector_store %arg6[%c0_64, %c0_65, %c6_66, %c0_67], %140 {strides = array<i32>} : memref<1x1x16x128xf32, #tpu.memory_space<vmem>>, vector<1x1x2x128xf32>,
      %c4 = arith.constant 4 : index
      %c0_68 = arith.constant 0 : index
      %141 = vector.load %arg7[%c4, %c0_68] : memref<16x512xf32, #tpu.memory_space<vmem>>, vector<2x512xf32>
      %c0_69 = arith.constant 0 : index
      %c0_70 = arith.constant 0 : index
      %c0_71 = arith.constant 0 : index
      %142 = vector.load %arg4[%c0_69, %c0_70, %c0_71] : memref<1x128x512xf32, #tpu.memory_space<vmem>>, vector<1x128x512xf32>
      %143 = vector.shape_cast %142 : vector<1x128x512xf32> to vector<128x512xf32>
      %cst_72 = arith.constant dense<0.000000e+00> : vector<2x512xf32>
      %144 = tpu.matmul %137, %143, %cst_72 {dimension_numbers = #tpu.dot_dimension_numbers<[1], [0], [0], [1], [0, 0, 1, 1], [], []>} : vector<2x128xf32>, vector<128x512xf32>, vector<2x512xf32> -> vector<2x512xf32>
      %145 = arith.addf %141, %144 : vector<2x512xf32>
      %146 = vector.extract_strided_slice %145 {offsets = [0, 0], sizes = [2, 384], strides = [1, 1]} : vector<2x512xf32> to vector<2x384xf32>
      %147 = arith.negf %146 : vector<2x384xf32>
      %148 = math.exp %147 : vector<2x384xf32>
      %cst_73 = arith.constant 1.000000e+00 : f32
      %149 = vector.broadcast %cst_73 : f32 to vector<2x384xf32>
      %150 = arith.addf %149, %148 : vector<2x384xf32>
      %151 = arith.divf %149, %150 : vector<2x384xf32>
      %152 = vector.extract_strided_slice %151 {offsets = [0, 0], sizes = [2, 128], strides = [1, 1]} : vector<2x384xf32> to vector<2x128xf32>
      %153 = vector.extract_strided_slice %151 {offsets = [0, 128], sizes = [2, 128], strides = [1, 1]} : vector<2x384xf32> to vector<2x128xf32>
      %154 = vector.extract_strided_slice %151 {offsets = [0, 256], sizes = [2, 128], strides = [1, 1]} : vector<2x384xf32> to vector<2x128xf32>
      %155 = vector.extract_strided_slice %145 {offsets = [0, 384], sizes = [2, 128], strides = [1, 1]} : vector<2x512xf32> to vector<2x128xf32>
      %156 = math.tanh %155 : vector<2x128xf32>
      %157 = arith.mulf %153, %135 : vector<2x128xf32>
      %158 = arith.mulf %152, %156 : vector<2x128xf32>
      %159 = arith.addf %157, %158 : vector<2x128xf32>
      %160 = math.tanh %159 : vector<2x128xf32>
      %161 = arith.mulf %154, %160 : vector<2x128xf32>
      %c0_74 = arith.constant 0 : index
      %c0_75 = arith.constant 0 : index
      %c4_76 = arith.constant 4 : index
      %c0_77 = arith.constant 0 : index
      %162 = vector.load %arg6[%c0_74, %c0_75, %c4_76, %c0_77] : memref<1x1x16x128xf32, #tpu.memory_space<vmem>>, vector<1x1x2x128xf32>
      %163 = vector.shape_cast %162 : vector<1x1x2x128xf32> to vector<2x128xf32>
      %164 = vector.shape_cast %161 : vector<2x128xf32> to vector<1x1x2x128xf32>
      tpu.vector_store %arg6[%c0_74, %c0_75, %c4_76, %c0_77], %164 {strides = array<i32>} : memref<1x1x16x128xf32, #tpu.memory_space<vmem>>, vector<1x1x2x128xf32>,
      %c2 = arith.constant 2 : index
      %c0_78 = arith.constant 0 : index
      %165 = vector.load %arg7[%c2, %c0_78] : memref<16x512xf32, #tpu.memory_space<vmem>>, vector<2x512xf32>
      %c0_79 = arith.constant 0 : index
      %c0_80 = arith.constant 0 : index
      %c0_81 = arith.constant 0 : index
      %166 = vector.load %arg4[%c0_79, %c0_80, %c0_81] : memref<1x128x512xf32, #tpu.memory_space<vmem>>, vector<1x128x512xf32>
      %167 = vector.shape_cast %166 : vector<1x128x512xf32> to vector<128x512xf32>
      %cst_82 = arith.constant dense<0.000000e+00> : vector<2x512xf32>
      %168 = tpu.matmul %161, %167, %cst_82 {dimension_numbers = #tpu.dot_dimension_numbers<[1], [0], [0], [1], [0, 0, 1, 1], [], []>} : vector<2x128xf32>, vector<128x512xf32>, vector<2x512xf32> -> vector<2x512xf32>
      %169 = arith.addf %165, %168 : vector<2x512xf32>
      %170 = vector.extract_strided_slice %169 {offsets = [0, 0], sizes = [2, 384], strides = [1, 1]} : vector<2x512xf32> to vector<2x384xf32>
      %171 = arith.negf %170 : vector<2x384xf32>
      %172 = math.exp %171 : vector<2x384xf32>
      %cst_83 = arith.constant 1.000000e+00 : f32
      %173 = vector.broadcast %cst_83 : f32 to vector<2x384xf32>
      %174 = arith.addf %173, %172 : vector<2x384xf32>
      %175 = arith.divf %173, %174 : vector<2x384xf32>
      %176 = vector.extract_strided_slice %175 {offsets = [0, 0], sizes = [2, 128], strides = [1, 1]} : vector<2x384xf32> to vector<2x128xf32>
      %177 = vector.extract_strided_slice %175 {offsets = [0, 128], sizes = [2, 128], strides = [1, 1]} : vector<2x384xf32> to vector<2x128xf32>
      %178 = vector.extract_strided_slice %175 {offsets = [0, 256], sizes = [2, 128], strides = [1, 1]} : vector<2x384xf32> to vector<2x128xf32>
      %179 = vector.extract_strided_slice %169 {offsets = [0, 384], sizes = [2, 128], strides = [1, 1]} : vector<2x512xf32> to vector<2x128xf32>
      %180 = math.tanh %179 : vector<2x128xf32>
      %181 = arith.mulf %177, %159 : vector<2x128xf32>
      %182 = arith.mulf %176, %180 : vector<2x128xf32>
      %183 = arith.addf %181, %182 : vector<2x128xf32>
      %184 = math.tanh %183 : vector<2x128xf32>
      %185 = arith.mulf %178, %184 : vector<2x128xf32>
      %c0_84 = arith.constant 0 : index
      %c0_85 = arith.constant 0 : index
      %c2_86 = arith.constant 2 : index
      %c0_87 = arith.constant 0 : index
      %186 = vector.load %arg6[%c0_84, %c0_85, %c2_86, %c0_87] : memref<1x1x16x128xf32, #tpu.memory_space<vmem>>, vector<1x1x2x128xf32>
      %187 = vector.shape_cast %186 : vector<1x1x2x128xf32> to vector<2x128xf32>
      %188 = vector.shape_cast %185 : vector<2x128xf32> to vector<1x1x2x128xf32>
      tpu.vector_store %arg6[%c0_84, %c0_85, %c2_86, %c0_87], %188 {strides = array<i32>} : memref<1x1x16x128xf32, #tpu.memory_space<vmem>>, vector<1x1x2x128xf32>,
      %c0_88 = arith.constant 0 : index
      %c0_89 = arith.constant 0 : index
      %189 = vector.load %arg7[%c0_88, %c0_89] : memref<16x512xf32, #tpu.memory_space<vmem>>, vector<2x512xf32>
      %c0_90 = arith.constant 0 : index
      %c0_91 = arith.constant 0 : index
      %c0_92 = arith.constant 0 : index
      %190 = vector.load %arg4[%c0_90, %c0_91, %c0_92] : memref<1x128x512xf32, #tpu.memory_space<vmem>>, vector<1x128x512xf32>
      %191 = vector.shape_cast %190 : vector<1x128x512xf32> to vector<128x512xf32>
      %cst_93 = arith.constant dense<0.000000e+00> : vector<2x512xf32>
      %192 = tpu.matmul %185, %191, %cst_93 {dimension_numbers = #tpu.dot_dimension_numbers<[1], [0], [0], [1], [0, 0, 1, 1], [], []>} : vector<2x128xf32>, vector<128x512xf32>, vector<2x512xf32> -> vector<2x512xf32>
      %193 = arith.addf %189, %192 : vector<2x512xf32>
      %194 = vector.extract_strided_slice %193 {offsets = [0, 0], sizes = [2, 384], strides = [1, 1]} : vector<2x512xf32> to vector<2x384xf32>
      %195 = arith.negf %194 : vector<2x384xf32>
      %196 = math.exp %195 : vector<2x384xf32>
      %cst_94 = arith.constant 1.000000e+00 : f32
      %197 = vector.broadcast %cst_94 : f32 to vector<2x384xf32>
      %198 = arith.addf %197, %196 : vector<2x384xf32>
      %199 = arith.divf %197, %198 : vector<2x384xf32>
      %200 = vector.extract_strided_slice %199 {offsets = [0, 0], sizes = [2, 128], strides = [1, 1]} : vector<2x384xf32> to vector<2x128xf32>
      %201 = vector.extract_strided_slice %199 {offsets = [0, 128], sizes = [2, 128], strides = [1, 1]} : vector<2x384xf32> to vector<2x128xf32>
      %202 = vector.extract_strided_slice %199 {offsets = [0, 256], sizes = [2, 128], strides = [1, 1]} : vector<2x384xf32> to vector<2x128xf32>
      %203 = vector.extract_strided_slice %193 {offsets = [0, 384], sizes = [2, 128], strides = [1, 1]} : vector<2x512xf32> to vector<2x128xf32>
      %204 = math.tanh %203 : vector<2x128xf32>
      %205 = arith.mulf %201, %183 : vector<2x128xf32>
      %206 = arith.mulf %200, %204 : vector<2x128xf32>
      %207 = arith.addf %205, %206 : vector<2x128xf32>
      %208 = math.tanh %207 : vector<2x128xf32>
      %209 = arith.mulf %202, %208 : vector<2x128xf32>
      %c0_95 = arith.constant 0 : index
      %c0_96 = arith.constant 0 : index
      %c0_97 = arith.constant 0 : index
      %c0_98 = arith.constant 0 : index
      %210 = vector.load %arg6[%c0_95, %c0_96, %c0_97, %c0_98] : memref<1x1x16x128xf32, #tpu.memory_space<vmem>>, vector<1x1x2x128xf32>
      %211 = vector.shape_cast %210 : vector<1x1x2x128xf32> to vector<2x128xf32>
      %212 = vector.shape_cast %209 : vector<2x128xf32> to vector<1x1x2x128xf32>
      tpu.vector_store %arg6[%c0_95, %c0_96, %c0_97, %c0_98], %212 {strides = array<i32>} : memref<1x1x16x128xf32, #tpu.memory_space<vmem>>, vector<1x1x2x128xf32>,
      %c0_99 = arith.constant 0 : index
      %c0_100 = arith.constant 0 : index
      %213 = vector.load %arg8[%c0_99, %c0_100] : memref<2x128xf32, #tpu.memory_space<vmem>>, vector<2x128xf32>
      tpu.vector_store %arg8[%c0_99, %c0_100], %209 {strides = array<i32>} : memref<2x128xf32, #tpu.memory_space<vmem>>, vector<2x128xf32>,
      %c0_101 = arith.constant 0 : index
      %c0_102 = arith.constant 0 : index
      %214 = vector.load %arg9[%c0_101, %c0_102] : memref<2x128xf32, #tpu.memory_space<vmem>>, vector<2x128xf32>
      tpu.vector_store %arg9[%c0_101, %c0_102], %207 {strides = array<i32>} : memref<2x128xf32, #tpu.memory_space<vmem>>, vector<2x128xf32>,
    } else {
    }
    return
  }
  func.func @transform_0(%arg0: i32, %arg1: i32) -> (i32, i32, i32) {
    %c2_i32 = arith.constant 2 : i32
    %0 = arith.muli %c2_i32, %arg1 : i32
    %c0_i32 = arith.constant 0 : i32
    %1 = arith.subi %c0_i32, %0 : i32
    %2 = arith.muli %arg0, %1 : i32
    %3 = arith.addi %arg1, %2 : i32
    %c0_i32_0 = arith.constant 0 : i32
    %c0_i32_1 = arith.constant 0 : i32
    %c0_i32_2 = arith.constant 0 : i32
    return %3, %c0_i32_0, %c0_i32_1 : i32, i32, i32
  }
  func.func @transform_1(%arg0: i32, %arg1: i32) -> (i32, i32, i32) {
    %c0_i32 = arith.constant 0 : i32
    %c0_i32_0 = arith.constant 0 : i32
    %c0_i32_1 = arith.constant 0 : i32
    return %arg0, %c0_i32, %c0_i32_0 : i32, i32, i32
  }
  func.func @transform_2(%arg0: i32, %arg1: i32) -> (i32, i32, i32) {
    %c0_i32 = arith.constant 0 : i32
    %c0_i32_0 = arith.constant 0 : i32
    %c0_i32_1 = arith.constant 0 : i32
    return %arg0, %c0_i32, %c0_i32_0 : i32, i32, i32
  }
  func.func @transform_3(%arg0: i32, %arg1: i32) -> (i32, i32, i32) {
    %c0_i32 = arith.constant 0 : i32
    %c0_i32_0 = arith.constant 0 : i32
    %c0_i32_1 = arith.constant 0 : i32
    return %arg0, %c0_i32, %c0_i32_0 : i32, i32, i32
  }
  func.func @transform_4(%arg0: i32, %arg1: i32) -> (i32, i32, i32, i32) {
    %c2_i32 = arith.constant 2 : i32
    %0 = arith.muli %c2_i32, %arg1 : i32
    %c0_i32 = arith.constant 0 : i32
    %1 = arith.subi %c0_i32, %0 : i32
    %2 = arith.muli %arg0, %1 : i32
    %3 = arith.addi %arg1, %2 : i32
    %c0_i32_0 = arith.constant 0 : i32
    %c0_i32_1 = arith.constant 0 : i32
    %c0_i32_2 = arith.constant 0 : i32
    return %arg0, %3, %c0_i32_0, %c0_i32_1 : i32, i32, i32, i32
  }
}

</mosaic_0001>

<bundles_post_ra>
// kernel: tpu_custom_call.1
= control target key start
LH: loop header
LB: loop body
LE: loop exit
PB: predicated region body
PF: predicated region fallthrough
CT: control target
= control target key end

     0   :  { %s7650_s0 = inlined_call_operand.hbm [shape: f32[1,16,32], index: 0, kind: input, shape index: {}]   ;;  %s7651_s1 = inlined_call_operand.hbm [shape: f32[2,32,512], index: 1, kind: input, shape index: {}]   ;;  %s7652_s2 = inlined_call_operand.hbm [shape: f32[2,128,512], index: 2, kind: input, shape index: {}]   ;;  %s7653_s3 = inlined_call_operand.hbm [shape: f32[2,1,512], index: 3, kind: input, shape index: {}]   ;;  %s7654_s4 = inlined_call_operand.hbm [shape: f32[2,1,16,128], index: 4, kind: output, shape index: {}]  }
   0x1   :  { %7735 = sst [smem:[#allocation64_spill]] %s7650_s0 }
   0x2   :  { %7736 = sst [smem:[#allocation65_spill]] %s7651_s1 }
   0x3   :  { %9 = vsyncpa [#allocation6], 0 }
   0x4   :  { %11 = vsyncpa [#allocation6 + $0x1], 0 }
   0x5   :  { %12 = vsyncpa [#allocation9], 0 }
   0x6   :  { %14 = vsyncpa [#allocation9 + $0x1], 0 }
   0x7   :  { %15 = vsyncpa [#allocation12], 0 }
   0x8   :  { %17 = vsyncpa [#allocation12 + $0x1], 0 }
   0x9   :  { %18 = vsyncpa [#allocation7], 0 }
   0xa   :  { %20 = vsyncpa [#allocation7 + $0x1], 0  ;;  %s5064_s15 = smov 0   ;;  %s5066_s16 = smov 0  }
   0xb   :  { %s5068_s17 = smov 0   ;;  %s5070_s18 = smov 0  }
   0xc   :  { %s5072_s19 = smov 0   ;;  %s5074_s20 = smov 0  }
   0xd LB: > { %7737 = sst [smem:[#allocation18_spill]] %s5009_s15  ;;  %s5095_s21 = sadd.s32 4294967295, %s5029_s20   ;;  %s5029_s20 = sphi %s5074_s20, %s26_s20   ;;  %s5025_s19 = sphi %s5072_s19, %s7876_s19   ;;  %s5021_s18 = sphi %s5070_s18, %s7875_s18   ;;  %s5017_s17 = sphi %s5068_s17, %s7871_s17   ;;  %s5013_s16 = sphi %s5066_s16, %s7874_s16   ;;  %s5009_s15 = sphi %s5064_s15, %s7873_s15  }
   0xe   : > { %7738 = sst [smem:[#allocation19_spill]] %s5017_s17  ;;  %s4390_s22 = sadd.s32 4294967294, %s5029_s20  }
   0xf   : > { %7739 = sst [smem:[#allocation20_spill]] %s5029_s20  ;;  %s38_s23 = sadd.s32 1, %s5025_s19 }
  0x10   : > { %s79_s24 = sadd.s32 1, %s5017_s17  ;;  %p40_p0 = scmp.ge.s32.totalorder %s38_s23, 2 }
  0x11   : > { %p86_p1 = scmp.ne.s32.totalorder %s5017_s17, %s5013_s16  ;;  %p87_p2 = scmp.eq.s32.totalorder %s5029_s20, 0 }
  0x12   : > { %p92_p3 = scmp.ne.s32.totalorder %s5013_s16, %s5009_s15  ;;  %s7878_s23 = smov (%p40_p0, %s38_s23), 0 }
  0x13   : > { %7740 = sst [smem:[#allocation21_spill]] %s7878_s23  ;;  %p5109_p4 = por %p87_p2, %p86_p1 }
  0x14   : > { %p93_p5 = scmp.eq.s32.totalorder %s5095_s21, 0  ;;  %s76_s26 = ssub.s32 %s5025_s19, %s7878_s23 }
  0x15   : > { %p178_p6 = scmp.eq.s32.totalorder %s5095_s21, 1  ;;  %p77_p7 = scmp.eq.s32.totalorder %s76_s26, 0 }
  0x16   : > { %p5119_p8 = por %p93_p5, %p92_p3  ;;  %p184_p10 = scmp.eq.s32.totalorder %s4390_s22, 1 }
  0x17   : > { %p5123_p9 = por %p178_p6, %p86_p1  ;;  %p4392_p12 = scmp.ge.s32.totalorder %s5029_s20, 2 }
  0x18   : > { %s5128_s29 = scalar_select %p77_p7, %s5017_s17, %s79_s24  }
  0x19   : > { %p5130_p11 = por %p184_p10, %p92_p3  ;;  %p4503_p13 = scmp.lt.s32.totalorder %s5029_s20, 2 }
  0x1a   : > { %7744 = sst [smem:[#allocation22_spill]] %s5128_s29  ;;  %s230_s5 = sand.u32 1, %s5029_s20  }
  0x1b   : > { %s7745_s30 = scalar_select %p5130_p11, 1, 0 }
  0x1c   : > { %s5138_s6 = sand.u32 1, %s5017_s17   ;;  %s4471_s8 = sshll.u32 %s5025_s19, 7 }
  0x1d   : > { %7746 = sst [smem:[#allocation23_spill]] %s7745_s30  ;;  %s4394_s7 = sshll.u32 %s5138_s6, 7 }
  0x1e   : > { %s7747_s1 = sld [smem:[#allocation65_spill]]  ;;  %s234_s12 = scalar_lea.vmem [#allocation8], %s4394_s7 }
  0x1f   : > { %s242_s13 = sshll.u32 %s234_s12, 4  ;;  %p5149_p0 = pnand %p4503_p13, %p5109_p4  ;;  %s243_s13 = int_to_ptr.vmem [resolvable:$true] %s242_s13 }
  0x20   : > { %p4402_p1 = scmp.ge.s32.totalorder %s5029_s20, 1  ;;  %s231_s24 = scalar_lea.sflag [#allocation9], %s230_s5 }
  0x21   : > { %s5031_s26 = smov 512   ;;  %p291_p3 = scmp.lt.s32.totalorder %s5029_s20, 3 }
  0x22   : > { %s7749_s0 = sld [smem:[#allocation64_spill]]  ;;  %p4487_p4 = pnand %p4503_p13, %p87_p2 }
  0x23   : > { %p5160_p6 = pnand %p4402_p1, %p291_p3  ;;  %s5033_s5 = smov [#allocation5]  }
  0x24   : > { %s239_s11 = scalar_lea.hbm %s7747_s1, %s4471_s8  ;;  %s5032_s8 = smov 32  }
  0x25   : > { %s240_s14 = sshll.u32 %s239_s11, 4  ;;  %s220_s11 = sshll.u32 %s5033_s5, 4  ;;  %s241_s14 = int_to_ptr.hbm [resolvable:$true] %s240_s14  ;;  %s221_s11 = int_to_ptr.vmem [resolvable:$true] %s220_s11 }
  0x26   : > { %4492 = dma.hbm_to_vmem [thread:$0]  (!%p5149_p0), %s241_s14, 2048, %s243_s13, %s231_s24, %s5031_s26, %s5031_s26, %s5032_s8  }
  0x27   : > { %s4397_s12 = sshll.u32 %s5138_s6, 9  ;;  %s5034_s13 = smov 128  }
  0x28   : > { %s218_s10 = sshll.u32 %s7749_s0, 4  ;;  %s5035_s14 = smov 8   ;;  %s219_s10 = int_to_ptr.hbm [resolvable:$true] %s218_s10 }
  0x29   : > { %4489 = dma.hbm_to_vmem [thread:$0]  (!%p4487_p4), %s219_s10, 256, %s221_s11, [#allocation6], %s5034_s13, %s5034_s13, %s5035_s14  }
  0x2a   : > { %s4472_s7 = sshll.u32 %s5025_s19, 9  ;;  %s256_s23 = scalar_lea.vmem [#allocation10], %s4397_s12 }
  0x2b   : > { %s261_s1 = scalar_lea.hbm %s7652_s2, %s4472_s7  ;;  %s264_s29 = sshll.u32 %s256_s23, 4  ;;  %s265_s29 = int_to_ptr.vmem [resolvable:$true] %s264_s29 }
  0x2c   : > { %s262_s17 = sshll.u32 %s261_s1, 4  ;;  %s4400_s5 = sshll.u32 %s5138_s6, 2  ;;  %s263_s17 = int_to_ptr.hbm [resolvable:$true] %s262_s17 }
  0x2d   : > { %4495 = dma.hbm_to_vmem [thread:$0]  (!%p5149_p0), %s263_s17, 8192, %s265_s29, %s231_s24, %s5031_s26, %s5031_s26, %s5032_s8  }
  0x2e   : > { %s4401_s20 = sshll.u32 %s5025_s19, 2  ;;  %s278_s13 = scalar_lea.vmem [#allocation11], %s4400_s5 }
  0x2f   : > { %s282_s10 = scalar_lea.hbm %s7653_s3, %s4401_s20  ;;  %s286_s14 = sshll.u32 %s278_s13, 4  ;;  %s287_s14 = int_to_ptr.vmem [resolvable:$true] %s286_s14 }
  0x30   : > { %s284_s11 = sshll.u32 %s282_s10, 4  ;;  %s275_s0 = scalar_lea.sflag [#allocation12], %s5138_s6  ;;  %s285_s11 = int_to_ptr.hbm [resolvable:$true] %s284_s11 }
  0x31   : > { %4498 = dma.hbm_to_vmem [thread:$0]  (!%p5149_p0), %s285_s11, 64, %s287_s14, %s275_s0  }
  0x32   : > { %295 = sbr.rel (%p5160_p6) target bundleno = 3073 (0xc01), region = 36 }
  0x37   : > { %4992 = dma.done.wait (%p93_p5), [#allocation6], 256  }
  0x38   : > { %4994 = vsyncadd (%p93_p5), [#allocation6], 4294967040  ;;  %s307_s1 = sand.u32 1, %s5095_s21   ;;  %s5191_s15 = sand.u32 1, %s5013_s16  }
  0x39   : > { %s4404_s17 = sshll.u32 %s5191_s15, 7  ;;  %s308_s20 = scalar_lea.sflag [#allocation9], %s307_s1 }
  0x3a   : > { %s5194_s23 = scalar_lea.vmem [#allocation8], %s4404_s17 }
  0x3b   : > { %4996 = dma.done.wait (%p5119_p8), %s308_s20, 10240  }
  0x3c   : > { %4998 = vsyncadd (%p5119_p8), %s308_s20, 4294957056  ;;  %s4405_s29 = sshll.u32 %s5191_s15, 9  ;;  %s4406_s30 = sshll.u32 %s5191_s15, 2 }
  0x3d   : > { %s5202_s6 = scalar_lea.vmem [#allocation10], %s4405_s29  ;;  %s328_s21 = scalar_lea.sflag [#allocation12], %s5191_s15 }
  0x3e   : > { %s5205_s22 = scalar_lea.vmem [#allocation11], %s4406_s30 }
  0x3f   : > { %5000 = dma.done.wait (%p5119_p8), %s328_s21, 64  }
  0x40   : > { %5002 = vsyncadd (%p5119_p8), %s328_s21, 4294967232  ;;  %s4407_s24 = sshll.u32 %s5191_s15, 4  ;;  %v5036_v0 = vmov 0.0   ;;  %v402_v1 = vld [vmem:[%s5194_s23 + $0x70] sm:$0xff]  ;;  %v403_v2 = vld [vmem:[%s5194_s23 + $0x78] sm:$0xff]  ;;  %vm414_vm0 = vcmask 261120  }
  0x41   : > { %384 = vst [vmem:[#allocation3] sm:$0x3] %v5036_v0  ;;  %v398_v3 = vld [vmem:[%s5194_s23 + $0x50] sm:$0xff]  ;;  %479 = vmatpush.msra.mxu2 %v402_v1  ;;  %502 = vmatpush.msra.mxu3 %v403_v2  ;;  %v399_v4 = vld [vmem:[%s5194_s23 + $0x58] sm:$0xff]  ;;  %v400_v7 = vld [vmem:[%s5194_s23 + $0x60] sm:$0xff]  ;;  %s5239_s27 = scalar_lea.vmem [#allocation13], %s4407_s24 }
  0x42   : > { %385 = vst [vmem:[#allocation4] sm:$0x3] %v5036_v0  ;;  %v394_v5 = vld [vmem:[%s5194_s23 + $0x30] sm:$0xff]  ;;  %v395_v6 = vld [vmem:[%s5194_s23 + $0x38] sm:$0xff]  ;;  %v401_v8 = vld [vmem:[%s5194_s23 + $0x68] sm:$0xff]  ;;  %433 = vmatpush.msra.mxu0 %v400_v7  ;;  %p4416_p2 = scmp.ne.s32.totalorder %s5021_s18, 0 }
  0x43   : > { %480 = vmatpush.msra.mxu2 %v398_v3  ;;  %503 = vmatpush.msra.mxu3 %v399_v4  ;;  %v396_v9 = vld [vmem:[%s5194_s23 + $0x40] sm:$0xff]  ;;  %v390_v10 = vld [vmem:[%s5194_s23 + $0x10] sm:$0xff]  ;;  %v391_v11 = vld [vmem:[%s5194_s23 + $0x18] sm:$0xff] }
  0x44   : > { %456 = vmatpush.msra.mxu1 %v401_v8  ;;  %v397_v12 = vld [vmem:[%s5194_s23 + $0x48] sm:$0xff]  ;;  %v386_v13 = vld [vmem:[#allocation5] sm:$0xff]  ;;  %434 = vmatpush.msra.mxu0 %v396_v9 }
  0x45   : > { %481 = vmatpush.msra.mxu2 %v394_v5  ;;  %504 = vmatpush.msra.mxu3 %v395_v6  ;;  %v392_v14 = vld [vmem:[%s5194_s23 + $0x20] sm:$0xff]  ;;  %v393_v15 = vld [vmem:[%s5194_s23 + $0x28] sm:$0xff] }
  0x46   : > { %457 = vmatpush.msra.mxu1 %v397_v12  ;;  %v388_v16 = vld [vmem:[%s5194_s23] sm:$0xff]  ;;  %v389_v17 = vld [vmem:[%s5194_s23 + $0x8] sm:$0xff]  ;;  %435 = vmatpush.msra.mxu0 %v392_v14 }
  0x47   : > { %482 = vmatpush.msra.mxu2 %v390_v10  ;;  %505 = vmatpush.msra.mxu3 %v391_v11  ;;  %v387_v18 = vld [vmem:[#allocation5 + $0x8] sm:$0xff]  ;;  %v404_v19 = vld [vmem:[%s5205_s22] sm:$0xf] }
  0x48   : > { %4412 = vmatmul.msk.f32.vlgmr.msra.gmra.mxu2 %vm414_vm0, %v386_v13  ;;  %4414 = vmatmul.msk.f32.vlgmr.msra.gmra.mxu3 %vm414_vm0, %v386_v13  ;;  %v406_v20 = vperm.slane %v404_v19, 0  ;;  %v407_v21 = vperm.slane %v404_v19, 1  ;;  %v408_v22 = vperm.slane %v404_v19, 2  ;;  %v409_v23 = vperm.slane %v404_v19, 3 }
  0x49   : > { %458 = vmatpush.msra.mxu1 %v393_v15  ;;  %436 = vmatpush.msra.mxu0 %v388_v16 }
  0x4a   : > { %4408 = vmatmul.msk.f32.vlgmr.msra.gmra.mxu0 %vm414_vm0, %v386_v13 }
  0x4b   : > { %459 = vmatpush.msra.mxu1 %v389_v17 }
  0x4c   : > { %4410 = vmatmul.msk.f32.vlgmr.msra.gmra.mxu1 %vm414_vm0, %v386_v13 }
  0x50   : > { %4413 = vmatmul.msk.f32.gmra.mxu2 %vm414_vm0, %v387_v18  ;;  %4415 = vmatmul.msk.f32.gmra.mxu3 %vm414_vm0, %v387_v18 }
  0x52   : > { %4409 = vmatmul.msk.f32.gmra.mxu0 %vm414_vm0, %v387_v18 }
  0x54   : > { %4411 = vmatmul.msk.f32.gmra.mxu1 %vm414_vm0, %v387_v18 }
  0xc7   : > { %v438_v24 = vpop.f32.mrf.mxu0 }
  0xc8   : > { %v439_v26 = vadd.f32 %v438_v24, %v406_v20 }
  0xc9   : > { %v461_v25 = vpop.f32.mrf.mxu1 }
  0xca   : > { %v462_v27 = vadd.f32 %v461_v25, %v407_v21  ;;  %513 = vst [vmem:[#allocation2 + $0x30] sm:$0xff] %v439_v26 }
  0xcb   : > { %v484_v28 = vpop.f32.mrf.mxu2  ;;  %v507_v29 = vpop.f32.mrf.mxu3 }
  0xcc   : > { %v485_v30 = vadd.f32 %v484_v28, %v408_v22  ;;  %v508_v31 = vadd.f32 %v507_v29, %v409_v23  ;;  %514 = vst [vmem:[#allocation2] sm:$0xff] %v462_v27 }
  0xce   : > { %515 = vst [vmem:[#allocation2 + $0x18] sm:$0xff] %v485_v30 }
  0xcf   : > { %516 = vst [vmem:[#allocation2 + $0x10] sm:$0xff] %v508_v31  ;;  %v441_v32 = vpop.f32.mrf.mxu0 }
  0xd0   : > { %v442_v34 = vadd.f32 %v441_v32, %v406_v20 }
  0xd1   : > { %v464_v33 = vpop.f32.mrf.mxu1 }
  0xd2   : > { %v465_v35 = vadd.f32 %v464_v33, %v407_v21  ;;  %517 = vst [vmem:[#allocation2 + $0x8] sm:$0xff] %v442_v34 }
  0xd3   : > { %v487_v36 = vpop.f32.mrf.mxu2  ;;  %v510_v37 = vpop.f32.mrf.mxu3  ;;  %524 = sbr.rel (%p4416_p2) target bundleno = 1632 (0x660), region = 60 }
  0xd4   : > { %v488_v38 = vadd.f32 %v487_v36, %v408_v22  ;;  %v511_v39 = vadd.f32 %v510_v37, %v409_v23  ;;  %518 = vst [vmem:[#allocation2 + $0x20] sm:$0xff] %v465_v35 }
  0xd6   : > { %519 = vst [vmem:[#allocation2 + $0x28] sm:$0xff] %v488_v38 }
  0xd7   : > { %520 = vst [vmem:[#allocation2 + $0x38] sm:$0xff] %v511_v39 }
  0xd8   : > { %v5243_v40 = vld [vmem:[%s5202_s6 + $0x1e0] sm:$0xff]  ;;  %v5246_v41 = vld [vmem:[%s5202_s6 + $0x1e8] sm:$0xff]  ;;  %v5249_v42 = vld [vmem:[%s5202_s6 + $0x1f0] sm:$0xff] }
  0xd9   : > { %7751 = vst [vmem:[#allocation24_spill] sm:$0xff] %v5243_v40  ;;  %595 = vmatpush.msra.mxu0 %v5243_v40  ;;  %615 = vmatpush.msra.mxu1 %v5246_v41  ;;  %v5254_v43 = vld [vmem:[%s5202_s6 + $0x1c0] sm:$0xff]  ;;  %v5257_v44 = vld [vmem:[%s5202_s6 + $0x1c8] sm:$0xff]  ;;  %v5260_v45 = vld [vmem:[%s5202_s6 + $0x1d0] sm:$0xff] }
  0xda   : > { %635 = vmatpush.msra.mxu2 %v5249_v42  ;;  %v5264_v46 = vld [vmem:[%s5202_s6 + $0x1a0] sm:$0xff]  ;;  %v5267_v47 = vld [vmem:[%s5202_s6 + $0x1a8] sm:$0xff]  ;;  %v5272_v48 = vld [vmem:[%s5202_s6 + $0x1b0] sm:$0xff] }
  0xdb   : > { %596 = vmatpush.msra.mxu0 %v5254_v43  ;;  %616 = vmatpush.msra.mxu1 %v5257_v44  ;;  %v5276_v49 = vld [vmem:[%s5202_s6 + $0x180] sm:$0xff]  ;;  %v5279_v50 = vld [vmem:[%s5202_s6 + $0x188] sm:$0xff]  ;;  %v5284_v51 = vld [vmem:[%s5202_s6 + $0x190] sm:$0xff] }
  0xdc   : > { %636 = vmatpush.msra.mxu2 %v5260_v45  ;;  %v5288_v52 = vld [vmem:[%s5202_s6 + $0x160] sm:$0xff]  ;;  %v5291_v53 = vld [vmem:[%s5202_s6 + $0x168] sm:$0xff]  ;;  %v5296_v54 = vld [vmem:[%s5202_s6 + $0x170] sm:$0xff] }
  0xdd   : > { %597 = vmatpush.msra.mxu0 %v5264_v46  ;;  %617 = vmatpush.msra.mxu1 %v5267_v47  ;;  %v5300_v55 = vld [vmem:[%s5202_s6 + $0x140] sm:$0xff]  ;;  %v5303_v56 = vld [vmem:[%s5202_s6 + $0x148] sm:$0xff]  ;;  %v5306_v57 = vld [vmem:[%s5202_s6 + $0x1f8] sm:$0xff] }
  0xde   : > { %637 = vmatpush.msra.mxu2 %v5272_v48  ;;  %v5311_v58 = vld [vmem:[%s5202_s6 + $0x150] sm:$0xff]  ;;  %v5314_v59 = vld [vmem:[%s5202_s6 + $0x1d8] sm:$0xff]  ;;  %v5318_v60 = vld [vmem:[%s5202_s6 + $0x120] sm:$0xff]  ;;  %655 = vmatpush.msra.mxu3 %v5306_v57 }
  0xdf   : > { %598 = vmatpush.msra.mxu0 %v5276_v49  ;;  %618 = vmatpush.msra.mxu1 %v5279_v50  ;;  %v5321_v61 = vld [vmem:[%s5202_s6 + $0x128] sm:$0xff]  ;;  %v5327_v62 = vld [vmem:[%s5202_s6 + $0x130] sm:$0xff]  ;;  %v5330_v63 = vld [vmem:[%s5202_s6 + $0x1b8] sm:$0xff] }
  0xe0   : > { %638 = vmatpush.msra.mxu2 %v5284_v51  ;;  %v5334_v0 = vld [vmem:[%s5202_s6 + $0x100] sm:$0xff]  ;;  %v5337_v1 = vld [vmem:[%s5202_s6 + $0x108] sm:$0xff]  ;;  %656 = vmatpush.msra.mxu3 %v5314_v59  ;;  %v5343_v2 = vld [vmem:[%s5202_s6 + $0x110] sm:$0xff] }
  0xe1   : > { %599 = vmatpush.msra.mxu0 %v5288_v52  ;;  %619 = vmatpush.msra.mxu1 %v5291_v53  ;;  %v5346_v3 = vld [vmem:[%s5202_s6 + $0x198] sm:$0xff]  ;;  %v5350_v4 = vld [vmem:[%s5202_s6 + $0xe0] sm:$0xff]  ;;  %v5353_v5 = vld [vmem:[%s5202_s6 + $0xe8] sm:$0xff] }
  0xe2   : > { %639 = vmatpush.msra.mxu2 %v5296_v54  ;;  %657 = vmatpush.msra.mxu3 %v5330_v63  ;;  %v5359_v6 = vld [vmem:[%s5202_s6 + $0xf0] sm:$0xff]  ;;  %v5362_v7 = vld [vmem:[%s5202_s6 + $0x178] sm:$0xff]  ;;  %v5366_v8 = vld [vmem:[%s5202_s6 + $0xc0] sm:$0xff] }
  0xe3   : > { %600 = vmatpush.msra.mxu0 %v5300_v55  ;;  %620 = vmatpush.msra.mxu1 %v5303_v56  ;;  %v5369_v9 = vld [vmem:[%s5202_s6 + $0xc8] sm:$0xff]  ;;  %v5375_v10 = vld [vmem:[%s5202_s6 + $0xd0] sm:$0xff]  ;;  %v5378_v11 = vld [vmem:[%s5202_s6 + $0x158] sm:$0xff] }
  0xe4   : > { %640 = vmatpush.msra.mxu2 %v5311_v58  ;;  %658 = vmatpush.msra.mxu3 %v5346_v3  ;;  %v5382_v12 = vld [vmem:[%s5202_s6 + $0xa0] sm:$0xff]  ;;  %v5385_v13 = vld [vmem:[%s5202_s6 + $0xa8] sm:$0xff]  ;;  %v5391_v14 = vld [vmem:[%s5202_s6 + $0xb0] sm:$0xff] }
  0xe5   : > { %601 = vmatpush.msra.mxu0 %v5318_v60  ;;  %621 = vmatpush.msra.mxu1 %v5321_v61  ;;  %v5394_v15 = vld [vmem:[%s5202_s6 + $0x138] sm:$0xff]  ;;  %v5398_v16 = vld [vmem:[%s5202_s6 + $0x80] sm:$0xff]  ;;  %v5401_v17 = vld [vmem:[%s5202_s6 + $0x88] sm:$0xff] }
  0xe6   : > { %641 = vmatpush.msra.mxu2 %v5327_v62  ;;  %659 = vmatpush.msra.mxu3 %v5362_v7  ;;  %v5407_v18 = vld [vmem:[%s5202_s6 + $0x90] sm:$0xff]  ;;  %v5410_v19 = vld [vmem:[%s5202_s6 + $0x118] sm:$0xff]  ;;  %v5414_v20 = vld [vmem:[%s5202_s6 + $0x60] sm:$0xff] }
  0xe7   : > { %602 = vmatpush.msra.mxu0 %v5334_v0  ;;  %622 = vmatpush.msra.mxu1 %v5337_v1  ;;  %v5417_v21 = vld [vmem:[%s5202_s6 + $0x68] sm:$0xff]  ;;  %v5423_v22 = vld [vmem:[%s5202_s6 + $0x70] sm:$0xff]  ;;  %v5426_v23 = vld [vmem:[%s5202_s6 + $0xf8] sm:$0xff] }
  0xe8   : > { %642 = vmatpush.msra.mxu2 %v5343_v2  ;;  %660 = vmatpush.msra.mxu3 %v5378_v11  ;;  %v5430_v24 = vld [vmem:[%s5202_s6 + $0x40] sm:$0xff]  ;;  %v5433_v25 = vld [vmem:[%s5202_s6 + $0x48] sm:$0xff]  ;;  %v5439_v26 = vld [vmem:[%s5202_s6 + $0x50] sm:$0xff] }
  0xe9   : > { %603 = vmatpush.msra.mxu0 %v5350_v4  ;;  %623 = vmatpush.msra.mxu1 %v5353_v5  ;;  %v5442_v27 = vld [vmem:[%s5202_s6 + $0xd8] sm:$0xff]  ;;  %v5446_v28 = vld [vmem:[%s5202_s6 + $0x20] sm:$0xff]  ;;  %v5449_v29 = vld [vmem:[%s5202_s6 + $0x28] sm:$0xff] }
  0xea   : > { %643 = vmatpush.msra.mxu2 %v5359_v6  ;;  %661 = vmatpush.msra.mxu3 %v5394_v15  ;;  %v5455_v30 = vld [vmem:[%s5202_s6 + $0x30] sm:$0xff]  ;;  %v5458_v31 = vld [vmem:[%s5202_s6 + $0xb8] sm:$0xff]  ;;  %v5462_v32 = vld [vmem:[%s5202_s6] sm:$0xff] }
  0xeb   : > { %604 = vmatpush.msra.mxu0 %v5366_v8  ;;  %624 = vmatpush.msra.mxu1 %v5369_v9  ;;  %v5465_v33 = vld [vmem:[%s5202_s6 + $0x8] sm:$0xff]  ;;  %v5471_v34 = vld [vmem:[%s5202_s6 + $0x10] sm:$0xff]  ;;  %v525_v35 = vld [vmem:[#allocation3] sm:$0x3] }
  0xec   : > { %644 = vmatpush.msra.mxu2 %v5375_v10  ;;  %662 = vmatpush.msra.mxu3 %v5410_v19  ;;  %v5478_v36 = vld [vmem:[%s5202_s6 + $0x98] sm:$0xff] }
  0xed   : > { %605 = vmatpush.msra.mxu0 %v5382_v12  ;;  %625 = vmatpush.msra.mxu1 %v5385_v13  ;;  %v5482_v37 = vld [vmem:[%s5202_s6 + $0x78] sm:$0xff] }
  0xee   : > { %645 = vmatpush.msra.mxu2 %v5391_v14  ;;  %663 = vmatpush.msra.mxu3 %v5426_v23  ;;  %v5487_v38 = vld [vmem:[%s5202_s6 + $0x58] sm:$0xff] }
  0xef   : > { %606 = vmatpush.msra.mxu0 %v5398_v16  ;;  %626 = vmatpush.msra.mxu1 %v5401_v17  ;;  %v5494_v39 = vld [vmem:[%s5202_s6 + $0x38] sm:$0xff] }
  0xf0   : > { %646 = vmatpush.msra.mxu2 %v5407_v18  ;;  %664 = vmatpush.msra.mxu3 %v5442_v27 }
  0xf1   : > { %607 = vmatpush.msra.mxu0 %v5414_v20  ;;  %627 = vmatpush.msra.mxu1 %v5417_v21 }
  0xf2   : > { %647 = vmatpush.msra.mxu2 %v5423_v22  ;;  %665 = vmatpush.msra.mxu3 %v5458_v31 }
  0xf3   : > { %608 = vmatpush.msra.mxu0 %v5430_v24  ;;  %628 = vmatpush.msra.mxu1 %v5433_v25 }
  0xf4   : > { %648 = vmatpush.msra.mxu2 %v5439_v26  ;;  %666 = vmatpush.msra.mxu3 %v5478_v36 }
  0xf5   : > { %609 = vmatpush.msra.mxu0 %v5446_v28  ;;  %629 = vmatpush.msra.mxu1 %v5449_v29 }
  0xf6   : > { %649 = vmatpush.msra.mxu2 %v5455_v30  ;;  %667 = vmatpush.msra.mxu3 %v5482_v37 }
  0xf7   : > { %610 = vmatpush.msra.mxu0 %v5462_v32  ;;  %630 = vmatpush.msra.mxu1 %v5465_v33 }
  0xf8   : > { %650 = vmatpush.msra.mxu2 %v5471_v34  ;;  %611 = vmatmul.f32.vlgmr.msra.gmra.mxu0 %v525_v35 }
  0xf9   : > { %631 = vmatmul.f32.vlgmr.msra.gmra.mxu1 %v525_v35  ;;  %651 = vmatmul.f32.vlgmr.msra.gmra.mxu2 %v525_v35 }
  0xfa   : > { %811 = vmatpush.msrb.mxu0 %v5243_v40  ;;  %831 = vmatpush.msrb.mxu1 %v5246_v41  ;;  %v5501_v40 = vld [vmem:[%s5202_s6 + $0x18] sm:$0xff] }
  0xfb   : > { %851 = vmatpush.msrb.mxu2 %v5249_v42  ;;  %668 = vmatpush.msra.mxu3 %v5487_v38 }
  0xfc   : > { %812 = vmatpush.msrb.mxu0 %v5254_v43  ;;  %832 = vmatpush.msrb.mxu1 %v5257_v44 }
  0xfd   : > { %852 = vmatpush.msrb.mxu2 %v5260_v45  ;;  %669 = vmatpush.msra.mxu3 %v5494_v39 }
  0xfe   : > { %813 = vmatpush.msrb.mxu0 %v5264_v46  ;;  %833 = vmatpush.msrb.mxu1 %v5267_v47 }
  0xff   : > { %853 = vmatpush.msrb.mxu2 %v5272_v48  ;;  %670 = vmatpush.msra.mxu3 %v5501_v40 }
 0x100   : > { %814 = vmatpush.msrb.mxu0 %v5276_v49  ;;  %834 = vmatpush.msrb.mxu1 %v5279_v50 }
 0x101   : > { %854 = vmatpush.msrb.mxu2 %v5284_v51  ;;  %671 = vmatmul.f32.vlgmr.msra.gmra.mxu3 %v525_v35  ;;  %v7752_v35 = vld [vmem:[#allocation24_spill] sm:$0xff] }
 0x102   : > { %815 = vmatpush.msrb.mxu0 %v5288_v52  ;;  %835 = vmatpush.msrb.mxu1 %v5291_v53 }
 0x103   : > { %871 = vmatpush.msrb.mxu3 %v5306_v57  ;;  %855 = vmatpush.msrb.mxu2 %v5296_v54 }
 0x104   : > { %816 = vmatpush.msrb.mxu0 %v5300_v55  ;;  %836 = vmatpush.msrb.mxu1 %v5303_v56 }
 0x105   : > { %872 = vmatpush.msrb.mxu3 %v5314_v59  ;;  %856 = vmatpush.msrb.mxu2 %v5311_v58 }
 0x106   : > { %817 = vmatpush.msrb.mxu0 %v5318_v60  ;;  %837 = vmatpush.msrb.mxu1 %v5321_v61 }
 0x107   : > { %873 = vmatpush.msrb.mxu3 %v5330_v63  ;;  %857 = vmatpush.msrb.mxu2 %v5327_v62 }
 0x108   : > { %818 = vmatpush.msrb.mxu0 %v5334_v0  ;;  %838 = vmatpush.msrb.mxu1 %v5337_v1 }
 0x109   : > { %874 = vmatpush.msrb.mxu3 %v5346_v3  ;;  %858 = vmatpush.msrb.mxu2 %v5343_v2 }
 0x10a   : > { %819 = vmatpush.msrb.mxu0 %v5350_v4  ;;  %839 = vmatpush.msrb.mxu1 %v5353_v5 }
 0x10b   : > { %875 = vmatpush.msrb.mxu3 %v5362_v7  ;;  %859 = vmatpush.msrb.mxu2 %v5359_v6 }
 0x10c   : > { %820 = vmatpush.msrb.mxu0 %v5366_v8  ;;  %840 = vmatpush.msrb.mxu1 %v5369_v9 }
 0x10d   : > { %876 = vmatpush.msrb.mxu3 %v5378_v11  ;;  %860 = vmatpush.msrb.mxu2 %v5375_v10 }
 0x10e   : > { %821 = vmatpush.msrb.mxu0 %v5382_v12  ;;  %841 = vmatpush.msrb.mxu1 %v5385_v13 }
 0x10f   : > { %877 = vmatpush.msrb.mxu3 %v5394_v15  ;;  %861 = vmatpush.msrb.mxu2 %v5391_v14 }
 0x110   : > { %822 = vmatpush.msrb.mxu0 %v5398_v16  ;;  %842 = vmatpush.msrb.mxu1 %v5401_v17 }
 0x111   : > { %878 = vmatpush.msrb.mxu3 %v5410_v19  ;;  %862 = vmatpush.msrb.mxu2 %v5407_v18 }
 0x112   : > { %823 = vmatpush.msrb.mxu0 %v5414_v20  ;;  %843 = vmatpush.msrb.mxu1 %v5417_v21 }
 0x113   : > { %879 = vmatpush.msrb.mxu3 %v5426_v23  ;;  %863 = vmatpush.msrb.mxu2 %v5423_v22 }
 0x114   : > { %824 = vmatpush.msrb.mxu0 %v5430_v24  ;;  %844 = vmatpush.msrb.mxu1 %v5433_v25 }
 0x115   : > { %880 = vmatpush.msrb.mxu3 %v5442_v27  ;;  %864 = vmatpush.msrb.mxu2 %v5439_v26 }
 0x116   : > { %825 = vmatpush.msrb.mxu0 %v5446_v28  ;;  %845 = vmatpush.msrb.mxu1 %v5449_v29 }
 0x117   : > { %881 = vmatpush.msrb.mxu3 %v5458_v31  ;;  %865 = vmatpush.msrb.mxu2 %v5455_v30 }
 0x118   : > { %826 = vmatpush.msrb.mxu0 %v5462_v32  ;;  %846 = vmatpush.msrb.mxu1 %v5465_v33 }
 0x119   : > { %882 = vmatpush.msrb.mxu3 %v5478_v36  ;;  %866 = vmatpush.msrb.mxu2 %v5471_v34 }
 0x11a   : > { %1045 = vmatpush.msra.mxu0 %v7752_v35  ;;  %1065 = vmatpush.msra.mxu1 %v5246_v41  ;;  %v527_v41 = vld [vmem:[#allocation2 + $0x30] sm:$0x3] }
 0x11b   : > { %883 = vmatpush.msrb.mxu3 %v5482_v37  ;;  %1085 = vmatpush.msra.mxu2 %v5249_v42  ;;  %v528_v42 = vld [vmem:[#allocation2] sm:$0x3] }
 0x11c   : > { %1046 = vmatpush.msra.mxu0 %v5254_v43  ;;  %1066 = vmatpush.msra.mxu1 %v5257_v44 }
 0x11d   : > { %884 = vmatpush.msrb.mxu3 %v5487_v38  ;;  %1086 = vmatpush.msra.mxu2 %v5260_v45 }
 0x11e   : > { %1047 = vmatpush.msra.mxu0 %v5264_v46  ;;  %1067 = vmatpush.msra.mxu1 %v5267_v47 }
 0x11f   : > { %885 = vmatpush.msrb.mxu3 %v5494_v39  ;;  %1087 = vmatpush.msra.mxu2 %v5272_v48 }
 0x120   : > { %1048 = vmatpush.msra.mxu0 %v5276_v49  ;;  %1068 = vmatpush.msra.mxu1 %v5279_v50  ;;  %v529_v49 = vld [vmem:[#allocation2 + $0x18] sm:$0x3] }
 0x121   : > { %886 = vmatpush.msrb.mxu3 %v5501_v40  ;;  %1088 = vmatpush.msra.mxu2 %v5284_v51 }
 0x122   : > { %1049 = vmatpush.msra.mxu0 %v5288_v52  ;;  %1069 = vmatpush.msra.mxu1 %v5291_v53 }
 0x123   : > { %1105 = vmatpush.msra.mxu3 %v5306_v57  ;;  %1089 = vmatpush.msra.mxu2 %v5296_v54 }
 0x124   : > { %1050 = vmatpush.msra.mxu0 %v5300_v55  ;;  %1070 = vmatpush.msra.mxu1 %v5303_v56 }
 0x125   : > { %1106 = vmatpush.msra.mxu3 %v5314_v59  ;;  %1090 = vmatpush.msra.mxu2 %v5311_v58 }
 0x126   : > { %1051 = vmatpush.msra.mxu0 %v5318_v60  ;;  %1071 = vmatpush.msra.mxu1 %v5321_v61 }
 0x127   : > { %1107 = vmatpush.msra.mxu3 %v5330_v63  ;;  %1091 = vmatpush.msra.mxu2 %v5327_v62 }
 0x128   : > { %1052 = vmatpush.msra.mxu0 %v5334_v0  ;;  %1072 = vmatpush.msra.mxu1 %v5337_v1 }
 0x129   : > { %1108 = vmatpush.msra.mxu3 %v5346_v3  ;;  %1092 = vmatpush.msra.mxu2 %v5343_v2 }
 0x12a   : > { %1053 = vmatpush.msra.mxu0 %v5350_v4  ;;  %1073 = vmatpush.msra.mxu1 %v5353_v5 }
 0x12b   : > { %1109 = vmatpush.msra.mxu3 %v5362_v7  ;;  %1093 = vmatpush.msra.mxu2 %v5359_v6 }
 0x12c   : > { %1054 = vmatpush.msra.mxu0 %v5366_v8  ;;  %1074 = vmatpush.msra.mxu1 %v5369_v9 }
 0x12d   : > { %1110 = vmatpush.msra.mxu3 %v5378_v11  ;;  %1094 = vmatpush.msra.mxu2 %v5375_v10 }
 0x12e   : > { %1055 = vmatpush.msra.mxu0 %v5382_v12  ;;  %1075 = vmatpush.msra.mxu1 %v5385_v13 }
 0x12f   : > { %1111 = vmatpush.msra.mxu3 %v5394_v15  ;;  %1095 = vmatpush.msra.mxu2 %v5391_v14 }
 0x130   : > { %1056 = vmatpush.msra.mxu0 %v5398_v16  ;;  %1076 = vmatpush.msra.mxu1 %v5401_v17  ;;  %v526_v16 = vld [vmem:[#allocation4] sm:$0x3] }
 0x131   : > { %1112 = vmatpush.msra.mxu3 %v5410_v19  ;;  %1096 = vmatpush.msra.mxu2 %v5407_v18 }
 0x132   : > { %1057 = vmatpush.msra.mxu0 %v5414_v20  ;;  %1077 = vmatpush.msra.mxu1 %v5417_v21 }
 0x133   : > { %1113 = vmatpush.msra.mxu3 %v5426_v23  ;;  %1097 = vmatpush.msra.mxu2 %v5423_v22 }
 0x134   : > { %1058 = vmatpush.msra.mxu0 %v5430_v24  ;;  %1078 = vmatpush.msra.mxu1 %v5433_v25 }
 0x135   : > { %1114 = vmatpush.msra.mxu3 %v5442_v27  ;;  %1098 = vmatpush.msra.mxu2 %v5439_v26 }
 0x136   : > { %1059 = vmatpush.msra.mxu0 %v5446_v28  ;;  %1079 = vmatpush.msra.mxu1 %v5449_v29 }
 0x137   : > { %1115 = vmatpush.msra.mxu3 %v5458_v31  ;;  %1099 = vmatpush.msra.mxu2 %v5455_v30 }
 0x138   : > { %1060 = vmatpush.msra.mxu0 %v5462_v32  ;;  %1080 = vmatpush.msra.mxu1 %v5465_v33 }
 0x139   : > { %1116 = vmatpush.msra.mxu3 %v5478_v36  ;;  %1100 = vmatpush.msra.mxu2 %v5471_v34  ;;  %v743_v34 = vld [vmem:[#allocation2 + $0x30] sm:$0xc] }
 0x13b   : > { %1117 = vmatpush.msra.mxu3 %v5482_v37  ;;  %v744_v37 = vld [vmem:[#allocation2] sm:$0xc] }
 0x13d   : > { %1118 = vmatpush.msra.mxu3 %v5487_v38 }
 0x13f   : > { %1119 = vmatpush.msra.mxu3 %v5494_v39 }
 0x141   : > { %1120 = vmatpush.msra.mxu3 %v5501_v40  ;;  %v530_v40 = vld [vmem:[#allocation2 + $0x10] sm:$0x3] }
 0x175   : > { %v612_v43 = vpop.f32.mrf.mxu0 }
 0x176   : > { %v675_v44 = vadd.f32 %v612_v43, %v527_v41  ;;  %v632_v45 = vpop.f32.mrf.mxu1 }
 0x177   : > { %v676_v46 = vadd.f32 %v632_v45, %v528_v42  ;;  %v745_v45 = vld [vmem:[#allocation2 + $0x18] sm:$0xc] }
 0x178   : > { %v4417_v47 = vmul.f32 -1.442695, %v675_v44 }
 0x179   : > { %v4418_v48 = vmul.f32 -1.442695, %v676_v46 }
 0x17a   : > { %4563 = vpow2.f32 %v4417_v47 }
 0x17b   : > { %4565 = vpow2.f32 %v4418_v48 }
 0x17c   : > { %v652_v50 = vpop.f32.mrf.mxu2 }
 0x17d   : > { %v677_v51 = vadd.f32 %v652_v50, %v529_v49 }
 0x17f   : > { %v4419_v52 = vmul.f32 -1.442695, %v677_v51 }
 0x180   : > { %v4564_v53 = vpop.eup %4563 }
 0x181   : > { %v4566_v54 = vpop.eup %4565  ;;  %v688_v55 = vadd.f32 1.0, %v4564_v53  ;;  %4567 = vpow2.f32 %v4419_v52 }
 0x182   : > { %v689_v56 = vadd.f32 1.0, %v4566_v54 }
 0x183   : > { %4569 = vrcp.f32 %v688_v55  ;;  %v702_v3 = vand.u32 2147483648, %v688_v55  ;;  %v700_v6 = vand.u32 2147483647, %v688_v55  ;;  %vm696_vm3 = vweird.f32 %v688_v55 }
 0x184   : > { %4571 = vrcp.f32 %v689_v56  ;;  %v672_v57 = vpop.f32.mrf.mxu3  ;;  %v717_v4 = vand.u32 2147483648, %v689_v56  ;;  %v715_v8 = vand.u32 2147483647, %v689_v56  ;;  %vm711_vm4 = vweird.f32 %v689_v56 }
 0x185   : > { %v678_v59 = vadd.f32 %v672_v57, %v530_v40  ;;  %v703_v13 = vor.u32 1.1754944e-38, %v702_v3  ;;  %vm701_vm7 = vcmp.eq.f32.partialorder %v700_v6, 8.507059e+37 }
 0x186   : > { %v718_v15 = vor.u32 1.1754944e-38, %v717_v4  ;;  %vm716_vm8 = vcmp.eq.f32.partialorder %v715_v8, 8.507059e+37 }
 0x187   : > { %v4568_v58 = vpop.eup %4567 }
 0x188   : > { %v690_v60 = vadd.f32 1.0, %v4568_v58 }
 0x189   : > { %v4570_v61 = vpop.eup %4569 }
 0x18a   : > { %v4572_v62 = vpop.eup %4571  ;;  %v692_v63 = vmul.f32 %v4570_v61, %v688_v55  ;;  %4573 = vrcp.f32 %v690_v60  ;;  %vm697_vm1 = vweird.f32 %v4570_v61  ;;  %v732_v27 = vand.u32 2147483648, %v690_v60 }
 0x18b   : > { %v707_v0 = vmul.f32 %v4572_v62, %v689_v56  ;;  %4575 = vtanh.f32 %v678_v59  ;;  %vm712_vm2 = vweird.f32 %v4572_v62  ;;  %vm698_vm5 = vmor %vm696_vm3, %vm697_vm1  ;;  %vm726_vm10 = vweird.f32 %v690_v60  ;;  %v746_v56 = vld [vmem:[#allocation2 + $0x10] sm:$0xc] }
 0x18c   : > { %v693_v1 = vsub.f32 1.0, %v692_v63  ;;  %vm713_vm6 = vmor %vm711_vm4, %vm712_vm2  ;;  %v730_v28 = vand.u32 2147483647, %v690_v60  ;;  %v733_v30 = vor.u32 1.1754944e-38, %v732_v27 }
 0x18d   : > { %v708_v2 = vsub.f32 1.0, %v707_v0 }
 0x18e   : > { %v694_v5 = vmul.f32 %v4570_v61, %v693_v1  ;;  %vm731_vm12 = vcmp.eq.f32.partialorder %v730_v28, 8.507059e+37 }
 0x18f   : > { %v709_v7 = vmul.f32 %v4572_v62, %v708_v2 }
 0x190   : > { %v4574_v9 = vpop.eup %4573  ;;  %v695_v10 = vadd.f32 %v4570_v61, %v694_v5 }
 0x191   : > { %v4576_v11 = vpop.eup %4575  ;;  %v722_v12 = vmul.f32 %v4574_v9, %v690_v60  ;;  %v710_v14 = vadd.f32 %v4572_v62, %v709_v7  ;;  %vm727_vm9 = vweird.f32 %v4574_v9 }
 0x192   : > { %v699_v17 = vsel %vm698_vm5, %v4570_v61, %v695_v10  ;;  %vm728_vm11 = vmor %vm726_vm10, %vm727_vm9 }
 0x193   : > { %v723_v18 = vsub.f32 1.0, %v722_v12  ;;  %v704_v19 = vsel %vm701_vm7, %v703_v13, %v699_v17  ;;  %v714_v20 = vsel %vm713_vm6, %v4572_v62, %v710_v14 }
 0x194   : > { %v719_v21 = vsel %vm716_vm8, %v718_v15, %v714_v20  ;;  %v738_v22 = vmul.f32 %v4576_v11, %v704_v19 }
 0x195   : > { %v724_v23 = vmul.f32 %v4574_v9, %v723_v18  ;;  %v737_v24 = vmul.f32 %v719_v21, %v526_v16 }
 0x197   : > { %v5626_v25 = vadd.f32 %v738_v22, %v737_v24  ;;  %v725_v26 = vadd.f32 %v4574_v9, %v724_v23 }
 0x199   : > { %4577 = vtanh.f32 %v5626_v25  ;;  %v729_v29 = vsel %vm728_vm11, %v4574_v9, %v725_v26  ;;  %v966_v12 = vrot.slane %v5626_v25, 6 }
 0x19a   : > { %v734_v32 = vsel %vm731_vm12, %v733_v30, %v729_v29 }
 0x19f   : > { %v4578_v31 = vpop.eup %4577 }
 0x1a0   : > { %v741_v33 = vmul.f32 %v4578_v31, %v734_v32 }
 0x1a2   : > { %742 = vst [vmem:[%s5239_s27] sm:$0x3] %v741_v33  ;;  %827 = vmatmul.f32.vlgmr.msrb.gmra.mxu0 %v741_v33  ;;  %847 = vmatmul.f32.vlgmr.msrb.gmra.mxu1 %v741_v33 }
 0x1a3   : > { %867 = vmatmul.f32.vlgmr.msrb.gmra.mxu2 %v741_v33  ;;  %887 = vmatmul.f32.vlgmr.msrb.gmra.mxu3 %v741_v33  ;;  %v5636_v33 = vld [vmem:[%s5202_s6 + $0x1e0] sm:$0xff] }
 0x1a4   : > { %7753 = vst [vmem:[#allocation24_spill] sm:$0xff] %v5636_v33  ;;  %1279 = vmatpush.msrb.mxu0 %v5636_v33 }
 0x21f   : > { %v828_v36 = vpop.f32.mrf.mxu0  ;;  %v848_v38 = vpop.f32.mrf.mxu1 }
 0x220   : > { %v895_v39 = vrot.slane %v828_v36, 6  ;;  %v896_v35 = vrot.slane %v848_v38, 6  ;;  %v5642_v36 = vld [vmem:[%s5202_s6 + $0x1f0] sm:$0xff]  ;;  %v5652_v38 = vld [vmem:[%s5202_s6 + $0x1c0] sm:$0xff] }
 0x221   : > { %7754 = vst [vmem:[#allocation25_spill] sm:$0xff] %v5642_v36  ;;  %1319 = vmatpush.msrb.mxu2 %v5642_v36  ;;  %1280 = vmatpush.msrb.mxu0 %v5652_v38 }
 0x222   : > { %v903_v41 = vadd.f32 %v895_v39, %v743_v34  ;;  %v904_v42 = vadd.f32 %v896_v35, %v744_v37  ;;  %v5639_v34 = vld [vmem:[%s5202_s6 + $0x1e8] sm:$0xff]  ;;  %v5647_v37 = vld [vmem:[%s5202_s6 + $0x1f8] sm:$0xff]  ;;  %v5658_v35 = vld [vmem:[%s5202_s6 + $0x1d0] sm:$0xff] }
 0x223   : > { %1299 = vmatpush.msrb.mxu1 %v5639_v34  ;;  %7755 = vst [vmem:[#allocation26_spill] sm:$0xff] %v5647_v37  ;;  %1339 = vmatpush.msrb.mxu3 %v5647_v37  ;;  %v5655_v39 = vld [vmem:[%s5202_s6 + $0x1c8] sm:$0xff] }
 0x224   : > { %v4420_v43 = vmul.f32 -1.442695, %v903_v41  ;;  %v4421_v44 = vmul.f32 -1.442695, %v904_v42  ;;  %v5663_v41 = vld [vmem:[%s5202_s6 + $0x1d8] sm:$0xff]  ;;  %1320 = vmatpush.msrb.mxu2 %v5658_v35  ;;  %v5668_v42 = vld [vmem:[%s5202_s6 + $0x1a0] sm:$0xff] }
 0x225   : > { %1300 = vmatpush.msrb.mxu1 %v5655_v39  ;;  %1340 = vmatpush.msrb.mxu3 %v5663_v41 }
 0x226   : > { %4579 = vpow2.f32 %v4420_v43  ;;  %v868_v46 = vpop.f32.mrf.mxu2  ;;  %v888_v54 = vpop.f32.mrf.mxu3  ;;  %v5671_v43 = vld [vmem:[%s5202_s6 + $0x1a8] sm:$0xff]  ;;  %1281 = vmatpush.msrb.mxu0 %v5668_v42 }
 0x227   : > { %4581 = vpow2.f32 %v4421_v44  ;;  %v897_v47 = vrot.slane %v868_v46, 6  ;;  %v898_v55 = vrot.slane %v888_v54, 6  ;;  %7756 = vst [vmem:[#allocation27_spill] sm:$0xff] %v5671_v43  ;;  %v5674_v44 = vld [vmem:[%s5202_s6 + $0x1b0] sm:$0xff]  ;;  %1301 = vmatpush.msrb.mxu1 %v5671_v43  ;;  %v5684_v46 = vld [vmem:[%s5202_s6 + $0x180] sm:$0xff] }
 0x228   : > { %7757 = vst [vmem:[#allocation28_spill] sm:$0xff] %v5674_v44  ;;  %1321 = vmatpush.msrb.mxu2 %v5674_v44  ;;  %1282 = vmatpush.msrb.mxu0 %v5684_v46  ;;  %v5716_v54 = vld [vmem:[%s5202_s6 + $0x140] sm:$0xff] }
 0x229   : > { %v905_v48 = vadd.f32 %v897_v47, %v745_v45  ;;  %v906_v59 = vadd.f32 %v898_v55, %v746_v56  ;;  %v5679_v45 = vld [vmem:[%s5202_s6 + $0x1b8] sm:$0xff]  ;;  %7759 = vst [vmem:[#allocation30_spill] sm:$0xff] %v5684_v46  ;;  %v5687_v47 = vld [vmem:[%s5202_s6 + $0x188] sm:$0xff]  ;;  %v5722_v56 = vld [vmem:[%s5202_s6 + $0x150] sm:$0xff] }
 0x22a   : > { %7758 = vst [vmem:[#allocation29_spill] sm:$0xff] %v5679_v45  ;;  %1341 = vmatpush.msrb.mxu3 %v5679_v45  ;;  %1302 = vmatpush.msrb.mxu1 %v5687_v47  ;;  %v5719_v55 = vld [vmem:[%s5202_s6 + $0x148] sm:$0xff] }
 0x22b   : > { %v4422_v49 = vmul.f32 -1.442695, %v905_v48  ;;  %v5690_v48 = vld [vmem:[%s5202_s6 + $0x190] sm:$0xff]  ;;  %7761 = vst [vmem:[#allocation32_spill] sm:$0xff] %v5716_v54 }
 0x22c   : > { %v4580_v50 = vpop.eup %4579  ;;  %1322 = vmatpush.msrb.mxu2 %v5690_v48  ;;  %7762 = vst [vmem:[#allocation33_spill] sm:$0xff] %v5719_v55 }
 0x22d   : > { %v4582_v51 = vpop.eup %4581  ;;  %v916_v52 = vadd.f32 1.0, %v4580_v50  ;;  %4583 = vpow2.f32 %v4422_v49  ;;  %v5695_v49 = vld [vmem:[%s5202_s6 + $0x198] sm:$0xff]  ;;  %v5700_v50 = vld [vmem:[%s5202_s6 + $0x160] sm:$0xff]  ;;  %7763 = vst [vmem:[#allocation34_spill] sm:$0xff] %v5722_v56 }
 0x22e   : > { %v917_v53 = vadd.f32 1.0, %v4582_v51  ;;  %1342 = vmatpush.msrb.mxu3 %v5695_v49  ;;  %v5703_v51 = vld [vmem:[%s5202_s6 + $0x168] sm:$0xff]  ;;  %1283 = vmatpush.msrb.mxu0 %v5700_v50 }
 0x22f   : > { %4585 = vrcp.f32 %v916_v52  ;;  %v930_v1 = vand.u32 2147483648, %v916_v52  ;;  %v928_v4 = vand.u32 2147483647, %v916_v52  ;;  %vm924_vm15 = vweird.f32 %v916_v52  ;;  %7760 = vst [vmem:[#allocation31_spill] sm:$0xff] %v5703_v51  ;;  %1303 = vmatpush.msrb.mxu1 %v5703_v51 }
 0x230   : > { %4587 = vrcp.f32 %v917_v53  ;;  %v945_v2 = vand.u32 2147483648, %v917_v53  ;;  %v943_v6 = vand.u32 2147483647, %v917_v53  ;;  %vm939_vm0 = vweird.f32 %v917_v53  ;;  %1284 = vmatpush.msrb.mxu0 %v5716_v54 }
 0x231   : > { %v931_v10 = vor.u32 1.1754944e-38, %v930_v1  ;;  %vm929_vm3 = vcmp.eq.f32.partialorder %v928_v4, 8.507059e+37  ;;  %1304 = vmatpush.msrb.mxu1 %v5719_v55  ;;  %v5759_v4 = vld [vmem:[%s5202_s6 + $0x118] sm:$0xff] }
 0x232   : > { %v946_v13 = vor.u32 1.1754944e-38, %v945_v2  ;;  %vm944_vm4 = vcmp.eq.f32.partialorder %v943_v6, 8.507059e+37  ;;  %v975_v2 = vld [vmem:[#allocation2] sm:$0x30] }
 0x233   : > { %v4584_v40 = vpop.eup %4583 }
 0x234   : > { %v918_v57 = vadd.f32 1.0, %v4584_v40  ;;  %v5727_v40 = vld [vmem:[%s5202_s6 + $0x158] sm:$0xff] }
 0x235   : > { %v4586_v58 = vpop.eup %4585  ;;  %7764 = vst [vmem:[#allocation35_spill] sm:$0xff] %v5727_v40 }
 0x236   : > { %v4588_v60 = vpop.eup %4587  ;;  %v920_v61 = vmul.f32 %v4586_v58, %v916_v52  ;;  %4589 = vrcp.f32 %v918_v57  ;;  %vm925_vm13 = vweird.f32 %v4586_v58  ;;  %v960_v25 = vand.u32 2147483648, %v918_v57  ;;  %v5706_v52 = vld [vmem:[%s5202_s6 + $0x170] sm:$0xff] }
 0x237   : > { %v935_v62 = vmul.f32 %v4588_v60, %v917_v53  ;;  %4591 = vtanh.f32 %v906_v59  ;;  %vm940_vm14 = vweird.f32 %v4588_v60  ;;  %vm926_vm1 = vmor %vm924_vm15, %vm925_vm13  ;;  %vm954_vm6 = vweird.f32 %v918_v57  ;;  %v5711_v53 = vld [vmem:[%s5202_s6 + $0x178] sm:$0xff]  ;;  %1323 = vmatpush.msrb.mxu2 %v5706_v52  ;;  %v5738_v59 = vld [vmem:[%s5202_s6 + $0x130] sm:$0xff] }
 0x238   : > { %v921_v63 = vsub.f32 1.0, %v920_v61  ;;  %vm941_vm2 = vmor %vm939_vm0, %vm940_vm14  ;;  %v958_v26 = vand.u32 2147483647, %v918_v57  ;;  %v961_v28 = vor.u32 1.1754944e-38, %v960_v25  ;;  %1343 = vmatpush.msrb.mxu3 %v5711_v53  ;;  %v5748_v61 = vld [vmem:[%s5202_s6 + $0x100] sm:$0xff] }
 0x239   : > { %v936_v0 = vsub.f32 1.0, %v935_v62  ;;  %1324 = vmatpush.msrb.mxu2 %v5722_v56  ;;  %v5751_v62 = vld [vmem:[%s5202_s6 + $0x108] sm:$0xff]  ;;  %v5810_v25 = vld [vmem:[%s5202_s6 + $0x80] sm:$0xff] }
 0x23a   : > { %v922_v3 = vmul.f32 %v4586_v58, %v921_v63  ;;  %vm959_vm8 = vcmp.eq.f32.partialorder %v958_v26, 8.507059e+37  ;;  %1344 = vmatpush.msrb.mxu3 %v5727_v40  ;;  %v5754_v63 = vld [vmem:[%s5202_s6 + $0x110] sm:$0xff] }
 0x23b   : > { %v937_v5 = vmul.f32 %v4588_v60, %v936_v0  ;;  %1325 = vmatpush.msrb.mxu2 %v5738_v59  ;;  %v974_v0 = vld [vmem:[#allocation2 + $0x30] sm:$0x30] }
 0x23c   : > { %v4590_v7 = vpop.eup %4589  ;;  %v923_v8 = vadd.f32 %v4586_v58, %v922_v3 }
 0x23d   : > { %v950_v9 = vmul.f32 %v4590_v7, %v918_v57  ;;  %v938_v11 = vadd.f32 %v4588_v60, %v937_v5  ;;  %v4592_v15 = vpop.eup %4591  ;;  %vm955_vm5 = vweird.f32 %v4590_v7  ;;  %v5732_v57 = vld [vmem:[%s5202_s6 + $0x120] sm:$0xff]  ;;  %1326 = vmatpush.msrb.mxu2 %v5754_v63 }
 0x23e   : > { %v927_v14 = vsel %vm926_vm1, %v4586_v58, %v923_v8  ;;  %vm956_vm7 = vmor %vm954_vm6, %vm955_vm5  ;;  %v5735_v58 = vld [vmem:[%s5202_s6 + $0x128] sm:$0xff]  ;;  %1285 = vmatpush.msrb.mxu0 %v5732_v57 }
 0x23f   : > { %v951_v16 = vsub.f32 1.0, %v950_v9  ;;  %v932_v17 = vsel %vm929_vm3, %v931_v10, %v927_v14  ;;  %v942_v18 = vsel %vm941_vm2, %v4588_v60, %v938_v11  ;;  %1305 = vmatpush.msrb.mxu1 %v5735_v58  ;;  %v5743_v60 = vld [vmem:[%s5202_s6 + $0x138] sm:$0xff]  ;;  %v5767_v8 = vld [vmem:[%s5202_s6 + $0xe8] sm:$0xff]  ;;  %v5770_v9 = vld [vmem:[%s5202_s6 + $0xf0] sm:$0xff] }
 0x240   : > { %v947_v19 = vsel %vm944_vm4, %v946_v13, %v942_v18  ;;  %v969_v20 = vmul.f32 %v4592_v15, %v932_v17  ;;  %1345 = vmatpush.msrb.mxu3 %v5743_v60  ;;  %1286 = vmatpush.msrb.mxu0 %v5748_v61  ;;  %v5775_v10 = vld [vmem:[%s5202_s6 + $0xf8] sm:$0xff]  ;;  %v5780_v13 = vld [vmem:[%s5202_s6 + $0xc0] sm:$0xff]  ;;  %v5783_v14 = vld [vmem:[%s5202_s6 + $0xc8] sm:$0xff] }
 0x241   : > { %v968_v21 = vmul.f32 %v966_v12, %v947_v19  ;;  %v952_v22 = vmul.f32 %v4590_v7, %v951_v16  ;;  %1306 = vmatpush.msrb.mxu1 %v5751_v62  ;;  %1327 = vmatpush.msrb.mxu2 %v5770_v9  ;;  %v5786_v15 = vld [vmem:[%s5202_s6 + $0xd0] sm:$0xff]  ;;  %v5791_v16 = vld [vmem:[%s5202_s6 + $0xd8] sm:$0xff] }
 0x242   : > { %1346 = vmatpush.msrb.mxu3 %v5759_v4  ;;  %v976_v19 = vld [vmem:[#allocation2 + $0x18] sm:$0x30] }
 0x243   : > { %v5631_v23 = vadd.f32 %v969_v20, %v968_v21  ;;  %v953_v24 = vadd.f32 %v4590_v7, %v952_v22  ;;  %1307 = vmatpush.msrb.mxu1 %v5767_v8  ;;  %1328 = vmatpush.msrb.mxu2 %v5786_v15  ;;  %v5796_v20 = vld [vmem:[%s5202_s6 + $0xa0] sm:$0xff]  ;;  %v5799_v21 = vld [vmem:[%s5202_s6 + $0xa8] sm:$0xff]  ;;  %v5804_v22 = vld [vmem:[%s5202_s6 + $0xb0] sm:$0xff] }
 0x244   : > { %1347 = vmatpush.msrb.mxu3 %v5775_v10 }
 0x245   : > { %4593 = vtanh.f32 %v5631_v23  ;;  %v957_v27 = vsel %vm956_vm7, %v4590_v7, %v953_v24  ;;  %v5764_v7 = vld [vmem:[%s5202_s6 + $0xe0] sm:$0xff]  ;;  %1308 = vmatpush.msrb.mxu1 %v5783_v14  ;;  %v5807_v24 = vld [vmem:[%s5202_s6 + $0xb8] sm:$0xff]  ;;  %1329 = vmatpush.msrb.mxu2 %v5804_v22 }
 0x246   : > { %v962_v30 = vsel %vm959_vm8, %v961_v28, %v957_v27  ;;  %1287 = vmatpush.msrb.mxu0 %v5764_v7  ;;  %1348 = vmatpush.msrb.mxu3 %v5791_v16  ;;  %v5815_v27 = vld [vmem:[%s5202_s6 + $0x88] sm:$0xff]  ;;  %v5818_v28 = vld [vmem:[%s5202_s6 + $0x90] sm:$0xff] }
 0x247   : > { %1309 = vmatpush.msrb.mxu1 %v5799_v21  ;;  %1330 = vmatpush.msrb.mxu2 %v5818_v28 }
 0x248   : > { %1288 = vmatpush.msrb.mxu0 %v5780_v13  ;;  %1349 = vmatpush.msrb.mxu3 %v5807_v24 }
 0x249   : > { %1310 = vmatpush.msrb.mxu1 %v5815_v27 }
 0x24a   : > { %1289 = vmatpush.msrb.mxu0 %v5796_v20 }
 0x24b   : > { %v4594_v29 = vpop.eup %4593 }
 0x24c   : > { %v972_v31 = vmul.f32 %v4594_v29, %v962_v30  ;;  %v5821_v29 = vld [vmem:[%s5202_s6 + $0x98] sm:$0xff]  ;;  %1290 = vmatpush.msrb.mxu0 %v5810_v25 }
 0x24d   : > { %1350 = vmatpush.msrb.mxu3 %v5821_v29 }
 0x24e   : > { %973 = vst [vmem:[%s5239_s27] sm:$0xc] %v972_v31  ;;  %v1043_v32 = vrot.slane %v972_v31, 2  ;;  %v5826_v31 = vld [vmem:[%s5202_s6 + $0x60] sm:$0xff] }
 0x24f   : > { %7765 = vst [vmem:[#allocation36_spill] sm:$0xff] %v5826_v31  ;;  %1291 = vmatpush.msrb.mxu0 %v5826_v31 }
 0x250   : > { %1061 = vmatmul.f32.vlgmr.msra.gmra.mxu0 %v1043_v32  ;;  %1081 = vmatmul.f32.vlgmr.msra.gmra.mxu1 %v1043_v32 }
 0x251   : > { %1101 = vmatmul.f32.vlgmr.msra.gmra.mxu2 %v1043_v32  ;;  %1121 = vmatmul.f32.vlgmr.msra.gmra.mxu3 %v1043_v32  ;;  %v5829_v32 = vld [vmem:[%s5202_s6 + $0x68] sm:$0xff] }
 0x252   : > { %7766 = vst [vmem:[#allocation37_spill] sm:$0xff] %v5829_v32  ;;  %1311 = vmatpush.msrb.mxu1 %v5829_v32 }
 0x2cd   : > { %v1062_v1 = vpop.f32.mrf.mxu0  ;;  %v1082_v3 = vpop.f32.mrf.mxu1 }
 0x2ce   : > { %v1129_v5 = vrot.slane %v1062_v1, 4  ;;  %v1130_v6 = vrot.slane %v1082_v3, 4  ;;  %v5837_v1 = vld [vmem:[%s5202_s6 + $0x78] sm:$0xff]  ;;  %v5843_v3 = vld [vmem:[%s5202_s6 + $0x48] sm:$0xff] }
 0x2cf   : > { %7768 = vst [vmem:[#allocation39_spill] sm:$0xff] %v5837_v1  ;;  %1351 = vmatpush.msrb.mxu3 %v5837_v1  ;;  %1312 = vmatpush.msrb.mxu1 %v5843_v3  ;;  %v5872_v1 = vld [vmem:[%s5202_s6] sm:$0xff] }
 0x2d0   : > { %v1137_v11 = vadd.f32 %v1129_v5, %v974_v0  ;;  %v1138_v12 = vadd.f32 %v1130_v6, %v975_v2  ;;  %v5832_v0 = vld [vmem:[%s5202_s6 + $0x70] sm:$0xff]  ;;  %v5840_v2 = vld [vmem:[%s5202_s6 + $0x40] sm:$0xff]  ;;  %7770 = vst [vmem:[#allocation41_spill] sm:$0xff] %v5843_v3 }
 0x2d1   : > { %7767 = vst [vmem:[#allocation38_spill] sm:$0xff] %v5832_v0  ;;  %v5848_v6 = vld [vmem:[%s5202_s6 + $0x50] sm:$0xff]  ;;  %1331 = vmatpush.msrb.mxu2 %v5832_v0  ;;  %1292 = vmatpush.msrb.mxu0 %v5840_v2  ;;  %v5875_v0 = vld [vmem:[%s5202_s6 + $0x8] sm:$0xff] }
 0x2d2   : > { %v4423_v17 = vmul.f32 -1.442695, %v1137_v11  ;;  %v4424_v18 = vmul.f32 -1.442695, %v1138_v12  ;;  %7769 = vst [vmem:[#allocation40_spill] sm:$0xff] %v5840_v2  ;;  %v5851_v11 = vld [vmem:[%s5202_s6 + $0x58] sm:$0xff] }
 0x2d3   : > { %7771 = vst [vmem:[#allocation42_spill] sm:$0xff] %v5848_v6  ;;  %v5856_v12 = vld [vmem:[%s5202_s6 + $0x20] sm:$0xff]  ;;  %1332 = vmatpush.msrb.mxu2 %v5848_v6  ;;  %1352 = vmatpush.msrb.mxu3 %v5851_v11  ;;  %v5882_v3 = vld [vmem:[%s5202_s6 + $0x10] sm:$0xff]  ;;  %v5885_v2 = vld [vmem:[%s5202_s6 + $0x18] sm:$0xff] }
 0x2d4   : > { %4595 = vpow2.f32 %v4423_v17  ;;  %v1102_v26 = vpop.f32.mrf.mxu2  ;;  %v5859_v17 = vld [vmem:[%s5202_s6 + $0x28] sm:$0xff]  ;;  %7772 = vst [vmem:[#allocation43_spill] sm:$0xff] %v5875_v0  ;;  %1293 = vmatpush.msrb.mxu0 %v5856_v12  ;;  %v1122_v6 = vpop.f32.mrf.mxu3 }
 0x2d5   : > { %4597 = vpow2.f32 %v4424_v18  ;;  %v1131_v30 = vrot.slane %v1102_v26, 4  ;;  %v5867_v26 = vld [vmem:[%s5202_s6 + $0x38] sm:$0xff]  ;;  %1313 = vmatpush.msrb.mxu1 %v5859_v17 }
 0x2d6   : > { %1353 = vmatpush.msrb.mxu3 %v5867_v26  ;;  %1294 = vmatpush.msrb.mxu0 %v5872_v1 }
 0x2d7   : > { %v1139_v5 = vadd.f32 %v1131_v30, %v976_v19  ;;  %v5864_v19 = vld [vmem:[%s5202_s6 + $0x30] sm:$0xff]  ;;  %1314 = vmatpush.msrb.mxu1 %v5875_v0 }
 0x2d8   : > { %1333 = vmatpush.msrb.mxu2 %v5864_v19  ;;  %1354 = vmatpush.msrb.mxu3 %v5885_v2 }
 0x2d9   : > { %v4425_v18 = vmul.f32 -1.442695, %v1139_v5  ;;  %1513 = vmatpush.msra.mxu0 %v5636_v33  ;;  %1533 = vmatpush.msra.mxu1 %v5639_v34 }
 0x2da   : > { %v4596_v30 = vpop.eup %4595  ;;  %1334 = vmatpush.msrb.mxu2 %v5882_v3  ;;  %1573 = vmatpush.msra.mxu3 %v5647_v37 }
 0x2db   : > { %v4598_v32 = vpop.eup %4597  ;;  %v5877_v5 = vadd.f32 1.0, %v4596_v30  ;;  %4599 = vpow2.f32 %v4425_v18  ;;  %v1132_v18 = vrot.slane %v1122_v6, 4  ;;  %1514 = vmatpush.msra.mxu0 %v5652_v38  ;;  %1534 = vmatpush.msra.mxu1 %v5655_v39 }
 0x2dc   : > { %v5887_v31 = vadd.f32 1.0, %v4598_v32  ;;  %v977_v32 = vld [vmem:[#allocation2 + $0x10] sm:$0x30]  ;;  %1553 = vmatpush.msra.mxu2 %v5642_v36  ;;  %1574 = vmatpush.msra.mxu3 %v5663_v41 }
 0x2dd   : > { %4601 = vrcp.f32 %v5877_v5  ;;  %v1140_v33 = vadd.f32 %v1132_v18, %v977_v32  ;;  %1515 = vmatpush.msra.mxu0 %v5668_v42  ;;  %1535 = vmatpush.msra.mxu1 %v5671_v43  ;;  %v1164_v43 = vand.u32 2147483648, %v5877_v5  ;;  %vm1158_vm11 = vweird.f32 %v5877_v5 }
 0x2de   : > { %4603 = vrcp.f32 %v5887_v31  ;;  %1554 = vmatpush.msra.mxu2 %v5658_v35  ;;  %1575 = vmatpush.msra.mxu3 %v5679_v45  ;;  %v1179_v45 = vand.u32 2147483648, %v5887_v31  ;;  %vm1173_vm12 = vweird.f32 %v5887_v31 }
 0x2df   : > { %1516 = vmatpush.msra.mxu0 %v5684_v46  ;;  %1536 = vmatpush.msra.mxu1 %v5687_v47  ;;  %v1162_v46 = vand.u32 2147483647, %v5877_v5 }
 0x2e0   : > { %1555 = vmatpush.msra.mxu2 %v5674_v44  ;;  %1576 = vmatpush.msra.mxu3 %v5695_v49 }
 0x2e1   : > { %v4600_v30 = vpop.eup %4599  ;;  %1517 = vmatpush.msra.mxu0 %v5700_v50  ;;  %1537 = vmatpush.msra.mxu1 %v5703_v51  ;;  %vm1163_vm15 = vcmp.eq.f32.partialorder %v1162_v46, 8.507059e+37 }
 0x2e2   : > { %v5903_v0 = vadd.f32 1.0, %v4600_v30  ;;  %1556 = vmatpush.msra.mxu2 %v5690_v48  ;;  %1577 = vmatpush.msra.mxu3 %v5711_v53 }
 0x2e3   : > { %v4602_v6 = vpop.eup %4601  ;;  %1518 = vmatpush.msra.mxu0 %v5716_v54  ;;  %1538 = vmatpush.msra.mxu1 %v5719_v55 }
 0x2e4   : > { %v4604_v36 = vpop.eup %4603  ;;  %v1154_v37 = vmul.f32 %v4602_v6, %v5877_v5  ;;  %4605 = vrcp.f32 %v5903_v0  ;;  %vm1159_vm9 = vweird.f32 %v4602_v6  ;;  %1557 = vmatpush.msra.mxu2 %v5706_v52  ;;  %1578 = vmatpush.msra.mxu3 %v5727_v40  ;;  %v1180_v5 = vor.u32 1.1754944e-38, %v1179_v45 }
 0x2e5   : > { %v1169_v30 = vmul.f32 %v4604_v36, %v5887_v31  ;;  %4607 = vtanh.f32 %v1140_v33  ;;  %vm1174_vm10 = vweird.f32 %v4604_v36  ;;  %vm1160_vm13 = vmor %vm1158_vm11, %vm1159_vm9  ;;  %1519 = vmatpush.msra.mxu0 %v5732_v57  ;;  %1539 = vmatpush.msra.mxu1 %v5735_v58  ;;  %vm1188_vm2 = vweird.f32 %v5903_v0 }
 0x2e6   : > { %v1155_v18 = vsub.f32 1.0, %v1154_v37  ;;  %1558 = vmatpush.msra.mxu2 %v5722_v56  ;;  %vm1175_vm14 = vmor %vm1173_vm12, %vm1174_vm10  ;;  %1579 = vmatpush.msra.mxu3 %v5743_v60 }
 0x2e7   : > { %v1170_v32 = vsub.f32 1.0, %v1169_v30  ;;  %v1177_v30 = vand.u32 2147483647, %v5887_v31  ;;  %1520 = vmatpush.msra.mxu0 %v5748_v61  ;;  %1540 = vmatpush.msra.mxu1 %v5751_v62 }
 0x2e8   : > { %v1156_v44 = vmul.f32 %v4602_v6, %v1155_v18  ;;  %1559 = vmatpush.msra.mxu2 %v5738_v59  ;;  %1580 = vmatpush.msra.mxu3 %v5759_v4 }
 0x2e9   : > { %v1171_v37 = vmul.f32 %v4604_v36, %v1170_v32  ;;  %v1165_v32 = vor.u32 1.1754944e-38, %v1164_v43  ;;  %vm1178_vm0 = vcmp.eq.f32.partialorder %v1177_v30, 8.507059e+37  ;;  %1521 = vmatpush.msra.mxu0 %v5764_v7  ;;  %1541 = vmatpush.msra.mxu1 %v5767_v8  ;;  %v7775_v30 = vld [vmem:[#allocation38_spill] sm:$0xff] }
 0x2ea   : > { %v5928_v33 = vpop.eup %4605  ;;  %v1157_v51 = vadd.f32 %v4602_v6, %v1156_v44  ;;  %v1200_v44 = vrot.slane %v5631_v23, 6  ;;  %1560 = vmatpush.msra.mxu2 %v5754_v63  ;;  %1581 = vmatpush.msra.mxu3 %v5775_v10 }
 0x2eb   : > { %v1184_v18 = vmul.f32 %v5928_v33, %v5903_v0  ;;  %v1172_v54 = vadd.f32 %v4604_v36, %v1171_v37  ;;  %v4608_v31 = vpop.eup %4607  ;;  %1522 = vmatpush.msra.mxu0 %v5780_v13  ;;  %1542 = vmatpush.msra.mxu1 %v5783_v14  ;;  %vm1189_vm1 = vweird.f32 %v5928_v33 }
 0x2ec   : > { %v1161_v56 = vsel %vm1160_vm13, %v4602_v6, %v1157_v51  ;;  %1561 = vmatpush.msra.mxu2 %v5770_v9  ;;  %1582 = vmatpush.msra.mxu3 %v5791_v16  ;;  %vm1190_vm3 = vmor %vm1188_vm2, %vm1189_vm1  ;;  %v7773_v6 = vld [vmem:[#allocation36_spill] sm:$0xff] }
 0x2ed   : > { %v1185_v40 = vsub.f32 1.0, %v1184_v18  ;;  %v1166_v55 = vsel %vm1163_vm15, %v1165_v32, %v1161_v56  ;;  %v1176_v43 = vsel %vm1175_vm14, %v4604_v36, %v1172_v54  ;;  %v1194_v54 = vand.u32 2147483648, %v5903_v0  ;;  %1523 = vmatpush.msra.mxu0 %v5796_v20  ;;  %1543 = vmatpush.msra.mxu1 %v5799_v21  ;;  %v7776_v18 = vld [vmem:[#allocation39_spill] sm:$0xff] }
 0x2ee   : > { %v1181_v37 = vsel %vm1178_vm0, %v1180_v5, %v1176_v43  ;;  %v1203_v23 = vmul.f32 %v4608_v31, %v1166_v55  ;;  %1562 = vmatpush.msra.mxu2 %v5786_v15  ;;  %v1192_v55 = vand.u32 2147483647, %v5903_v0  ;;  %1583 = vmatpush.msra.mxu3 %v5807_v24  ;;  %v7774_v0 = vld [vmem:[#allocation37_spill] sm:$0xff]  ;;  %v7777_v5 = vld [vmem:[#allocation40_spill] sm:$0xff]  ;;  %v7779_v43 = vld [vmem:[#allocation42_spill] sm:$0xff] }
 0x2ef   : > { %v1202_v45 = vmul.f32 %v1200_v44, %v1181_v37  ;;  %v1186_v46 = vmul.f32 %v5928_v33, %v1185_v40  ;;  %1524 = vmatpush.msra.mxu0 %v5810_v25  ;;  %1544 = vmatpush.msra.mxu1 %v5815_v27  ;;  %v1195_v40 = vor.u32 1.1754944e-38, %v1194_v54  ;;  %v7784_v54 = vld [vmem:[#allocation27_spill] sm:$0xff] }
 0x2f0   : > { %1563 = vmatpush.msra.mxu2 %v5804_v22  ;;  %1584 = vmatpush.msra.mxu3 %v5821_v29  ;;  %vm1193_vm4 = vcmp.eq.f32.partialorder %v1192_v55, 8.507059e+37  ;;  %v7785_v55 = vld [vmem:[#allocation28_spill] sm:$0xff] }
 0x2f1   : > { %v5952_v36 = vadd.f32 %v1203_v23, %v1202_v45  ;;  %v1187_v51 = vadd.f32 %v5928_v33, %v1186_v46  ;;  %1525 = vmatpush.msra.mxu0 %v7773_v6  ;;  %1545 = vmatpush.msra.mxu1 %v7774_v0  ;;  %v7780_v23 = vld [vmem:[#allocation43_spill] sm:$0xff]  ;;  %v7781_v45 = vld [vmem:[#allocation24_spill] sm:$0xff]  ;;  %v7782_v46 = vld [vmem:[#allocation25_spill] sm:$0xff] }
 0x2f2   : > { %1564 = vmatpush.msra.mxu2 %v5818_v28  ;;  %1585 = vmatpush.msra.mxu3 %v7776_v18 }
 0x2f3   : > { %4609 = vtanh.f32 %v5952_v36  ;;  %v1191_v56 = vsel %vm1190_vm3, %v5928_v33, %v1187_v51  ;;  %1526 = vmatpush.msra.mxu0 %v7777_v5  ;;  %v7778_v33 = vld [vmem:[#allocation41_spill] sm:$0xff]  ;;  %v7783_v51 = vld [vmem:[#allocation26_spill] sm:$0xff] }
 0x2f4   : > { %1565 = vmatpush.msra.mxu2 %v7775_v30  ;;  %v1196_v44 = vsel %vm1193_vm4, %v1195_v40, %v1191_v56  ;;  %1546 = vmatpush.msra.mxu1 %v7778_v33  ;;  %v7786_v56 = vld [vmem:[#allocation29_spill] sm:$0xff] }
 0x2f5   : > { %1586 = vmatpush.msra.mxu3 %v5851_v11  ;;  %1527 = vmatpush.msra.mxu0 %v5856_v12 }
 0x2f6   : > { %1566 = vmatpush.msra.mxu2 %v7779_v43  ;;  %1547 = vmatpush.msra.mxu1 %v5859_v17 }
 0x2f7   : > { %1587 = vmatpush.msra.mxu3 %v5867_v26  ;;  %1528 = vmatpush.msra.mxu0 %v5872_v1 }
 0x2f8   : > { %1567 = vmatpush.msra.mxu2 %v5864_v19  ;;  %1548 = vmatpush.msra.mxu1 %v7780_v23 }
 0x2f9   : > { %v4610_v32 = vpop.eup %4609  ;;  %1588 = vmatpush.msra.mxu3 %v5885_v2 }
 0x2fa   : > { %v1206_v31 = vmul.f32 %v4610_v32, %v1196_v44  ;;  %1568 = vmatpush.msra.mxu2 %v5882_v3 }
 0x2fc   : > { %1207 = vst [vmem:[%s5239_s27] sm:$0x30] %v1206_v31  ;;  %v1277_v37 = vrot.slane %v1206_v31, 4 }
 0x2fe   : > { %1295 = vmatmul.f32.vlgmr.msrb.gmra.mxu0 %v1277_v37  ;;  %1315 = vmatmul.f32.vlgmr.msrb.gmra.mxu1 %v1277_v37 }
 0x2ff   : > { %1335 = vmatmul.f32.vlgmr.msrb.gmra.mxu2 %v1277_v37  ;;  %1355 = vmatmul.f32.vlgmr.msrb.gmra.mxu3 %v1277_v37 }
 0x300   : > { %1732 = vmatpush.msrb.mxu0 %v7781_v45  ;;  %1752 = vmatpush.msrb.mxu1 %v5639_v34  ;;  %v7787_v34 = vld [vmem:[#allocation30_spill] sm:$0xff] }
 0x301   : > { %1772 = vmatpush.msrb.mxu2 %v7782_v46  ;;  %1792 = vmatpush.msrb.mxu3 %v7783_v51 }
 0x302   : > { %1733 = vmatpush.msrb.mxu0 %v5652_v38  ;;  %1753 = vmatpush.msrb.mxu1 %v5655_v39  ;;  %v7788_v38 = vld [vmem:[#allocation31_spill] sm:$0xff]  ;;  %v7789_v39 = vld [vmem:[#allocation32_spill] sm:$0xff] }
 0x303   : > { %1773 = vmatpush.msrb.mxu2 %v5658_v35  ;;  %1793 = vmatpush.msrb.mxu3 %v5663_v41  ;;  %v7790_v35 = vld [vmem:[#allocation33_spill] sm:$0xff]  ;;  %v7791_v41 = vld [vmem:[#allocation34_spill] sm:$0xff] }
 0x304   : > { %1734 = vmatpush.msrb.mxu0 %v5668_v42  ;;  %1754 = vmatpush.msrb.mxu1 %v7784_v54  ;;  %v7792_v42 = vld [vmem:[#allocation35_spill] sm:$0xff] }
 0x305   : > { %1774 = vmatpush.msrb.mxu2 %v7785_v55  ;;  %1794 = vmatpush.msrb.mxu3 %v7786_v56 }
 0x306   : > { %1735 = vmatpush.msrb.mxu0 %v7787_v34  ;;  %1755 = vmatpush.msrb.mxu1 %v5687_v47  ;;  %v1208_v47 = vld [vmem:[#allocation2 + $0x30] sm:$0xc0] }
 0x307   : > { %1775 = vmatpush.msrb.mxu2 %v5690_v48  ;;  %1795 = vmatpush.msrb.mxu3 %v5695_v49  ;;  %v1209_v49 = vld [vmem:[#allocation2] sm:$0xc0] }
 0x308   : > { %1736 = vmatpush.msrb.mxu0 %v5700_v50  ;;  %1756 = vmatpush.msrb.mxu1 %v7788_v38 }
 0x309   : > { %1776 = vmatpush.msrb.mxu2 %v5706_v52  ;;  %1796 = vmatpush.msrb.mxu3 %v5711_v53 }
 0x30a   : > { %1737 = vmatpush.msrb.mxu0 %v7789_v39  ;;  %1757 = vmatpush.msrb.mxu1 %v7790_v35 }
 0x30b   : > { %1777 = vmatpush.msrb.mxu2 %v7791_v41  ;;  %1797 = vmatpush.msrb.mxu3 %v7792_v42  ;;  %v1442_v42 = vld [vmem:[#allocation2 + $0x8] sm:$0x3] }
 0x30c   : > { %1738 = vmatpush.msrb.mxu0 %v5732_v57  ;;  %1758 = vmatpush.msrb.mxu1 %v5735_v58 }
 0x30d   : > { %1778 = vmatpush.msrb.mxu2 %v5738_v59  ;;  %1798 = vmatpush.msrb.mxu3 %v5743_v60 }
 0x30e   : > { %1739 = vmatpush.msrb.mxu0 %v5748_v61  ;;  %1759 = vmatpush.msrb.mxu1 %v5751_v62  ;;  %v1210_v61 = vld [vmem:[#allocation2 + $0x18] sm:$0xc0] }
 0x30f   : > { %1779 = vmatpush.msrb.mxu2 %v5754_v63  ;;  %1799 = vmatpush.msrb.mxu3 %v5759_v4 }
 0x310   : > { %1740 = vmatpush.msrb.mxu0 %v5764_v7  ;;  %1760 = vmatpush.msrb.mxu1 %v5767_v8 }
 0x311   : > { %1780 = vmatpush.msrb.mxu2 %v5770_v9  ;;  %1800 = vmatpush.msrb.mxu3 %v5775_v10 }
 0x312   : > { %1741 = vmatpush.msrb.mxu0 %v5780_v13  ;;  %1761 = vmatpush.msrb.mxu1 %v5783_v14 }
 0x313   : > { %1781 = vmatpush.msrb.mxu2 %v5786_v15  ;;  %1801 = vmatpush.msrb.mxu3 %v5791_v16  ;;  %v1211_v16 = vld [vmem:[#allocation2 + $0x10] sm:$0xc0] }
 0x314   : > { %1742 = vmatpush.msrb.mxu0 %v5796_v20  ;;  %1762 = vmatpush.msrb.mxu1 %v5799_v21 }
 0x315   : > { %1782 = vmatpush.msrb.mxu2 %v5804_v22  ;;  %1802 = vmatpush.msrb.mxu3 %v5807_v24 }
 0x316   : > { %1743 = vmatpush.msrb.mxu0 %v5810_v25  ;;  %1763 = vmatpush.msrb.mxu1 %v5815_v27 }
 0x317   : > { %1783 = vmatpush.msrb.mxu2 %v5818_v28  ;;  %1803 = vmatpush.msrb.mxu3 %v5821_v29 }
 0x318   : > { %1744 = vmatpush.msrb.mxu0 %v7773_v6  ;;  %1764 = vmatpush.msrb.mxu1 %v7774_v0 }
 0x319   : > { %1784 = vmatpush.msrb.mxu2 %v7775_v30  ;;  %1804 = vmatpush.msrb.mxu3 %v7776_v18  ;;  %v1434_v18 = vrot.slane %v5952_v36, 6 }
 0x31a   : > { %1745 = vmatpush.msrb.mxu0 %v7777_v5  ;;  %1765 = vmatpush.msrb.mxu1 %v7778_v33 }
 0x31b   : > { %1785 = vmatpush.msrb.mxu2 %v7779_v43  ;;  %1805 = vmatpush.msrb.mxu3 %v5851_v11 }
 0x31c   : > { %1746 = vmatpush.msrb.mxu0 %v5856_v12  ;;  %1766 = vmatpush.msrb.mxu1 %v5859_v17 }
 0x31d   : > { %1786 = vmatpush.msrb.mxu2 %v5864_v19  ;;  %1806 = vmatpush.msrb.mxu3 %v5867_v26 }
 0x31e   : > { %1747 = vmatpush.msrb.mxu0 %v5872_v1  ;;  %1767 = vmatpush.msrb.mxu1 %v7780_v23 }
 0x31f   : > { %1787 = vmatpush.msrb.mxu2 %v5882_v3  ;;  %1807 = vmatpush.msrb.mxu3 %v5885_v2 }
 0x37b   : > { %v1296_v48 = vpop.f32.mrf.mxu0  ;;  %v1316_v50 = vpop.f32.mrf.mxu1 }
 0x37c   : > { %v1363_v52 = vrot.slane %v1296_v48, 2  ;;  %v1364_v53 = vrot.slane %v1316_v50, 2 }
 0x37e   : > { %v1371_v57 = vadd.f32 %v1363_v52, %v1208_v47  ;;  %v1372_v58 = vadd.f32 %v1364_v53, %v1209_v49  ;;  %v1443_v47 = vld [vmem:[#allocation2 + $0x20] sm:$0x3] }
 0x380   : > { %v4426_v59 = vmul.f32 -1.442695, %v1371_v57  ;;  %v4427_v60 = vmul.f32 -1.442695, %v1372_v58  ;;  %v1444_v58 = vld [vmem:[#allocation2 + $0x28] sm:$0x3] }
 0x382   : > { %4611 = vpow2.f32 %v4426_v59  ;;  %v1336_v62 = vpop.f32.mrf.mxu2  ;;  %v1356_v14 = vpop.f32.mrf.mxu3 }
 0x383   : > { %4613 = vpow2.f32 %v4427_v60  ;;  %v1365_v63 = vrot.slane %v1336_v62, 2  ;;  %v1366_v15 = vrot.slane %v1356_v14, 2 }
 0x385   : > { %v1373_v4 = vadd.f32 %v1365_v63, %v1210_v61  ;;  %v1374_v24 = vadd.f32 %v1366_v15, %v1211_v16 }
 0x387   : > { %v4428_v7 = vmul.f32 -1.442695, %v1373_v4 }
 0x388   : > { %v4612_v8 = vpop.eup %4611 }
 0x389   : > { %v4614_v9 = vpop.eup %4613  ;;  %v1384_v10 = vadd.f32 1.0, %v4612_v8  ;;  %4615 = vpow2.f32 %v4428_v7  ;;  %v1445_v8 = vld [vmem:[#allocation2 + $0x38] sm:$0x3] }
 0x38a   : > { %v1385_v13 = vadd.f32 1.0, %v4614_v9 }
 0x38b   : > { %4617 = vrcp.f32 %v1384_v10  ;;  %v1398_v2 = vand.u32 2147483648, %v1384_v10  ;;  %v1396_v12 = vand.u32 2147483647, %v1384_v10  ;;  %vm1392_vm7 = vweird.f32 %v1384_v10 }
 0x38c   : > { %4619 = vrcp.f32 %v1385_v13  ;;  %v1413_v3 = vand.u32 2147483648, %v1385_v13  ;;  %v1411_v19 = vand.u32 2147483647, %v1385_v13  ;;  %vm1407_vm8 = vweird.f32 %v1385_v13 }
 0x38d   : > { %v1399_v0 = vor.u32 1.1754944e-38, %v1398_v2  ;;  %vm1397_vm11 = vcmp.eq.f32.partialorder %v1396_v12, 8.507059e+37 }
 0x38e   : > { %v1414_v32 = vor.u32 1.1754944e-38, %v1413_v3  ;;  %vm1412_vm12 = vcmp.eq.f32.partialorder %v1411_v19, 8.507059e+37 }
 0x38f   : > { %v4616_v20 = vpop.eup %4615 }
 0x390   : > { %v1386_v21 = vadd.f32 1.0, %v4616_v20 }
 0x391   : > { %v4618_v22 = vpop.eup %4617 }
 0x392   : > { %v4620_v25 = vpop.eup %4619  ;;  %v1388_v27 = vmul.f32 %v4618_v22, %v1384_v10  ;;  %4621 = vrcp.f32 %v1386_v21  ;;  %vm1393_vm5 = vweird.f32 %v4618_v22  ;;  %v1428_v36 = vand.u32 2147483648, %v1386_v21 }
 0x393   : > { %v1403_v28 = vmul.f32 %v4620_v25, %v1385_v13  ;;  %4623 = vtanh.f32 %v1374_v24  ;;  %vm1408_vm6 = vweird.f32 %v4620_v25  ;;  %vm1394_vm9 = vmor %vm1392_vm7, %vm1393_vm5  ;;  %vm1422_vm14 = vweird.f32 %v1386_v21 }
 0x394   : > { %v1389_v29 = vsub.f32 1.0, %v1388_v27  ;;  %vm1409_vm10 = vmor %vm1407_vm8, %vm1408_vm6  ;;  %v1426_v55 = vand.u32 2147483647, %v1386_v21  ;;  %v1429_v34 = vor.u32 1.1754944e-38, %v1428_v36 }
 0x395   : > { %v1404_v1 = vsub.f32 1.0, %v1403_v28 }
 0x396   : > { %v1390_v11 = vmul.f32 %v4618_v22, %v1389_v29  ;;  %vm1427_vm0 = vcmp.eq.f32.partialorder %v1426_v55, 8.507059e+37 }
 0x397   : > { %v1405_v17 = vmul.f32 %v4620_v25, %v1404_v1 }
 0x398   : > { %v4622_v26 = vpop.eup %4621  ;;  %v1391_v40 = vadd.f32 %v4618_v22, %v1390_v11 }
 0x399   : > { %v1418_v6 = vmul.f32 %v4622_v26, %v1386_v21  ;;  %v1406_v30 = vadd.f32 %v4620_v25, %v1405_v17  ;;  %v4624_v5 = vpop.eup %4623  ;;  %vm1423_vm13 = vweird.f32 %v4622_v26 }
 0x39a   : > { %v1395_v44 = vsel %vm1394_vm9, %v4618_v22, %v1391_v40  ;;  %vm1424_vm15 = vmor %vm1422_vm14, %vm1423_vm13 }
 0x39b   : > { %v1419_v33 = vsub.f32 1.0, %v1418_v6  ;;  %v1400_v31 = vsel %vm1397_vm11, %v1399_v0, %v1395_v44  ;;  %v1410_v43 = vsel %vm1409_vm10, %v4620_v25, %v1406_v30 }
 0x39c   : > { %v1415_v37 = vsel %vm1412_vm12, %v1414_v32, %v1410_v43  ;;  %v1437_v23 = vmul.f32 %v4624_v5, %v1400_v31 }
 0x39d   : > { %v1436_v45 = vmul.f32 %v1434_v18, %v1415_v37  ;;  %v1420_v46 = vmul.f32 %v4622_v26, %v1419_v33 }
 0x39f   : > { %v6055_v51 = vadd.f32 %v1437_v23, %v1436_v45  ;;  %v1421_v54 = vadd.f32 %v4622_v26, %v1420_v46 }
 0x3a1   : > { %4625 = vtanh.f32 %v6055_v51  ;;  %v1425_v56 = vsel %vm1424_vm15, %v4622_v26, %v1421_v54  ;;  %v1656_v6 = vrot.slane %v6055_v51, 6 }
 0x3a2   : > { %v1430_v39 = vsel %vm1427_vm0, %v1429_v34, %v1425_v56  ;;  %v6065_v56 = vld [vmem:[%s5202_s6 + $0x1e0] sm:$0xff]  ;;  %v6068_v34 = vld [vmem:[%s5202_s6 + $0x1e8] sm:$0xff] }
 0x3a7   : > { %v4626_v38 = vpop.eup %4625 }
 0x3a8   : > { %v1440_v35 = vmul.f32 %v4626_v38, %v1430_v39  ;;  %v6071_v38 = vld [vmem:[%s5202_s6 + $0x1f0] sm:$0xff]  ;;  %v6076_v39 = vld [vmem:[%s5202_s6 + $0x1f8] sm:$0xff] }
 0x3aa   : > { %1441 = vst [vmem:[%s5239_s27] sm:$0xc0] %v1440_v35  ;;  %v1511_v41 = vrot.slane %v1440_v35, 6  ;;  %v6081_v35 = vld [vmem:[%s5202_s6 + $0x1c0] sm:$0xff] }
 0x3ac   : > { %1529 = vmatmul.f32.vlgmr.msra.gmra.mxu0 %v1511_v41  ;;  %1549 = vmatmul.f32.vlgmr.msra.gmra.mxu1 %v1511_v41 }
 0x3ad   : > { %1569 = vmatmul.f32.vlgmr.msra.gmra.mxu2 %v1511_v41  ;;  %1589 = vmatmul.f32.vlgmr.msra.gmra.mxu3 %v1511_v41  ;;  %v6084_v41 = vld [vmem:[%s5202_s6 + $0x1c8] sm:$0xff] }
 0x3ae   : > { %1966 = vmatpush.msra.mxu0 %v6065_v56  ;;  %1986 = vmatpush.msra.mxu1 %v6068_v34 }
 0x3af   : > { %2006 = vmatpush.msra.mxu2 %v6071_v38  ;;  %2026 = vmatpush.msra.mxu3 %v6076_v39 }
 0x3b0   : > { %1967 = vmatpush.msra.mxu0 %v6081_v35  ;;  %1987 = vmatpush.msra.mxu1 %v6084_v41 }
 0x429   : > { %v1530_v48 = vpop.f32.mrf.mxu0  ;;  %v1550_v49 = vpop.f32.mrf.mxu1 }
 0x42a   : > { %v1593_v50 = vadd.f32 %v1530_v48, %v1442_v42  ;;  %v1594_v52 = vadd.f32 %v1550_v49, %v1443_v47  ;;  %v6087_v42 = vld [vmem:[%s5202_s6 + $0x1d0] sm:$0xff]  ;;  %v6092_v47 = vld [vmem:[%s5202_s6 + $0x1d8] sm:$0xff]  ;;  %v6097_v48 = vld [vmem:[%s5202_s6 + $0x1a0] sm:$0xff] }
 0x42b   : > { %2007 = vmatpush.msra.mxu2 %v6087_v42  ;;  %2027 = vmatpush.msra.mxu3 %v6092_v47  ;;  %v6100_v49 = vld [vmem:[%s5202_s6 + $0x1a8] sm:$0xff] }
 0x42c   : > { %v4429_v53 = vmul.f32 -1.442695, %v1593_v50  ;;  %v4430_v57 = vmul.f32 -1.442695, %v1594_v52  ;;  %v6103_v50 = vld [vmem:[%s5202_s6 + $0x1b0] sm:$0xff]  ;;  %1968 = vmatpush.msra.mxu0 %v6097_v48  ;;  %1988 = vmatpush.msra.mxu1 %v6100_v49  ;;  %v6108_v52 = vld [vmem:[%s5202_s6 + $0x1b8] sm:$0xff] }
 0x42d   : > { %2008 = vmatpush.msra.mxu2 %v6103_v50  ;;  %2028 = vmatpush.msra.mxu3 %v6108_v52 }
 0x42e   : > { %4627 = vpow2.f32 %v4429_v53  ;;  %v6113_v53 = vld [vmem:[%s5202_s6 + $0x180] sm:$0xff] }
 0x42f   : > { %4629 = vpow2.f32 %v4430_v57  ;;  %v6116_v57 = vld [vmem:[%s5202_s6 + $0x188] sm:$0xff]  ;;  %1969 = vmatpush.msra.mxu0 %v6113_v53 }
 0x430   : > { %v1570_v59 = vpop.f32.mrf.mxu2  ;;  %v1590_v9 = vpop.f32.mrf.mxu3  ;;  %1989 = vmatpush.msra.mxu1 %v6116_v57 }
 0x431   : > { %v1595_v60 = vadd.f32 %v1570_v59, %v1444_v58  ;;  %v1596_v15 = vadd.f32 %v1590_v9, %v1445_v8  ;;  %v6119_v58 = vld [vmem:[%s5202_s6 + $0x190] sm:$0xff]  ;;  %v6124_v59 = vld [vmem:[%s5202_s6 + $0x198] sm:$0xff] }
 0x432   : > { %2009 = vmatpush.msra.mxu2 %v6119_v58  ;;  %2029 = vmatpush.msra.mxu3 %v6124_v59  ;;  %v6151_v8 = vld [vmem:[%s5202_s6 + $0x150] sm:$0xff]  ;;  %v6156_v9 = vld [vmem:[%s5202_s6 + $0x158] sm:$0xff] }
 0x433   : > { %v4431_v61 = vmul.f32 -1.442695, %v1595_v60  ;;  %v6129_v60 = vld [vmem:[%s5202_s6 + $0x160] sm:$0xff] }
 0x434   : > { %v4628_v62 = vpop.eup %4627  ;;  %1970 = vmatpush.msra.mxu0 %v6129_v60 }
 0x435   : > { %v4630_v63 = vpop.eup %4629  ;;  %v1606_v4 = vadd.f32 1.0, %v4628_v62  ;;  %4631 = vpow2.f32 %v4431_v61  ;;  %v6132_v61 = vld [vmem:[%s5202_s6 + $0x168] sm:$0xff]  ;;  %v6135_v62 = vld [vmem:[%s5202_s6 + $0x170] sm:$0xff] }
 0x436   : > { %v1607_v7 = vadd.f32 1.0, %v4630_v63  ;;  %1990 = vmatpush.msra.mxu1 %v6132_v61  ;;  %v6140_v63 = vld [vmem:[%s5202_s6 + $0x178] sm:$0xff]  ;;  %2010 = vmatpush.msra.mxu2 %v6135_v62 }
 0x437   : > { %4633 = vrcp.f32 %v1606_v4  ;;  %v1620_v25 = vand.u32 2147483648, %v1606_v4  ;;  %v1618_v29 = vand.u32 2147483647, %v1606_v4  ;;  %vm1614_vm3 = vweird.f32 %v1606_v4  ;;  %2030 = vmatpush.msra.mxu3 %v6140_v63 }
 0x438   : > { %4635 = vrcp.f32 %v1607_v7  ;;  %v1635_v27 = vand.u32 2147483648, %v1607_v7  ;;  %v1633_v2 = vand.u32 2147483647, %v1607_v7  ;;  %vm1629_vm4 = vweird.f32 %v1607_v7  ;;  %2011 = vmatpush.msra.mxu2 %v6151_v8 }
 0x439   : > { %v1621_v17 = vor.u32 1.1754944e-38, %v1620_v25  ;;  %vm1619_vm7 = vcmp.eq.f32.partialorder %v1618_v29, 8.507059e+37  ;;  %2031 = vmatpush.msra.mxu3 %v6156_v9  ;;  %v1665_v25 = vld [vmem:[#allocation2 + $0x20] sm:$0xc] }
 0x43a   : > { %v1636_v26 = vor.u32 1.1754944e-38, %v1635_v27  ;;  %vm1634_vm8 = vcmp.eq.f32.partialorder %v1633_v2, 8.507059e+37  ;;  %v6193_v2 = vld [vmem:[%s5202_s6 + $0xe0] sm:$0xff] }
 0x43b   : > { %v4632_v10 = vpop.eup %4631 }
 0x43c   : > { %v1608_v13 = vadd.f32 1.0, %v4632_v10  ;;  %v6161_v10 = vld [vmem:[%s5202_s6 + $0x120] sm:$0xff] }
 0x43d   : > { %v4634_v14 = vpop.eup %4633 }
 0x43e   : > { %v4636_v16 = vpop.eup %4635  ;;  %v1610_v20 = vmul.f32 %v4634_v14, %v1606_v4  ;;  %4637 = vrcp.f32 %v1608_v13  ;;  %vm1615_vm1 = vweird.f32 %v4634_v14  ;;  %v1650_v23 = vand.u32 2147483648, %v1608_v13  ;;  %v6145_v4 = vld [vmem:[%s5202_s6 + $0x140] sm:$0xff] }
 0x43f   : > { %v1625_v21 = vmul.f32 %v4636_v16, %v1607_v7  ;;  %4639 = vtanh.f32 %v1596_v15  ;;  %vm1630_vm2 = vweird.f32 %v4636_v16  ;;  %vm1616_vm5 = vmor %vm1614_vm3, %vm1615_vm1  ;;  %vm1644_vm10 = vweird.f32 %v1608_v13  ;;  %v6148_v7 = vld [vmem:[%s5202_s6 + $0x148] sm:$0xff]  ;;  %1971 = vmatpush.msra.mxu0 %v6145_v4  ;;  %v6172_v15 = vld [vmem:[%s5202_s6 + $0x138] sm:$0xff] }
 0x440   : > { %v1611_v22 = vsub.f32 1.0, %v1610_v20  ;;  %vm1631_vm6 = vmor %vm1629_vm4, %vm1630_vm2  ;;  %v1648_v45 = vand.u32 2147483647, %v1608_v13  ;;  %v1651_v51 = vor.u32 1.1754944e-38, %v1650_v23  ;;  %1991 = vmatpush.msra.mxu1 %v6148_v7  ;;  %2032 = vmatpush.msra.mxu3 %v6172_v15  ;;  %v6180_v20 = vld [vmem:[%s5202_s6 + $0x108] sm:$0xff] }
 0x441   : > { %v1626_v24 = vsub.f32 1.0, %v1625_v21  ;;  %1972 = vmatpush.msra.mxu0 %v6161_v10  ;;  %v6183_v21 = vld [vmem:[%s5202_s6 + $0x110] sm:$0xff] }
 0x442   : > { %v1612_v28 = vmul.f32 %v4634_v14, %v1611_v22  ;;  %vm1649_vm12 = vcmp.eq.f32.partialorder %v1648_v45, 8.507059e+37  ;;  %v1664_v22 = vld [vmem:[#allocation2 + $0x8] sm:$0xc]  ;;  %v6244_v45 = vld [vmem:[%s5202_s6 + $0x88] sm:$0xff] }
 0x443   : > { %v1627_v1 = vmul.f32 %v4636_v16, %v1626_v24 }
 0x444   : > { %v4638_v3 = vpop.eup %4637  ;;  %v1613_v11 = vadd.f32 %v4634_v14, %v1612_v28  ;;  %v6188_v28 = vld [vmem:[%s5202_s6 + $0x118] sm:$0xff] }
 0x445   : > { %v1640_v12 = vmul.f32 %v4638_v3, %v1608_v13  ;;  %v1628_v19 = vadd.f32 %v4636_v16, %v1627_v1  ;;  %v4640_v0 = vpop.eup %4639  ;;  %vm1645_vm9 = vweird.f32 %v4638_v3  ;;  %v6164_v13 = vld [vmem:[%s5202_s6 + $0x128] sm:$0xff]  ;;  %2033 = vmatpush.msra.mxu3 %v6188_v28 }
 0x446   : > { %v1617_v40 = vsel %vm1616_vm5, %v4634_v14, %v1613_v11  ;;  %vm1646_vm11 = vmor %vm1644_vm10, %vm1645_vm9  ;;  %v6167_v14 = vld [vmem:[%s5202_s6 + $0x130] sm:$0xff]  ;;  %1992 = vmatpush.msra.mxu1 %v6164_v13 }
 0x447   : > { %v1641_v30 = vsub.f32 1.0, %v1640_v12  ;;  %v1622_v18 = vsel %vm1619_vm7, %v1621_v17, %v1617_v40  ;;  %v1632_v32 = vsel %vm1631_vm6, %v4636_v16, %v1628_v19  ;;  %2012 = vmatpush.msra.mxu2 %v6167_v14  ;;  %v6177_v16 = vld [vmem:[%s5202_s6 + $0x100] sm:$0xff]  ;;  %v6199_v11 = vld [vmem:[%s5202_s6 + $0xf0] sm:$0xff]  ;;  %v6204_v12 = vld [vmem:[%s5202_s6 + $0xf8] sm:$0xff] }
 0x448   : > { %v1637_v44 = vsel %vm1634_vm8, %v1636_v26, %v1632_v32  ;;  %v1659_v5 = vmul.f32 %v4640_v0, %v1622_v18  ;;  %1973 = vmatpush.msra.mxu0 %v6177_v16  ;;  %1993 = vmatpush.msra.mxu1 %v6180_v20  ;;  %v6209_v26 = vld [vmem:[%s5202_s6 + $0xc0] sm:$0xff]  ;;  %v6212_v40 = vld [vmem:[%s5202_s6 + $0xc8] sm:$0xff]  ;;  %v6220_v0 = vld [vmem:[%s5202_s6 + $0xd8] sm:$0xff] }
 0x449   : > { %v1642_v33 = vmul.f32 %v4638_v3, %v1641_v30  ;;  %v1658_v31 = vmul.f32 %v1656_v6, %v1637_v44  ;;  %2013 = vmatpush.msra.mxu2 %v6183_v21  ;;  %2034 = vmatpush.msra.mxu3 %v6204_v12  ;;  %v6215_v6 = vld [vmem:[%s5202_s6 + $0xd0] sm:$0xff]  ;;  %v1666_v32 = vld [vmem:[#allocation2 + $0x28] sm:$0xc] }
 0x44a   : > { %1974 = vmatpush.msra.mxu0 %v6193_v2  ;;  %v6225_v44 = vld [vmem:[%s5202_s6 + $0xa0] sm:$0xff] }
 0x44b   : > { %v6060_v43 = vadd.f32 %v1659_v5, %v1658_v31  ;;  %v1643_v37 = vadd.f32 %v4638_v3, %v1642_v33  ;;  %2014 = vmatpush.msra.mxu2 %v6199_v11  ;;  %2035 = vmatpush.msra.mxu3 %v6220_v0  ;;  %v6228_v5 = vld [vmem:[%s5202_s6 + $0xa8] sm:$0xff]  ;;  %v6233_v33 = vld [vmem:[%s5202_s6 + $0xb0] sm:$0xff]  ;;  %v6236_v31 = vld [vmem:[%s5202_s6 + $0xb8] sm:$0xff] }
 0x44c   : > { %1975 = vmatpush.msra.mxu0 %v6209_v26 }
 0x44d   : > { %4641 = vtanh.f32 %v6060_v43  ;;  %v1647_v46 = vsel %vm1646_vm11, %v4638_v3, %v1643_v37  ;;  %v6196_v3 = vld [vmem:[%s5202_s6 + $0xe8] sm:$0xff]  ;;  %2015 = vmatpush.msra.mxu2 %v6215_v6  ;;  %v6239_v37 = vld [vmem:[%s5202_s6 + $0x80] sm:$0xff]  ;;  %2036 = vmatpush.msra.mxu3 %v6236_v31 }
 0x44e   : > { %v1652_v36 = vsel %vm1649_vm12, %v1651_v51, %v1647_v46  ;;  %1994 = vmatpush.msra.mxu1 %v6196_v3  ;;  %1976 = vmatpush.msra.mxu0 %v6225_v44  ;;  %v6247_v46 = vld [vmem:[%s5202_s6 + $0x90] sm:$0xff]  ;;  %v6250_v51 = vld [vmem:[%s5202_s6 + $0x98] sm:$0xff] }
 0x44f   : > { %2016 = vmatpush.msra.mxu2 %v6233_v33  ;;  %2037 = vmatpush.msra.mxu3 %v6250_v51 }
 0x450   : > { %1995 = vmatpush.msra.mxu1 %v6212_v40  ;;  %1977 = vmatpush.msra.mxu0 %v6239_v37 }
 0x451   : > { %2017 = vmatpush.msra.mxu2 %v6247_v46 }
 0x452   : > { %1996 = vmatpush.msra.mxu1 %v6228_v5 }
 0x453   : > { %v4642_v54 = vpop.eup %4641 }
 0x454   : > { %v1662_v55 = vmul.f32 %v4642_v54, %v1652_v36  ;;  %1997 = vmatpush.msra.mxu1 %v6244_v45  ;;  %v6255_v36 = vld [vmem:[%s5202_s6 + $0x60] sm:$0xff] }
 0x455   : > { %7793 = vst [vmem:[#allocation36_spill] sm:$0xff] %v6255_v36  ;;  %1978 = vmatpush.msra.mxu0 %v6255_v36 }
 0x456   : > { %1663 = vst [vmem:[%s5239_s27 + $0x8] sm:$0x3] %v1662_v55  ;;  %1748 = vmatmul.f32.vlgmr.msrb.gmra.mxu0 %v1662_v55  ;;  %1768 = vmatmul.f32.vlgmr.msrb.gmra.mxu1 %v1662_v55 }
 0x457   : > { %1788 = vmatmul.f32.vlgmr.msrb.gmra.mxu2 %v1662_v55  ;;  %1808 = vmatmul.f32.vlgmr.msrb.gmra.mxu3 %v1662_v55  ;;  %v6258_v55 = vld [vmem:[%s5202_s6 + $0x68] sm:$0xff] }
 0x458   : > { %7794 = vst [vmem:[#allocation37_spill] sm:$0xff] %v6258_v55  ;;  %1998 = vmatpush.msra.mxu1 %v6258_v55 }
 0x4d3   : > { %v1749_v24 = vpop.f32.mrf.mxu0  ;;  %v1769_v27 = vpop.f32.mrf.mxu1 }
 0x4d4   : > { %v1816_v29 = vrot.slane %v1749_v24, 6  ;;  %v1817_v1 = vrot.slane %v1769_v27, 6  ;;  %v6266_v24 = vld [vmem:[%s5202_s6 + $0x78] sm:$0xff]  ;;  %v6272_v27 = vld [vmem:[%s5202_s6 + $0x48] sm:$0xff] }
 0x4d5   : > { %7796 = vst [vmem:[#allocation39_spill] sm:$0xff] %v6266_v24  ;;  %2038 = vmatpush.msra.mxu3 %v6266_v24  ;;  %1999 = vmatpush.msra.mxu1 %v6272_v27  ;;  %v6301_v24 = vld [vmem:[%s5202_s6] sm:$0xff] }
 0x4d6   : > { %v1824_v17 = vadd.f32 %v1816_v29, %v1664_v22  ;;  %v1825_v19 = vadd.f32 %v1817_v1, %v1665_v25  ;;  %v6261_v22 = vld [vmem:[%s5202_s6 + $0x70] sm:$0xff]  ;;  %v6269_v25 = vld [vmem:[%s5202_s6 + $0x40] sm:$0xff]  ;;  %7798 = vst [vmem:[#allocation41_spill] sm:$0xff] %v6272_v27 }
 0x4d7   : > { %7795 = vst [vmem:[#allocation38_spill] sm:$0xff] %v6261_v22  ;;  %v6277_v1 = vld [vmem:[%s5202_s6 + $0x50] sm:$0xff]  ;;  %2018 = vmatpush.msra.mxu2 %v6261_v22  ;;  %1979 = vmatpush.msra.mxu0 %v6269_v25  ;;  %v6304_v22 = vld [vmem:[%s5202_s6 + $0x8] sm:$0xff] }
 0x4d8   : > { %v4432_v30 = vmul.f32 -1.442695, %v1824_v17  ;;  %v4433_v18 = vmul.f32 -1.442695, %v1825_v19  ;;  %7797 = vst [vmem:[#allocation40_spill] sm:$0xff] %v6269_v25  ;;  %v6280_v17 = vld [vmem:[%s5202_s6 + $0x58] sm:$0xff] }
 0x4d9   : > { %7799 = vst [vmem:[#allocation42_spill] sm:$0xff] %v6277_v1  ;;  %v6285_v19 = vld [vmem:[%s5202_s6 + $0x20] sm:$0xff]  ;;  %2019 = vmatpush.msra.mxu2 %v6277_v1  ;;  %2039 = vmatpush.msra.mxu3 %v6280_v17  ;;  %v6311_v27 = vld [vmem:[%s5202_s6 + $0x10] sm:$0xff]  ;;  %v6314_v25 = vld [vmem:[%s5202_s6 + $0x18] sm:$0xff] }
 0x4da   : > { %4643 = vpow2.f32 %v4432_v30  ;;  %v1789_v23 = vpop.f32.mrf.mxu2  ;;  %v6288_v30 = vld [vmem:[%s5202_s6 + $0x28] sm:$0xff]  ;;  %7800 = vst [vmem:[#allocation43_spill] sm:$0xff] %v6304_v22  ;;  %1980 = vmatpush.msra.mxu0 %v6285_v19  ;;  %v1809_v1 = vpop.f32.mrf.mxu3 }
 0x4db   : > { %4645 = vpow2.f32 %v4433_v18  ;;  %v1818_v54 = vrot.slane %v1789_v23, 6  ;;  %v6296_v23 = vld [vmem:[%s5202_s6 + $0x38] sm:$0xff]  ;;  %2000 = vmatpush.msra.mxu1 %v6288_v30 }
 0x4dc   : > { %2040 = vmatpush.msra.mxu3 %v6296_v23  ;;  %1981 = vmatpush.msra.mxu0 %v6301_v24 }
 0x4dd   : > { %v1826_v29 = vadd.f32 %v1818_v54, %v1666_v32  ;;  %v6293_v32 = vld [vmem:[%s5202_s6 + $0x30] sm:$0xff]  ;;  %2001 = vmatpush.msra.mxu1 %v6304_v22 }
 0x4de   : > { %2020 = vmatpush.msra.mxu2 %v6293_v32  ;;  %2041 = vmatpush.msra.mxu3 %v6314_v25 }
 0x4df   : > { %v4434_v18 = vmul.f32 -1.442695, %v1826_v29  ;;  %2200 = vmatpush.msrb.mxu0 %v6065_v56  ;;  %2220 = vmatpush.msrb.mxu1 %v6068_v34 }
 0x4e0   : > { %v4644_v54 = vpop.eup %4643  ;;  %2021 = vmatpush.msra.mxu2 %v6311_v27  ;;  %2260 = vmatpush.msrb.mxu3 %v6076_v39 }
 0x4e1   : > { %v4646_v55 = vpop.eup %4645  ;;  %v6306_v29 = vadd.f32 1.0, %v4644_v54  ;;  %4647 = vpow2.f32 %v4434_v18  ;;  %v1819_v18 = vrot.slane %v1809_v1, 6  ;;  %2201 = vmatpush.msrb.mxu0 %v6081_v35  ;;  %2221 = vmatpush.msrb.mxu1 %v6084_v41 }
 0x4e2   : > { %v6316_v36 = vadd.f32 1.0, %v4646_v55  ;;  %v1667_v55 = vld [vmem:[#allocation2 + $0x38] sm:$0xc]  ;;  %2240 = vmatpush.msrb.mxu2 %v6071_v38  ;;  %2261 = vmatpush.msrb.mxu3 %v6092_v47 }
 0x4e3   : > { %4649 = vrcp.f32 %v6306_v29  ;;  %v1827_v56 = vadd.f32 %v1819_v18, %v1667_v55  ;;  %2202 = vmatpush.msrb.mxu0 %v6097_v48  ;;  %2222 = vmatpush.msrb.mxu1 %v6100_v49  ;;  %v1849_v49 = vand.u32 2147483647, %v6306_v29  ;;  %vm1845_vm15 = vweird.f32 %v6306_v29 }
 0x4e4   : > { %4651 = vrcp.f32 %v6316_v36  ;;  %2241 = vmatpush.msrb.mxu2 %v6087_v42  ;;  %2262 = vmatpush.msrb.mxu3 %v6108_v52  ;;  %v1851_v42 = vand.u32 2147483648, %v6306_v29  ;;  %v1866_v47 = vand.u32 2147483648, %v6316_v36  ;;  %v1864_v52 = vand.u32 2147483647, %v6316_v36 }
 0x4e5   : > { %2203 = vmatpush.msrb.mxu0 %v6113_v53  ;;  %2223 = vmatpush.msrb.mxu1 %v6116_v57  ;;  %vm1860_vm0 = vweird.f32 %v6316_v36  ;;  %vm1850_vm3 = vcmp.eq.f32.partialorder %v1849_v49, 8.507059e+37 }
 0x4e6   : > { %2242 = vmatpush.msrb.mxu2 %v6103_v50  ;;  %2263 = vmatpush.msrb.mxu3 %v6124_v59  ;;  %v1852_v59 = vor.u32 1.1754944e-38, %v1851_v42  ;;  %vm1865_vm4 = vcmp.eq.f32.partialorder %v1864_v52, 8.507059e+37 }
 0x4e7   : > { %v4648_v54 = vpop.eup %4647  ;;  %2204 = vmatpush.msrb.mxu0 %v6129_v60  ;;  %2224 = vmatpush.msrb.mxu1 %v6132_v61  ;;  %v1887_v61 = vrot.slane %v6060_v43, 6 }
 0x4e8   : > { %v6332_v22 = vadd.f32 1.0, %v4648_v54  ;;  %2243 = vmatpush.msrb.mxu2 %v6119_v58  ;;  %2264 = vmatpush.msrb.mxu3 %v6140_v63 }
 0x4e9   : > { %v4650_v1 = vpop.eup %4649  ;;  %2205 = vmatpush.msrb.mxu0 %v6145_v4  ;;  %2225 = vmatpush.msrb.mxu1 %v6148_v7 }
 0x4ea   : > { %v4652_v34 = vpop.eup %4651  ;;  %v1841_v38 = vmul.f32 %v4650_v1, %v6306_v29  ;;  %4653 = vrcp.f32 %v6332_v22  ;;  %vm1846_vm13 = vweird.f32 %v4650_v1  ;;  %2244 = vmatpush.msrb.mxu2 %v6135_v62  ;;  %2265 = vmatpush.msrb.mxu3 %v6156_v9  ;;  %v1867_v62 = vor.u32 1.1754944e-38, %v1866_v47 }
 0x4eb   : > { %v1856_v39 = vmul.f32 %v4652_v34, %v6316_v36  ;;  %4655 = vtanh.f32 %v1827_v56  ;;  %vm1861_vm14 = vweird.f32 %v4652_v34  ;;  %vm1847_vm1 = vmor %vm1845_vm15, %vm1846_vm13  ;;  %2206 = vmatpush.msrb.mxu0 %v6161_v10  ;;  %2226 = vmatpush.msrb.mxu1 %v6164_v13  ;;  %vm1875_vm6 = vweird.f32 %v6332_v22 }
 0x4ec   : > { %v1842_v35 = vsub.f32 1.0, %v1841_v38  ;;  %2245 = vmatpush.msrb.mxu2 %v6151_v8  ;;  %vm1862_vm2 = vmor %vm1860_vm0, %vm1861_vm14  ;;  %2266 = vmatpush.msrb.mxu3 %v6172_v15 }
 0x4ed   : > { %v1857_v41 = vsub.f32 1.0, %v1856_v39  ;;  %2207 = vmatpush.msrb.mxu0 %v6177_v16  ;;  %2227 = vmatpush.msrb.mxu1 %v6180_v20  ;;  %v1881_v20 = vand.u32 2147483648, %v6332_v22  ;;  %v1898_v39 = vld [vmem:[#allocation2 + $0x38] sm:$0x30] }
 0x4ee   : > { %v1843_v48 = vmul.f32 %v4650_v1, %v1842_v35  ;;  %2246 = vmatpush.msrb.mxu2 %v6167_v14  ;;  %2267 = vmatpush.msrb.mxu3 %v6188_v28 }
 0x4ef   : > { %v1858_v50 = vmul.f32 %v4652_v34, %v1857_v41  ;;  %2208 = vmatpush.msrb.mxu0 %v6193_v2  ;;  %2228 = vmatpush.msrb.mxu1 %v6196_v3  ;;  %v1882_v2 = vor.u32 1.1754944e-38, %v1881_v20  ;;  %v7801_v3 = vld [vmem:[#allocation36_spill] sm:$0xff] }
 0x4f0   : > { %v6357_v53 = vpop.eup %4653  ;;  %v1844_v57 = vadd.f32 %v4650_v1, %v1843_v48  ;;  %2247 = vmatpush.msrb.mxu2 %v6183_v21  ;;  %2268 = vmatpush.msrb.mxu3 %v6204_v12  ;;  %v1879_v21 = vand.u32 2147483647, %v6332_v22  ;;  %v7803_v12 = vld [vmem:[#allocation38_spill] sm:$0xff] }
 0x4f1   : > { %v1871_v58 = vmul.f32 %v6357_v53, %v6332_v22  ;;  %v1859_v60 = vadd.f32 %v4652_v34, %v1858_v50  ;;  %v4656_v4 = vpop.eup %4655  ;;  %2209 = vmatpush.msrb.mxu0 %v6209_v26  ;;  %2229 = vmatpush.msrb.mxu1 %v6212_v40  ;;  %vm1876_vm5 = vweird.f32 %v6357_v53  ;;  %v7804_v26 = vld [vmem:[#allocation39_spill] sm:$0xff] }
 0x4f2   : > { %v1848_v63 = vsel %vm1847_vm1, %v4650_v1, %v1844_v57  ;;  %2248 = vmatpush.msrb.mxu2 %v6199_v11  ;;  %2269 = vmatpush.msrb.mxu3 %v6220_v0  ;;  %vm1877_vm7 = vmor %vm1875_vm6, %vm1876_vm5  ;;  %v7802_v11 = vld [vmem:[#allocation37_spill] sm:$0xff]  ;;  %vm1880_vm8 = vcmp.eq.f32.partialorder %v1879_v21, 8.507059e+37  ;;  %v7805_v0 = vld [vmem:[#allocation40_spill] sm:$0xff] }
 0x4f3   : > { %v1872_v7 = vsub.f32 1.0, %v1871_v58  ;;  %v1853_v8 = vsel %vm1850_vm3, %v1852_v59, %v1848_v63  ;;  %v1863_v9 = vsel %vm1862_vm2, %v4652_v34, %v1859_v60  ;;  %2210 = vmatpush.msrb.mxu0 %v6225_v44  ;;  %2230 = vmatpush.msrb.mxu1 %v6228_v5  ;;  %v7806_v44 = vld [vmem:[#allocation41_spill] sm:$0xff] }
 0x4f4   : > { %v1868_v10 = vsel %vm1865_vm4, %v1867_v62, %v1863_v9  ;;  %v1890_v43 = vmul.f32 %v4656_v4, %v1853_v8  ;;  %2249 = vmatpush.msrb.mxu2 %v6215_v6  ;;  %2270 = vmatpush.msrb.mxu3 %v6236_v31 }
 0x4f5   : > { %v1889_v13 = vmul.f32 %v1887_v61, %v1868_v10  ;;  %v1873_v14 = vmul.f32 %v6357_v53, %v1872_v7  ;;  %2211 = vmatpush.msrb.mxu0 %v6239_v37  ;;  %2231 = vmatpush.msrb.mxu1 %v6244_v45  ;;  %v7808_v37 = vld [vmem:[#allocation43_spill] sm:$0xff]  ;;  %v1895_v45 = vld [vmem:[#allocation2 + $0x8] sm:$0x30] }
 0x4f6   : > { %2250 = vmatpush.msrb.mxu2 %v6233_v33  ;;  %2271 = vmatpush.msrb.mxu3 %v6250_v51  ;;  %v7807_v33 = vld [vmem:[#allocation42_spill] sm:$0xff]  ;;  %v1896_v51 = vld [vmem:[#allocation2 + $0x20] sm:$0x30] }
 0x4f7   : > { %v6381_v15 = vadd.f32 %v1890_v43, %v1889_v13  ;;  %v1874_v16 = vadd.f32 %v6357_v53, %v1873_v14  ;;  %2212 = vmatpush.msrb.mxu0 %v7801_v3  ;;  %2232 = vmatpush.msrb.mxu1 %v7802_v11 }
 0x4f8   : > { %2251 = vmatpush.msrb.mxu2 %v6247_v46  ;;  %2272 = vmatpush.msrb.mxu3 %v7804_v26 }
 0x4f9   : > { %4657 = vtanh.f32 %v6381_v15  ;;  %v1878_v28 = vsel %vm1877_vm7, %v6357_v53, %v1874_v16  ;;  %2213 = vmatpush.msrb.mxu0 %v7805_v0  ;;  %2233 = vmatpush.msrb.mxu1 %v7806_v44  ;;  %v2121_v10 = vrot.slane %v6381_v15, 6 }
 0x4fa   : > { %2252 = vmatpush.msrb.mxu2 %v7803_v12  ;;  %v1883_v6 = vsel %vm1880_vm8, %v1882_v2, %v1878_v28  ;;  %2273 = vmatpush.msrb.mxu3 %v6280_v17 }
 0x4fb   : > { %2214 = vmatpush.msrb.mxu0 %v6285_v19  ;;  %2234 = vmatpush.msrb.mxu1 %v6288_v30 }
 0x4fc   : > { %2253 = vmatpush.msrb.mxu2 %v7807_v33  ;;  %2274 = vmatpush.msrb.mxu3 %v6296_v23  ;;  %v1897_v23 = vld [vmem:[#allocation2 + $0x28] sm:$0x30] }
 0x4fd   : > { %2215 = vmatpush.msrb.mxu0 %v6301_v24  ;;  %2235 = vmatpush.msrb.mxu1 %v7808_v37  ;;  %v2129_v37 = vld [vmem:[#allocation2 + $0x8] sm:$0xc0] }
 0x4fe   : > { %2254 = vmatpush.msrb.mxu2 %v6293_v32  ;;  %2275 = vmatpush.msrb.mxu3 %v6314_v25 }
 0x4ff   : > { %v4658_v40 = vpop.eup %4657 }
 0x500   : > { %v1893_v5 = vmul.f32 %v4658_v40, %v1883_v6  ;;  %2255 = vmatpush.msrb.mxu2 %v6311_v27 }
 0x502   : > { %1894 = vst [vmem:[%s5239_s27 + $0x8] sm:$0xc] %v1893_v5  ;;  %v1964_v31 = vrot.slane %v1893_v5, 2 }
 0x504   : > { %1982 = vmatmul.f32.vlgmr.msra.gmra.mxu0 %v1964_v31  ;;  %2002 = vmatmul.f32.vlgmr.msra.gmra.mxu1 %v1964_v31 }
 0x505   : > { %2022 = vmatmul.f32.vlgmr.msra.gmra.mxu2 %v1964_v31  ;;  %2042 = vmatmul.f32.vlgmr.msra.gmra.mxu3 %v1964_v31 }
 0x581   : > { %v1983_v46 = vpop.f32.mrf.mxu0  ;;  %v2003_v36 = vpop.f32.mrf.mxu1 }
 0x582   : > { %v2050_v22 = vrot.slane %v1983_v46, 4  ;;  %v2051_v17 = vrot.slane %v2003_v36, 4  ;;  %v2130_v46 = vld [vmem:[#allocation2 + $0x20] sm:$0xc0] }
 0x584   : > { %v2058_v19 = vadd.f32 %v2050_v22, %v1895_v45  ;;  %v2059_v30 = vadd.f32 %v2051_v17, %v1896_v51 }
 0x586   : > { %v4435_v32 = vmul.f32 -1.442695, %v2058_v19  ;;  %v4436_v24 = vmul.f32 -1.442695, %v2059_v30 }
 0x588   : > { %4659 = vpow2.f32 %v4435_v32  ;;  %v2023_v29 = vpop.f32.mrf.mxu2  ;;  %v2043_v34 = vpop.f32.mrf.mxu3 }
 0x589   : > { %4661 = vpow2.f32 %v4436_v24  ;;  %v2052_v18 = vrot.slane %v2023_v29, 4  ;;  %v2053_v38 = vrot.slane %v2043_v34, 4  ;;  %v2131_v24 = vld [vmem:[#allocation2 + $0x28] sm:$0xc0] }
 0x58b   : > { %v2060_v55 = vadd.f32 %v2052_v18, %v1897_v23  ;;  %v2061_v47 = vadd.f32 %v2053_v38, %v1898_v39  ;;  %v2132_v38 = vld [vmem:[#allocation2 + $0x38] sm:$0xc0] }
 0x58d   : > { %v4437_v54 = vmul.f32 -1.442695, %v2060_v55 }
 0x58e   : > { %v4660_v27 = vpop.eup %4659 }
 0x58f   : > { %v4662_v1 = vpop.eup %4661  ;;  %v2071_v25 = vadd.f32 1.0, %v4660_v27  ;;  %4663 = vpow2.f32 %v4437_v54 }
 0x590   : > { %v2072_v56 = vadd.f32 1.0, %v4662_v1 }
 0x591   : > { %4665 = vrcp.f32 %v2071_v25  ;;  %v2085_v57 = vand.u32 2147483648, %v2071_v25  ;;  %v2083_v60 = vand.u32 2147483647, %v2071_v25  ;;  %vm2079_vm11 = vweird.f32 %v2071_v25 }
 0x592   : > { %4667 = vrcp.f32 %v2072_v56  ;;  %v2100_v58 = vand.u32 2147483648, %v2072_v56  ;;  %v2098_v62 = vand.u32 2147483647, %v2072_v56  ;;  %vm2094_vm12 = vweird.f32 %v2072_v56 }
 0x593   : > { %v2086_v8 = vor.u32 1.1754944e-38, %v2085_v57  ;;  %vm2084_vm15 = vcmp.eq.f32.partialorder %v2083_v60, 8.507059e+37 }
 0x594   : > { %v2101_v43 = vor.u32 1.1754944e-38, %v2100_v58  ;;  %vm2099_vm0 = vcmp.eq.f32.partialorder %v2098_v62, 8.507059e+37 }
 0x595   : > { %v4664_v35 = vpop.eup %4663 }
 0x596   : > { %v2073_v41 = vadd.f32 1.0, %v4664_v35 }
 0x597   : > { %v4666_v42 = vpop.eup %4665 }
 0x598   : > { %v4668_v48 = vpop.eup %4667  ;;  %v2075_v49 = vmul.f32 %v4666_v42, %v2071_v25  ;;  %4669 = vrcp.f32 %v2073_v41  ;;  %vm2080_vm9 = vweird.f32 %v4666_v42  ;;  %v2115_v15 = vand.u32 2147483648, %v2073_v41 }
 0x599   : > { %v2090_v50 = vmul.f32 %v4668_v48, %v2072_v56  ;;  %4671 = vtanh.f32 %v2061_v47  ;;  %vm2095_vm10 = vweird.f32 %v4668_v48  ;;  %vm2081_vm13 = vmor %vm2079_vm11, %vm2080_vm9  ;;  %vm2109_vm2 = vweird.f32 %v2073_v41 }
 0x59a   : > { %v2076_v52 = vsub.f32 1.0, %v2075_v49  ;;  %vm2096_vm14 = vmor %vm2094_vm12, %vm2095_vm10  ;;  %v2113_v40 = vand.u32 2147483647, %v2073_v41  ;;  %v2116_v0 = vor.u32 1.1754944e-38, %v2115_v15 }
 0x59b   : > { %v2091_v53 = vsub.f32 1.0, %v2090_v50 }
 0x59c   : > { %v2077_v59 = vmul.f32 %v4666_v42, %v2076_v52  ;;  %vm2114_vm4 = vcmp.eq.f32.partialorder %v2113_v40, 8.507059e+37 }
 0x59d   : > { %v2092_v61 = vmul.f32 %v4668_v48, %v2091_v53 }
 0x59e   : > { %v4670_v63 = vpop.eup %4669  ;;  %v2078_v4 = vadd.f32 %v4666_v42, %v2077_v59 }
 0x59f   : > { %v2105_v7 = vmul.f32 %v4670_v63, %v2073_v41  ;;  %v2093_v9 = vadd.f32 %v4668_v48, %v2092_v61  ;;  %v4672_v14 = vpop.eup %4671  ;;  %vm2110_vm1 = vweird.f32 %v4670_v63 }
 0x5a0   : > { %v2082_v13 = vsel %vm2081_vm13, %v4666_v42, %v2078_v4  ;;  %vm2111_vm3 = vmor %vm2109_vm2, %vm2110_vm1 }
 0x5a1   : > { %v2106_v16 = vsub.f32 1.0, %v2105_v7  ;;  %v2087_v20 = vsel %vm2084_vm15, %v2086_v8, %v2082_v13  ;;  %v2097_v21 = vsel %vm2096_vm14, %v4668_v48, %v2093_v9 }
 0x5a2   : > { %v2102_v28 = vsel %vm2099_vm0, %v2101_v43, %v2097_v21  ;;  %v2124_v2 = vmul.f32 %v4672_v14, %v2087_v20 }
 0x5a3   : > { %v2123_v3 = vmul.f32 %v2121_v10, %v2102_v28  ;;  %v2107_v11 = vmul.f32 %v4670_v63, %v2106_v16 }
 0x5a5   : > { %v6420_v12 = vadd.f32 %v2124_v2, %v2123_v3  ;;  %v2108_v26 = vadd.f32 %v4670_v63, %v2107_v11 }
 0x5a7   : > { %4673 = vtanh.f32 %v6420_v12  ;;  %v2112_v6 = vsel %vm2111_vm3, %v4670_v63, %v2108_v26  ;;  %v2355_v9 = vrot.slane %v6420_v12, 6 }
 0x5a8   : > { %v2117_v5 = vsel %vm2114_vm4, %v2116_v0, %v2112_v6 }
 0x5ad   : > { %v4674_v44 = vpop.eup %4673 }
 0x5ae   : > { %v2127_v33 = vmul.f32 %v4674_v44, %v2117_v5 }
 0x5b0   : > { %2128 = vst [vmem:[%s5239_s27 + $0x8] sm:$0x30] %v2127_v33  ;;  %v2198_v31 = vrot.slane %v2127_v33, 4 }
 0x5b2   : > { %2216 = vmatmul.f32.vlgmr.msrb.gmra.mxu0 %v2198_v31  ;;  %2236 = vmatmul.f32.vlgmr.msrb.gmra.mxu1 %v2198_v31 }
 0x5b3   : > { %2256 = vmatmul.f32.vlgmr.msrb.gmra.mxu2 %v2198_v31  ;;  %2276 = vmatmul.f32.vlgmr.msrb.gmra.mxu3 %v2198_v31 }
 0x62f   : > { %v2217_v45 = vpop.f32.mrf.mxu0  ;;  %v2237_v51 = vpop.f32.mrf.mxu1 }
 0x630   : > { %v2284_v36 = vrot.slane %v2217_v45, 2  ;;  %v2285_v22 = vrot.slane %v2237_v51, 2 }
 0x632   : > { %v2292_v17 = vadd.f32 %v2284_v36, %v2129_v37  ;;  %v2293_v19 = vadd.f32 %v2285_v22, %v2130_v46 }
 0x634   : > { %v4438_v30 = vmul.f32 -1.442695, %v2292_v17  ;;  %v4439_v32 = vmul.f32 -1.442695, %v2293_v19 }
 0x636   : > { %4675 = vpow2.f32 %v4438_v30  ;;  %v2257_v23 = vpop.f32.mrf.mxu2  ;;  %v2277_v56 = vpop.f32.mrf.mxu3 }
 0x637   : > { %4677 = vpow2.f32 %v4439_v32  ;;  %v2286_v29 = vrot.slane %v2257_v23, 2  ;;  %v2287_v34 = vrot.slane %v2277_v56, 2 }
 0x639   : > { %v2294_v18 = vadd.f32 %v2286_v29, %v2131_v24  ;;  %v2295_v42 = vadd.f32 %v2287_v34, %v2132_v38 }
 0x63b   : > { %v4440_v55 = vmul.f32 -1.442695, %v2294_v18 }
 0x63c   : > { %v4676_v54 = vpop.eup %4675 }
 0x63d   : > { %v4678_v27 = vpop.eup %4677  ;;  %v2305_v1 = vadd.f32 1.0, %v4676_v54  ;;  %4679 = vpow2.f32 %v4440_v55 }
 0x63e   : > { %v2306_v25 = vadd.f32 1.0, %v4678_v27 }
 0x63f   : > { %4681 = vrcp.f32 %v2305_v1  ;;  %v2319_v53 = vand.u32 2147483648, %v2305_v1  ;;  %v2317_v59 = vand.u32 2147483647, %v2305_v1  ;;  %vm2313_vm7 = vweird.f32 %v2305_v1 }
 0x640   : > { %4683 = vrcp.f32 %v2306_v25  ;;  %v2334_v57 = vand.u32 2147483648, %v2306_v25  ;;  %v2332_v61 = vand.u32 2147483647, %v2306_v25  ;;  %vm2328_vm8 = vweird.f32 %v2306_v25 }
 0x641   : > { %v2320_v7 = vor.u32 1.1754944e-38, %v2319_v53  ;;  %vm2318_vm11 = vcmp.eq.f32.partialorder %v2317_v59, 8.507059e+37 }
 0x642   : > { %v2335_v10 = vor.u32 1.1754944e-38, %v2334_v57  ;;  %vm2333_vm12 = vcmp.eq.f32.partialorder %v2332_v61, 8.507059e+37 }
 0x643   : > { %v4680_v39 = vpop.eup %4679 }
 0x644   : > { %v2307_v35 = vadd.f32 1.0, %v4680_v39 }
 0x645   : > { %v4682_v41 = vpop.eup %4681 }
 0x646   : > { %v4684_v47 = vpop.eup %4683  ;;  %v2309_v48 = vmul.f32 %v4682_v41, %v2305_v1  ;;  %4685 = vrcp.f32 %v2307_v35  ;;  %vm2314_vm5 = vweird.f32 %v4682_v41  ;;  %v2349_v15 = vand.u32 2147483648, %v2307_v35 }
 0x647   : > { %v2324_v49 = vmul.f32 %v4684_v47, %v2306_v25  ;;  %4687 = vtanh.f32 %v2295_v42  ;;  %vm2329_vm6 = vweird.f32 %v4684_v47  ;;  %vm2315_vm9 = vmor %vm2313_vm7, %vm2314_vm5  ;;  %vm2343_vm14 = vweird.f32 %v2307_v35 }
 0x648   : > { %v2310_v50 = vsub.f32 1.0, %v2309_v48  ;;  %vm2330_vm10 = vmor %vm2328_vm8, %vm2329_vm6  ;;  %v2347_v12 = vand.u32 2147483647, %v2307_v35  ;;  %v2350_v6 = vor.u32 1.1754944e-38, %v2349_v15 }
 0x649   : > { %v2325_v52 = vsub.f32 1.0, %v2324_v49 }
 0x64a   : > { %v2311_v58 = vmul.f32 %v4682_v41, %v2310_v50  ;;  %vm2348_vm0 = vcmp.eq.f32.partialorder %v2347_v12, 8.507059e+37 }
 0x64b   : > { %v2326_v60 = vmul.f32 %v4684_v47, %v2325_v52 }
 0x64c   : > { %v4686_v62 = vpop.eup %4685  ;;  %v2312_v63 = vadd.f32 %v4682_v41, %v2311_v58 }
 0x64d   : > { %v2339_v4 = vmul.f32 %v4686_v62, %v2307_v35  ;;  %v2327_v8 = vadd.f32 %v4684_v47, %v2326_v60  ;;  %v4688_v13 = vpop.eup %4687  ;;  %vm2344_vm13 = vweird.f32 %v4686_v62 }
 0x64e   : > { %v2316_v43 = vsel %vm2315_vm9, %v4682_v41, %v2312_v63  ;;  %vm2345_vm15 = vmor %vm2343_vm14, %vm2344_vm13 }
 0x64f   : > { %v2340_v14 = vsub.f32 1.0, %v2339_v4  ;;  %v2321_v16 = vsel %vm2318_vm11, %v2320_v7, %v2316_v43  ;;  %v2331_v20 = vsel %vm2330_vm10, %v4684_v47, %v2327_v8 }
 0x650   : > { %v2336_v21 = vsel %vm2333_vm12, %v2335_v10, %v2331_v20  ;;  %v2358_v28 = vmul.f32 %v4688_v13, %v2321_v16 }
 0x651   : > { %v2341_v2 = vmul.f32 %v4686_v62, %v2340_v14  ;;  %v2357_v3 = vmul.f32 %v2355_v9, %v2336_v21 }
 0x653   : > { %v2359_v11 = vadd.f32 %v2358_v28, %v2357_v3  ;;  %v2342_v26 = vadd.f32 %v4686_v62, %v2341_v2 }
 0x655   : > { %4689 = vtanh.f32 %v2359_v11  ;;  %2364 = vst [vmem:[#allocation4 - $0x6] sm:$0xc0] %v2359_v11  ;;  %v2346_v40 = vsel %vm2345_vm15, %v4686_v62, %v2342_v26 }
 0x656   : > { %v2351_v44 = vsel %vm2348_vm0, %v2350_v6, %v2346_v40 }
 0x65b   : > { %v4690_v0 = vpop.eup %4689 }
 0x65c   : > { %v2361_v5 = vmul.f32 %v4690_v0, %v2351_v44 }
 0x65e   : > { %2362 = vst [vmem:[%s5239_s27 + $0x8] sm:$0xc0] %v2361_v5 }
 0x65f   : > { %2363 = vst [vmem:[#allocation3 - $0x6] sm:$0xc0] %v2361_v5 }
 0x660 PF: > { %p4441_p5 = scmp.ne.s32.totalorder %s5021_s18, 1 }
 0x662   : > { %2368 = sbr.rel (%p4441_p5) target bundleno = 3057 (0xbf1), region = 64 }
 0x667   : > { %v6428_v33 = vld [vmem:[%s5202_s6 + $0x1e0] sm:$0xff]  ;;  %v6431_v31 = vld [vmem:[%s5202_s6 + $0x1e8] sm:$0xff]  ;;  %v6434_v37 = vld [vmem:[%s5202_s6 + $0x1f0] sm:$0xff] }
 0x668   : > { %7809 = vst [vmem:[#allocation44_spill] sm:$0xff] %v6428_v33  ;;  %2439 = vmatpush.msra.mxu0 %v6428_v33  ;;  %2459 = vmatpush.msra.mxu1 %v6431_v31  ;;  %v6439_v45 = vld [vmem:[%s5202_s6 + $0x1c0] sm:$0xff]  ;;  %v6442_v46 = vld [vmem:[%s5202_s6 + $0x1c8] sm:$0xff]  ;;  %v6445_v51 = vld [vmem:[%s5202_s6 + $0x1d0] sm:$0xff] }
 0x669   : > { %2479 = vmatpush.msra.mxu2 %v6434_v37  ;;  %v6449_v36 = vld [vmem:[%s5202_s6 + $0x1a0] sm:$0xff]  ;;  %v6452_v22 = vld [vmem:[%s5202_s6 + $0x1a8] sm:$0xff]  ;;  %v6457_v17 = vld [vmem:[%s5202_s6 + $0x1b0] sm:$0xff] }
 0x66a   : > { %2440 = vmatpush.msra.mxu0 %v6439_v45  ;;  %2460 = vmatpush.msra.mxu1 %v6442_v46  ;;  %v6461_v19 = vld [vmem:[%s5202_s6 + $0x180] sm:$0xff]  ;;  %v6464_v30 = vld [vmem:[%s5202_s6 + $0x188] sm:$0xff]  ;;  %v6469_v32 = vld [vmem:[%s5202_s6 + $0x190] sm:$0xff] }
 0x66b   : > { %2480 = vmatpush.msra.mxu2 %v6445_v51  ;;  %v6473_v24 = vld [vmem:[%s5202_s6 + $0x160] sm:$0xff]  ;;  %v6476_v23 = vld [vmem:[%s5202_s6 + $0x168] sm:$0xff]  ;;  %v6481_v29 = vld [vmem:[%s5202_s6 + $0x170] sm:$0xff] }
 0x66c   : > { %2441 = vmatpush.msra.mxu0 %v6449_v36  ;;  %2461 = vmatpush.msra.mxu1 %v6452_v22  ;;  %v6485_v18 = vld [vmem:[%s5202_s6 + $0x140] sm:$0xff]  ;;  %v6488_v55 = vld [vmem:[%s5202_s6 + $0x148] sm:$0xff]  ;;  %v6491_v54 = vld [vmem:[%s5202_s6 + $0x1f8] sm:$0xff] }
 0x66d   : > { %2481 = vmatpush.msra.mxu2 %v6457_v17  ;;  %v6496_v27 = vld [vmem:[%s5202_s6 + $0x150] sm:$0xff]  ;;  %v6499_v1 = vld [vmem:[%s5202_s6 + $0x1d8] sm:$0xff]  ;;  %v6503_v25 = vld [vmem:[%s5202_s6 + $0x120] sm:$0xff]  ;;  %2499 = vmatpush.msra.mxu3 %v6491_v54 }
 0x66e   : > { %2442 = vmatpush.msra.mxu0 %v6461_v19  ;;  %2462 = vmatpush.msra.mxu1 %v6464_v30  ;;  %v6506_v56 = vld [vmem:[%s5202_s6 + $0x128] sm:$0xff]  ;;  %v6512_v34 = vld [vmem:[%s5202_s6 + $0x130] sm:$0xff]  ;;  %v6515_v38 = vld [vmem:[%s5202_s6 + $0x1b8] sm:$0xff] }
 0x66f   : > { %2482 = vmatpush.msra.mxu2 %v6469_v32  ;;  %v6519_v39 = vld [vmem:[%s5202_s6 + $0x100] sm:$0xff]  ;;  %v6522_v35 = vld [vmem:[%s5202_s6 + $0x108] sm:$0xff]  ;;  %2500 = vmatpush.msra.mxu3 %v6499_v1  ;;  %v6528_v41 = vld [vmem:[%s5202_s6 + $0x110] sm:$0xff] }
 0x670   : > { %2443 = vmatpush.msra.mxu0 %v6473_v24  ;;  %2463 = vmatpush.msra.mxu1 %v6476_v23  ;;  %v6531_v42 = vld [vmem:[%s5202_s6 + $0x198] sm:$0xff]  ;;  %v6535_v47 = vld [vmem:[%s5202_s6 + $0xe0] sm:$0xff]  ;;  %v6538_v48 = vld [vmem:[%s5202_s6 + $0xe8] sm:$0xff] }
 0x671   : > { %2483 = vmatpush.msra.mxu2 %v6481_v29  ;;  %2501 = vmatpush.msra.mxu3 %v6515_v38  ;;  %v6544_v49 = vld [vmem:[%s5202_s6 + $0xf0] sm:$0xff]  ;;  %v6547_v50 = vld [vmem:[%s5202_s6 + $0x178] sm:$0xff]  ;;  %v6551_v52 = vld [vmem:[%s5202_s6 + $0xc0] sm:$0xff] }
 0x672   : > { %2444 = vmatpush.msra.mxu0 %v6485_v18  ;;  %2464 = vmatpush.msra.mxu1 %v6488_v55  ;;  %v6554_v53 = vld [vmem:[%s5202_s6 + $0xc8] sm:$0xff]  ;;  %v6560_v57 = vld [vmem:[%s5202_s6 + $0xd0] sm:$0xff]  ;;  %v6563_v58 = vld [vmem:[%s5202_s6 + $0x158] sm:$0xff] }
 0x673   : > { %2484 = vmatpush.msra.mxu2 %v6496_v27  ;;  %2502 = vmatpush.msra.mxu3 %v6531_v42  ;;  %v6567_v59 = vld [vmem:[%s5202_s6 + $0xa0] sm:$0xff]  ;;  %v6570_v60 = vld [vmem:[%s5202_s6 + $0xa8] sm:$0xff]  ;;  %v6576_v61 = vld [vmem:[%s5202_s6 + $0xb0] sm:$0xff] }
 0x674   : > { %2445 = vmatpush.msra.mxu0 %v6503_v25  ;;  %2465 = vmatpush.msra.mxu1 %v6506_v56  ;;  %v6579_v62 = vld [vmem:[%s5202_s6 + $0x138] sm:$0xff]  ;;  %v6583_v63 = vld [vmem:[%s5202_s6 + $0x80] sm:$0xff]  ;;  %v6586_v4 = vld [vmem:[%s5202_s6 + $0x88] sm:$0xff] }
 0x675   : > { %2485 = vmatpush.msra.mxu2 %v6512_v34  ;;  %2503 = vmatpush.msra.mxu3 %v6547_v50  ;;  %v6592_v7 = vld [vmem:[%s5202_s6 + $0x90] sm:$0xff]  ;;  %v6595_v8 = vld [vmem:[%s5202_s6 + $0x118] sm:$0xff]  ;;  %v6599_v9 = vld [vmem:[%s5202_s6 + $0x60] sm:$0xff] }
 0x676   : > { %2446 = vmatpush.msra.mxu0 %v6519_v39  ;;  %2466 = vmatpush.msra.mxu1 %v6522_v35  ;;  %v6602_v10 = vld [vmem:[%s5202_s6 + $0x68] sm:$0xff]  ;;  %v6608_v43 = vld [vmem:[%s5202_s6 + $0x70] sm:$0xff]  ;;  %v6611_v13 = vld [vmem:[%s5202_s6 + $0xf8] sm:$0xff] }
 0x677   : > { %2486 = vmatpush.msra.mxu2 %v6528_v41  ;;  %2504 = vmatpush.msra.mxu3 %v6563_v58  ;;  %v6615_v14 = vld [vmem:[%s5202_s6 + $0x40] sm:$0xff]  ;;  %v6618_v16 = vld [vmem:[%s5202_s6 + $0x48] sm:$0xff]  ;;  %v6624_v20 = vld [vmem:[%s5202_s6 + $0x50] sm:$0xff] }
 0x678   : > { %2447 = vmatpush.msra.mxu0 %v6535_v47  ;;  %2467 = vmatpush.msra.mxu1 %v6538_v48  ;;  %v6627_v21 = vld [vmem:[%s5202_s6 + $0xd8] sm:$0xff]  ;;  %v6631_v28 = vld [vmem:[%s5202_s6 + $0x20] sm:$0xff]  ;;  %v6634_v2 = vld [vmem:[%s5202_s6 + $0x28] sm:$0xff] }
 0x679   : > { %2487 = vmatpush.msra.mxu2 %v6544_v49  ;;  %2505 = vmatpush.msra.mxu3 %v6579_v62  ;;  %v6640_v3 = vld [vmem:[%s5202_s6 + $0x30] sm:$0xff]  ;;  %v6643_v11 = vld [vmem:[%s5202_s6 + $0xb8] sm:$0xff]  ;;  %v6647_v26 = vld [vmem:[%s5202_s6] sm:$0xff] }
 0x67a   : > { %2448 = vmatpush.msra.mxu0 %v6551_v52  ;;  %2468 = vmatpush.msra.mxu1 %v6554_v53  ;;  %v6650_v15 = vld [vmem:[%s5202_s6 + $0x8] sm:$0xff]  ;;  %v6656_v12 = vld [vmem:[%s5202_s6 + $0x10] sm:$0xff]  ;;  %v2369_v40 = vld [vmem:[#allocation3] sm:$0x3] }
 0x67b   : > { %2488 = vmatpush.msra.mxu2 %v6560_v57  ;;  %2506 = vmatpush.msra.mxu3 %v6595_v8  ;;  %v6663_v6 = vld [vmem:[%s5202_s6 + $0x98] sm:$0xff] }
 0x67c   : > { %2449 = vmatpush.msra.mxu0 %v6567_v59  ;;  %2469 = vmatpush.msra.mxu1 %v6570_v60  ;;  %v6667_v0 = vld [vmem:[%s5202_s6 + $0x78] sm:$0xff] }
 0x67d   : > { %2489 = vmatpush.msra.mxu2 %v6576_v61  ;;  %2507 = vmatpush.msra.mxu3 %v6611_v13  ;;  %v6672_v44 = vld [vmem:[%s5202_s6 + $0x58] sm:$0xff] }
 0x67e   : > { %2450 = vmatpush.msra.mxu0 %v6583_v63  ;;  %2470 = vmatpush.msra.mxu1 %v6586_v4  ;;  %v6679_v5 = vld [vmem:[%s5202_s6 + $0x38] sm:$0xff] }
 0x67f   : > { %2490 = vmatpush.msra.mxu2 %v6592_v7  ;;  %2508 = vmatpush.msra.mxu3 %v6627_v21 }
 0x680   : > { %2451 = vmatpush.msra.mxu0 %v6599_v9  ;;  %2471 = vmatpush.msra.mxu1 %v6602_v10 }
 0x681   : > { %2491 = vmatpush.msra.mxu2 %v6608_v43  ;;  %2509 = vmatpush.msra.mxu3 %v6643_v11 }
 0x682   : > { %2452 = vmatpush.msra.mxu0 %v6615_v14  ;;  %2472 = vmatpush.msra.mxu1 %v6618_v16 }
 0x683   : > { %2492 = vmatpush.msra.mxu2 %v6624_v20  ;;  %2510 = vmatpush.msra.mxu3 %v6663_v6 }
 0x684   : > { %2453 = vmatpush.msra.mxu0 %v6631_v28  ;;  %2473 = vmatpush.msra.mxu1 %v6634_v2 }
 0x685   : > { %2493 = vmatpush.msra.mxu2 %v6640_v3  ;;  %2511 = vmatpush.msra.mxu3 %v6667_v0 }
 0x686   : > { %2454 = vmatpush.msra.mxu0 %v6647_v26  ;;  %2474 = vmatpush.msra.mxu1 %v6650_v15 }
 0x687   : > { %2494 = vmatpush.msra.mxu2 %v6656_v12  ;;  %2455 = vmatmul.f32.vlgmr.msra.gmra.mxu0 %v2369_v40 }
 0x688   : > { %2475 = vmatmul.f32.vlgmr.msra.gmra.mxu1 %v2369_v40  ;;  %2495 = vmatmul.f32.vlgmr.msra.gmra.mxu2 %v2369_v40 }
 0x689   : > { %2673 = vmatpush.msrb.mxu0 %v6428_v33  ;;  %2693 = vmatpush.msrb.mxu1 %v6431_v31  ;;  %v6686_v33 = vld [vmem:[%s5202_s6 + $0x18] sm:$0xff] }
 0x68a   : > { %2713 = vmatpush.msrb.mxu2 %v6434_v37  ;;  %2512 = vmatpush.msra.mxu3 %v6672_v44 }
 0x68b   : > { %2674 = vmatpush.msrb.mxu0 %v6439_v45  ;;  %2694 = vmatpush.msrb.mxu1 %v6442_v46 }
 0x68c   : > { %2714 = vmatpush.msrb.mxu2 %v6445_v51  ;;  %2513 = vmatpush.msra.mxu3 %v6679_v5 }
 0x68d   : > { %2675 = vmatpush.msrb.mxu0 %v6449_v36  ;;  %2695 = vmatpush.msrb.mxu1 %v6452_v22 }
 0x68e   : > { %2715 = vmatpush.msrb.mxu2 %v6457_v17  ;;  %2514 = vmatpush.msra.mxu3 %v6686_v33 }
 0x68f   : > { %2676 = vmatpush.msrb.mxu0 %v6461_v19  ;;  %2696 = vmatpush.msrb.mxu1 %v6464_v30 }
 0x690   : > { %2716 = vmatpush.msrb.mxu2 %v6469_v32  ;;  %2515 = vmatmul.f32.vlgmr.msra.gmra.mxu3 %v2369_v40  ;;  %v7810_v40 = vld [vmem:[#allocation44_spill] sm:$0xff] }
 0x691   : > { %2677 = vmatpush.msrb.mxu0 %v6473_v24  ;;  %2697 = vmatpush.msrb.mxu1 %v6476_v23 }
 0x692   : > { %2733 = vmatpush.msrb.mxu3 %v6491_v54  ;;  %2717 = vmatpush.msrb.mxu2 %v6481_v29 }
 0x693   : > { %2678 = vmatpush.msrb.mxu0 %v6485_v18  ;;  %2698 = vmatpush.msrb.mxu1 %v6488_v55 }
 0x694   : > { %2734 = vmatpush.msrb.mxu3 %v6499_v1  ;;  %2718 = vmatpush.msrb.mxu2 %v6496_v27 }
 0x695   : > { %2679 = vmatpush.msrb.mxu0 %v6503_v25  ;;  %2699 = vmatpush.msrb.mxu1 %v6506_v56 }
 0x696   : > { %2735 = vmatpush.msrb.mxu3 %v6515_v38  ;;  %2719 = vmatpush.msrb.mxu2 %v6512_v34 }
 0x697   : > { %2680 = vmatpush.msrb.mxu0 %v6519_v39  ;;  %2700 = vmatpush.msrb.mxu1 %v6522_v35 }
 0x698   : > { %2736 = vmatpush.msrb.mxu3 %v6531_v42  ;;  %2720 = vmatpush.msrb.mxu2 %v6528_v41 }
 0x699   : > { %2681 = vmatpush.msrb.mxu0 %v6535_v47  ;;  %2701 = vmatpush.msrb.mxu1 %v6538_v48 }
 0x69a   : > { %2737 = vmatpush.msrb.mxu3 %v6547_v50  ;;  %2721 = vmatpush.msrb.mxu2 %v6544_v49 }
 0x69b   : > { %2682 = vmatpush.msrb.mxu0 %v6551_v52  ;;  %2702 = vmatpush.msrb.mxu1 %v6554_v53 }
 0x69c   : > { %2738 = vmatpush.msrb.mxu3 %v6563_v58  ;;  %2722 = vmatpush.msrb.mxu2 %v6560_v57 }
 0x69d   : > { %2683 = vmatpush.msrb.mxu0 %v6567_v59  ;;  %2703 = vmatpush.msrb.mxu1 %v6570_v60 }
 0x69e   : > { %2739 = vmatpush.msrb.mxu3 %v6579_v62  ;;  %2723 = vmatpush.msrb.mxu2 %v6576_v61 }
 0x69f   : > { %2684 = vmatpush.msrb.mxu0 %v6583_v63  ;;  %2704 = vmatpush.msrb.mxu1 %v6586_v4 }
 0x6a0   : > { %2740 = vmatpush.msrb.mxu3 %v6595_v8  ;;  %2724 = vmatpush.msrb.mxu2 %v6592_v7 }
 0x6a1   : > { %2685 = vmatpush.msrb.mxu0 %v6599_v9  ;;  %2705 = vmatpush.msrb.mxu1 %v6602_v10 }
 0x6a2   : > { %2741 = vmatpush.msrb.mxu3 %v6611_v13  ;;  %2725 = vmatpush.msrb.mxu2 %v6608_v43 }
 0x6a3   : > { %2686 = vmatpush.msrb.mxu0 %v6615_v14  ;;  %2706 = vmatpush.msrb.mxu1 %v6618_v16 }
 0x6a4   : > { %2742 = vmatpush.msrb.mxu3 %v6627_v21  ;;  %2726 = vmatpush.msrb.mxu2 %v6624_v20 }
 0x6a5   : > { %2687 = vmatpush.msrb.mxu0 %v6631_v28  ;;  %2707 = vmatpush.msrb.mxu1 %v6634_v2 }
 0x6a6   : > { %2743 = vmatpush.msrb.mxu3 %v6643_v11  ;;  %2727 = vmatpush.msrb.mxu2 %v6640_v3 }
 0x6a7   : > { %2688 = vmatpush.msrb.mxu0 %v6647_v26  ;;  %2708 = vmatpush.msrb.mxu1 %v6650_v15 }
 0x6a8   : > { %2744 = vmatpush.msrb.mxu3 %v6663_v6  ;;  %2728 = vmatpush.msrb.mxu2 %v6656_v12 }
 0x6a9   : > { %2907 = vmatpush.msra.mxu0 %v7810_v40  ;;  %2927 = vmatpush.msra.mxu1 %v6431_v31  ;;  %v2371_v31 = vld [vmem:[#allocation2 + $0x8] sm:$0xc0] }
 0x6aa   : > { %2745 = vmatpush.msrb.mxu3 %v6667_v0  ;;  %2947 = vmatpush.msra.mxu2 %v6434_v37 }
 0x6ab   : > { %2908 = vmatpush.msra.mxu0 %v6439_v45  ;;  %2928 = vmatpush.msra.mxu1 %v6442_v46  ;;  %v2372_v46 = vld [vmem:[#allocation2 + $0x20] sm:$0xc0] }
 0x6ac   : > { %2746 = vmatpush.msrb.mxu3 %v6672_v44  ;;  %2948 = vmatpush.msra.mxu2 %v6445_v51 }
 0x6ad   : > { %2909 = vmatpush.msra.mxu0 %v6449_v36  ;;  %2929 = vmatpush.msra.mxu1 %v6452_v22 }
 0x6ae   : > { %2747 = vmatpush.msrb.mxu3 %v6679_v5  ;;  %2949 = vmatpush.msra.mxu2 %v6457_v17 }
 0x6af   : > { %2910 = vmatpush.msra.mxu0 %v6461_v19  ;;  %2930 = vmatpush.msra.mxu1 %v6464_v30 }
 0x6b0   : > { %2748 = vmatpush.msrb.mxu3 %v6686_v33  ;;  %2950 = vmatpush.msra.mxu2 %v6469_v32  ;;  %v2373_v32 = vld [vmem:[#allocation2 + $0x28] sm:$0xc0] }
 0x6b1   : > { %2911 = vmatpush.msra.mxu0 %v6473_v24  ;;  %2931 = vmatpush.msra.mxu1 %v6476_v23 }
 0x6b2   : > { %2967 = vmatpush.msra.mxu3 %v6491_v54  ;;  %2951 = vmatpush.msra.mxu2 %v6481_v29 }
 0x6b3   : > { %2912 = vmatpush.msra.mxu0 %v6485_v18  ;;  %2932 = vmatpush.msra.mxu1 %v6488_v55 }
 0x6b4   : > { %2968 = vmatpush.msra.mxu3 %v6499_v1  ;;  %2952 = vmatpush.msra.mxu2 %v6496_v27  ;;  %v2374_v1 = vld [vmem:[#allocation2 + $0x38] sm:$0xc0] }
 0x6b5   : > { %2913 = vmatpush.msra.mxu0 %v6503_v25  ;;  %2933 = vmatpush.msra.mxu1 %v6506_v56 }
 0x6b6   : > { %2969 = vmatpush.msra.mxu3 %v6515_v38  ;;  %2953 = vmatpush.msra.mxu2 %v6512_v34 }
 0x6b7   : > { %2914 = vmatpush.msra.mxu0 %v6519_v39  ;;  %2934 = vmatpush.msra.mxu1 %v6522_v35 }
 0x6b8   : > { %2970 = vmatpush.msra.mxu3 %v6531_v42  ;;  %2954 = vmatpush.msra.mxu2 %v6528_v41 }
 0x6b9   : > { %2915 = vmatpush.msra.mxu0 %v6535_v47  ;;  %2935 = vmatpush.msra.mxu1 %v6538_v48 }
 0x6ba   : > { %2971 = vmatpush.msra.mxu3 %v6547_v50  ;;  %2955 = vmatpush.msra.mxu2 %v6544_v49  ;;  %v2370_v50 = vld [vmem:[#allocation4] sm:$0x3] }
 0x6bb   : > { %2916 = vmatpush.msra.mxu0 %v6551_v52  ;;  %2936 = vmatpush.msra.mxu1 %v6554_v53 }
 0x6bc   : > { %2972 = vmatpush.msra.mxu3 %v6563_v58  ;;  %2956 = vmatpush.msra.mxu2 %v6560_v57 }
 0x6bd   : > { %2917 = vmatpush.msra.mxu0 %v6567_v59  ;;  %2937 = vmatpush.msra.mxu1 %v6570_v60 }
 0x6be   : > { %2973 = vmatpush.msra.mxu3 %v6579_v62  ;;  %2957 = vmatpush.msra.mxu2 %v6576_v61 }
 0x6bf   : > { %2918 = vmatpush.msra.mxu0 %v6583_v63  ;;  %2938 = vmatpush.msra.mxu1 %v6586_v4  ;;  %v2594_v63 = vrot.slane %v2370_v50, 2 }
 0x6c0   : > { %2974 = vmatpush.msra.mxu3 %v6595_v8  ;;  %2958 = vmatpush.msra.mxu2 %v6592_v7 }
 0x6c1   : > { %2919 = vmatpush.msra.mxu0 %v6599_v9  ;;  %2939 = vmatpush.msra.mxu1 %v6602_v10 }
 0x6c2   : > { %2975 = vmatpush.msra.mxu3 %v6611_v13  ;;  %2959 = vmatpush.msra.mxu2 %v6608_v43 }
 0x6c3   : > { %2920 = vmatpush.msra.mxu0 %v6615_v14  ;;  %2940 = vmatpush.msra.mxu1 %v6618_v16 }
 0x6c4   : > { %2976 = vmatpush.msra.mxu3 %v6627_v21  ;;  %2960 = vmatpush.msra.mxu2 %v6624_v20 }
 0x6c5   : > { %2921 = vmatpush.msra.mxu0 %v6631_v28  ;;  %2941 = vmatpush.msra.mxu1 %v6634_v2 }
 0x6c6   : > { %2977 = vmatpush.msra.mxu3 %v6643_v11  ;;  %2961 = vmatpush.msra.mxu2 %v6640_v3 }
 0x6c7   : > { %2922 = vmatpush.msra.mxu0 %v6647_v26  ;;  %2942 = vmatpush.msra.mxu1 %v6650_v15 }
 0x6c8   : > { %2978 = vmatpush.msra.mxu3 %v6663_v6  ;;  %2962 = vmatpush.msra.mxu2 %v6656_v12 }
 0x6ca   : > { %2979 = vmatpush.msra.mxu3 %v6667_v0 }
 0x6cc   : > { %2980 = vmatpush.msra.mxu3 %v6672_v44 }
 0x6ce   : > { %2981 = vmatpush.msra.mxu3 %v6679_v5 }
 0x6d0   : > { %2982 = vmatpush.msra.mxu3 %v6686_v33 }
 0x704   : > { %v2456_v37 = vpop.f32.mrf.mxu0 }
 0x705   : > { %v2523_v45 = vrot.slane %v2456_v37, 2  ;;  %v2476_v51 = vpop.f32.mrf.mxu1 }
 0x706   : > { %v2524_v36 = vrot.slane %v2476_v51, 2 }
 0x707   : > { %v2531_v22 = vadd.f32 %v2523_v45, %v2371_v31  ;;  %v2602_v31 = vld [vmem:[#allocation2 + $0x8] sm:$0x30]  ;;  %v2603_v45 = vld [vmem:[#allocation2 + $0x20] sm:$0x30] }
 0x708   : > { %v2532_v17 = vadd.f32 %v2524_v36, %v2372_v46 }
 0x709   : > { %v4442_v19 = vmul.f32 -1.442695, %v2531_v22 }
 0x70a   : > { %v4443_v30 = vmul.f32 -1.442695, %v2532_v17 }
 0x70b   : > { %4691 = vpow2.f32 %v4442_v19  ;;  %v2496_v24 = vpop.f32.mrf.mxu2 }
 0x70c   : > { %4693 = vpow2.f32 %v4443_v30  ;;  %v2525_v23 = vrot.slane %v2496_v24, 2 }
 0x70e   : > { %v2533_v29 = vadd.f32 %v2525_v23, %v2373_v32  ;;  %v2604_v32 = vld [vmem:[#allocation2 + $0x28] sm:$0x30] }
 0x710   : > { %v4444_v18 = vmul.f32 -1.442695, %v2533_v29 }
 0x711   : > { %v4692_v55 = vpop.eup %4691 }
 0x712   : > { %v4694_v54 = vpop.eup %4693  ;;  %v2544_v33 = vadd.f32 1.0, %v4692_v55  ;;  %4695 = vpow2.f32 %v4444_v18 }
 0x713   : > { %v2545_v27 = vadd.f32 1.0, %v4694_v54  ;;  %v2516_v25 = vpop.f32.mrf.mxu3 }
 0x714   : > { %4697 = vrcp.f32 %v2544_v33  ;;  %v2526_v56 = vrot.slane %v2516_v25, 2  ;;  %v2558_v52 = vand.u32 2147483648, %v2544_v33  ;;  %v2556_v58 = vand.u32 2147483647, %v2544_v33 }
 0x715   : > { %4699 = vrcp.f32 %v2545_v27  ;;  %v2573_v53 = vand.u32 2147483648, %v2545_v27  ;;  %v2571_v60 = vand.u32 2147483647, %v2545_v27  ;;  %vm2552_vm3 = vweird.f32 %v2544_v33 }
 0x716   : > { %v2534_v38 = vadd.f32 %v2526_v56, %v2374_v1  ;;  %vm2567_vm4 = vweird.f32 %v2545_v27  ;;  %v2559_v8 = vor.u32 1.1754944e-38, %v2558_v52  ;;  %vm2557_vm7 = vcmp.eq.f32.partialorder %v2556_v58, 8.507059e+37  ;;  %v2605_v56 = vld [vmem:[#allocation2 + $0x38] sm:$0x30] }
 0x717   : > { %v2574_v10 = vor.u32 1.1754944e-38, %v2573_v53  ;;  %vm2572_vm8 = vcmp.eq.f32.partialorder %v2571_v60, 8.507059e+37 }
 0x718   : > { %v4696_v34 = vpop.eup %4695 }
 0x719   : > { %v2546_v39 = vadd.f32 1.0, %v4696_v34 }
 0x71a   : > { %v4698_v35 = vpop.eup %4697 }
 0x71b   : > { %v4700_v41 = vpop.eup %4699  ;;  %v2548_v42 = vmul.f32 %v4698_v35, %v2544_v33  ;;  %4701 = vrcp.f32 %v2546_v39  ;;  %vm2553_vm1 = vweird.f32 %v4698_v35  ;;  %v2588_v26 = vand.u32 2147483648, %v2546_v39 }
 0x71c   : > { %v2563_v47 = vmul.f32 %v4700_v41, %v2545_v27  ;;  %4703 = vtanh.f32 %v2534_v38  ;;  %vm2568_vm2 = vweird.f32 %v4700_v41  ;;  %vm2554_vm5 = vmor %vm2552_vm3, %vm2553_vm1  ;;  %vm2582_vm10 = vweird.f32 %v2546_v39 }
 0x71d   : > { %v2549_v48 = vsub.f32 1.0, %v2548_v42  ;;  %vm2569_vm6 = vmor %vm2567_vm4, %vm2568_vm2  ;;  %v2586_v15 = vand.u32 2147483647, %v2546_v39  ;;  %v2589_v6 = vor.u32 1.1754944e-38, %v2588_v26 }
 0x71e   : > { %v2564_v49 = vsub.f32 1.0, %v2563_v47 }
 0x71f   : > { %v2550_v57 = vmul.f32 %v4698_v35, %v2549_v48  ;;  %vm2587_vm12 = vcmp.eq.f32.partialorder %v2586_v15, 8.507059e+37 }
 0x720   : > { %v2565_v59 = vmul.f32 %v4700_v41, %v2564_v49 }
 0x721   : > { %v4702_v61 = vpop.eup %4701  ;;  %v2551_v62 = vadd.f32 %v4698_v35, %v2550_v57 }
 0x722   : > { %v4704_v4 = vpop.eup %4703  ;;  %v2578_v7 = vmul.f32 %v4702_v61, %v2546_v39  ;;  %v2566_v9 = vadd.f32 %v4700_v41, %v2565_v59  ;;  %vm2583_vm9 = vweird.f32 %v4702_v61 }
 0x723   : > { %v2555_v43 = vsel %vm2554_vm5, %v4698_v35, %v2551_v62  ;;  %vm2584_vm11 = vmor %vm2582_vm10, %vm2583_vm9 }
 0x724   : > { %v2579_v13 = vsub.f32 1.0, %v2578_v7  ;;  %v2560_v14 = vsel %vm2557_vm7, %v2559_v8, %v2555_v43  ;;  %v2570_v16 = vsel %vm2569_vm6, %v4700_v41, %v2566_v9 }
 0x725   : > { %v2575_v20 = vsel %vm2572_vm8, %v2574_v10, %v2570_v16  ;;  %v2597_v21 = vmul.f32 %v4704_v4, %v2560_v14 }
 0x726   : > { %v2596_v28 = vmul.f32 %v2594_v63, %v2575_v20  ;;  %v2580_v2 = vmul.f32 %v4702_v61, %v2579_v13 }
 0x728   : > { %v6811_v3 = vadd.f32 %v2597_v21, %v2596_v28  ;;  %v2581_v11 = vadd.f32 %v4702_v61, %v2580_v2 }
 0x72a   : > { %4705 = vtanh.f32 %v6811_v3  ;;  %v2585_v12 = vsel %vm2584_vm11, %v4702_v61, %v2581_v11  ;;  %v2828_v7 = vrot.slane %v6811_v3, 2 }
 0x72b   : > { %v2590_v44 = vsel %vm2587_vm12, %v2589_v6, %v2585_v12 }
 0x730   : > { %v4706_v0 = vpop.eup %4705 }
 0x731   : > { %v2600_v5 = vmul.f32 %v4706_v0, %v2590_v44 }
 0x733   : > { %2601 = vst [vmem:[%s5239_s27 + $0x8] sm:$0xc0] %v2600_v5  ;;  %v2671_v40 = vrot.slane %v2600_v5, 6 }
 0x735   : > { %2689 = vmatmul.f32.vlgmr.msrb.gmra.mxu0 %v2671_v40  ;;  %2709 = vmatmul.f32.vlgmr.msrb.gmra.mxu1 %v2671_v40 }
 0x736   : > { %2729 = vmatmul.f32.vlgmr.msrb.gmra.mxu2 %v2671_v40  ;;  %2749 = vmatmul.f32.vlgmr.msrb.gmra.mxu3 %v2671_v40  ;;  %v6821_v40 = vld [vmem:[%s5202_s6 + $0x1e0] sm:$0xff] }
 0x737   : > { %7811 = vst [vmem:[#allocation44_spill] sm:$0xff] %v6821_v40  ;;  %3141 = vmatpush.msrb.mxu0 %v6821_v40 }
 0x7b2   : > { %v2690_v37 = vpop.f32.mrf.mxu0  ;;  %v2710_v46 = vpop.f32.mrf.mxu1 }
 0x7b3   : > { %v2757_v51 = vrot.slane %v2690_v37, 4  ;;  %v2758_v36 = vrot.slane %v2710_v46, 4  ;;  %v6827_v37 = vld [vmem:[%s5202_s6 + $0x1f0] sm:$0xff]  ;;  %v6837_v46 = vld [vmem:[%s5202_s6 + $0x1c0] sm:$0xff] }
 0x7b4   : > { %7812 = vst [vmem:[#allocation45_spill] sm:$0xff] %v6827_v37  ;;  %3181 = vmatpush.msrb.mxu2 %v6827_v37  ;;  %3142 = vmatpush.msrb.mxu0 %v6837_v46 }
 0x7b5   : > { %v2765_v22 = vadd.f32 %v2757_v51, %v2602_v31  ;;  %v2766_v17 = vadd.f32 %v2758_v36, %v2603_v45  ;;  %v6824_v31 = vld [vmem:[%s5202_s6 + $0x1e8] sm:$0xff]  ;;  %v6832_v45 = vld [vmem:[%s5202_s6 + $0x1f8] sm:$0xff]  ;;  %v6843_v36 = vld [vmem:[%s5202_s6 + $0x1d0] sm:$0xff] }
 0x7b6   : > { %3161 = vmatpush.msrb.mxu1 %v6824_v31  ;;  %7813 = vst [vmem:[#allocation46_spill] sm:$0xff] %v6832_v45  ;;  %3201 = vmatpush.msrb.mxu3 %v6832_v45  ;;  %v6840_v51 = vld [vmem:[%s5202_s6 + $0x1c8] sm:$0xff] }
 0x7b7   : > { %v4445_v19 = vmul.f32 -1.442695, %v2765_v22  ;;  %v4446_v30 = vmul.f32 -1.442695, %v2766_v17  ;;  %v6848_v22 = vld [vmem:[%s5202_s6 + $0x1d8] sm:$0xff]  ;;  %3182 = vmatpush.msrb.mxu2 %v6843_v36  ;;  %v6853_v17 = vld [vmem:[%s5202_s6 + $0x1a0] sm:$0xff] }
 0x7b8   : > { %3162 = vmatpush.msrb.mxu1 %v6840_v51  ;;  %3202 = vmatpush.msrb.mxu3 %v6848_v22 }
 0x7b9   : > { %4707 = vpow2.f32 %v4445_v19  ;;  %v2730_v24 = vpop.f32.mrf.mxu2  ;;  %v2750_v1 = vpop.f32.mrf.mxu3  ;;  %v6856_v19 = vld [vmem:[%s5202_s6 + $0x1a8] sm:$0xff]  ;;  %3143 = vmatpush.msrb.mxu0 %v6853_v17 }
 0x7ba   : > { %4709 = vpow2.f32 %v4446_v30  ;;  %v2759_v23 = vrot.slane %v2730_v24, 4  ;;  %v2760_v25 = vrot.slane %v2750_v1, 4  ;;  %7814 = vst [vmem:[#allocation47_spill] sm:$0xff] %v6856_v19  ;;  %v6859_v30 = vld [vmem:[%s5202_s6 + $0x1b0] sm:$0xff]  ;;  %3163 = vmatpush.msrb.mxu1 %v6856_v19  ;;  %v6869_v24 = vld [vmem:[%s5202_s6 + $0x180] sm:$0xff] }
 0x7bb   : > { %7815 = vst [vmem:[#allocation48_spill] sm:$0xff] %v6859_v30  ;;  %3183 = vmatpush.msrb.mxu2 %v6859_v30  ;;  %3144 = vmatpush.msrb.mxu0 %v6869_v24  ;;  %v6901_v1 = vld [vmem:[%s5202_s6 + $0x140] sm:$0xff] }
 0x7bc   : > { %v2767_v29 = vadd.f32 %v2759_v23, %v2604_v32  ;;  %v2768_v35 = vadd.f32 %v2760_v25, %v2605_v56  ;;  %v6864_v32 = vld [vmem:[%s5202_s6 + $0x1b8] sm:$0xff]  ;;  %7817 = vst [vmem:[#allocation50_spill] sm:$0xff] %v6869_v24  ;;  %v6872_v23 = vld [vmem:[%s5202_s6 + $0x188] sm:$0xff]  ;;  %v6907_v56 = vld [vmem:[%s5202_s6 + $0x150] sm:$0xff] }
 0x7bd   : > { %7816 = vst [vmem:[#allocation49_spill] sm:$0xff] %v6864_v32  ;;  %3203 = vmatpush.msrb.mxu3 %v6864_v32  ;;  %3164 = vmatpush.msrb.mxu1 %v6872_v23  ;;  %v6904_v25 = vld [vmem:[%s5202_s6 + $0x148] sm:$0xff] }
 0x7be   : > { %v4447_v18 = vmul.f32 -1.442695, %v2767_v29  ;;  %v6875_v29 = vld [vmem:[%s5202_s6 + $0x190] sm:$0xff]  ;;  %7819 = vst [vmem:[#allocation52_spill] sm:$0xff] %v6901_v1 }
 0x7bf   : > { %v4708_v55 = vpop.eup %4707  ;;  %3184 = vmatpush.msrb.mxu2 %v6875_v29  ;;  %7820 = vst [vmem:[#allocation53_spill] sm:$0xff] %v6904_v25 }
 0x7c0   : > { %v4710_v54 = vpop.eup %4709  ;;  %v2778_v33 = vadd.f32 1.0, %v4708_v55  ;;  %4711 = vpow2.f32 %v4447_v18  ;;  %v6880_v18 = vld [vmem:[%s5202_s6 + $0x198] sm:$0xff]  ;;  %v6885_v55 = vld [vmem:[%s5202_s6 + $0x160] sm:$0xff]  ;;  %7821 = vst [vmem:[#allocation54_spill] sm:$0xff] %v6907_v56 }
 0x7c1   : > { %v2779_v27 = vadd.f32 1.0, %v4710_v54  ;;  %3204 = vmatpush.msrb.mxu3 %v6880_v18  ;;  %v6888_v54 = vld [vmem:[%s5202_s6 + $0x168] sm:$0xff]  ;;  %3145 = vmatpush.msrb.mxu0 %v6885_v55 }
 0x7c2   : > { %4713 = vrcp.f32 %v2778_v33  ;;  %v2792_v50 = vand.u32 2147483648, %v2778_v33  ;;  %v2790_v57 = vand.u32 2147483647, %v2778_v33  ;;  %vm2786_vm15 = vweird.f32 %v2778_v33  ;;  %7818 = vst [vmem:[#allocation51_spill] sm:$0xff] %v6888_v54  ;;  %3165 = vmatpush.msrb.mxu1 %v6888_v54 }
 0x7c3   : > { %4715 = vrcp.f32 %v2779_v27  ;;  %v2807_v52 = vand.u32 2147483648, %v2779_v27  ;;  %v2805_v59 = vand.u32 2147483647, %v2779_v27  ;;  %vm2801_vm0 = vweird.f32 %v2779_v27  ;;  %3146 = vmatpush.msrb.mxu0 %v6901_v1 }
 0x7c4   : > { %v2793_v63 = vor.u32 1.1754944e-38, %v2792_v50  ;;  %vm2791_vm3 = vcmp.eq.f32.partialorder %v2790_v57, 8.507059e+37  ;;  %3166 = vmatpush.msrb.mxu1 %v6904_v25  ;;  %v6944_v57 = vld [vmem:[%s5202_s6 + $0x118] sm:$0xff] }
 0x7c5   : > { %v2808_v8 = vor.u32 1.1754944e-38, %v2807_v52  ;;  %vm2806_vm4 = vcmp.eq.f32.partialorder %v2805_v59, 8.507059e+37  ;;  %v2837_v52 = vld [vmem:[#allocation2 + $0x20] sm:$0xc] }
 0x7c6   : > { %v4712_v34 = vpop.eup %4711 }
 0x7c7   : > { %v2780_v38 = vadd.f32 1.0, %v4712_v34  ;;  %v6912_v34 = vld [vmem:[%s5202_s6 + $0x158] sm:$0xff] }
 0x7c8   : > { %v4714_v39 = vpop.eup %4713  ;;  %7822 = vst [vmem:[#allocation55_spill] sm:$0xff] %v6912_v34 }
 0x7c9   : > { %v4716_v41 = vpop.eup %4715  ;;  %v2782_v42 = vmul.f32 %v4714_v39, %v2778_v33  ;;  %4717 = vrcp.f32 %v2780_v38  ;;  %vm2787_vm13 = vweird.f32 %v4714_v39  ;;  %v2822_v3 = vand.u32 2147483648, %v2780_v38  ;;  %v6891_v33 = vld [vmem:[%s5202_s6 + $0x170] sm:$0xff] }
 0x7ca   : > { %v2797_v47 = vmul.f32 %v4716_v41, %v2779_v27  ;;  %4719 = vtanh.f32 %v2768_v35  ;;  %vm2802_vm14 = vweird.f32 %v4716_v41  ;;  %vm2788_vm1 = vmor %vm2786_vm15, %vm2787_vm13  ;;  %vm2816_vm6 = vweird.f32 %v2780_v38  ;;  %v6896_v27 = vld [vmem:[%s5202_s6 + $0x178] sm:$0xff]  ;;  %3185 = vmatpush.msrb.mxu2 %v6891_v33  ;;  %v6923_v35 = vld [vmem:[%s5202_s6 + $0x130] sm:$0xff] }
 0x7cb   : > { %v2783_v48 = vsub.f32 1.0, %v2782_v42  ;;  %vm2803_vm2 = vmor %vm2801_vm0, %vm2802_vm14  ;;  %v2820_v26 = vand.u32 2147483647, %v2780_v38  ;;  %v2823_v12 = vor.u32 1.1754944e-38, %v2822_v3  ;;  %3205 = vmatpush.msrb.mxu3 %v6896_v27  ;;  %v6933_v42 = vld [vmem:[%s5202_s6 + $0x100] sm:$0xff] }
 0x7cc   : > { %v2798_v49 = vsub.f32 1.0, %v2797_v47  ;;  %3186 = vmatpush.msrb.mxu2 %v6907_v56  ;;  %v6936_v47 = vld [vmem:[%s5202_s6 + $0x108] sm:$0xff]  ;;  %v6995_v3 = vld [vmem:[%s5202_s6 + $0x80] sm:$0xff] }
 0x7cd   : > { %v2784_v53 = vmul.f32 %v4714_v39, %v2783_v48  ;;  %vm2821_vm8 = vcmp.eq.f32.partialorder %v2820_v26, 8.507059e+37  ;;  %3206 = vmatpush.msrb.mxu3 %v6912_v34  ;;  %v6939_v48 = vld [vmem:[%s5202_s6 + $0x110] sm:$0xff] }
 0x7ce   : > { %v2799_v58 = vmul.f32 %v4716_v41, %v2798_v49  ;;  %3187 = vmatpush.msrb.mxu2 %v6923_v35  ;;  %v2836_v49 = vld [vmem:[#allocation2 + $0x8] sm:$0xc] }
 0x7cf   : > { %v4718_v60 = vpop.eup %4717  ;;  %v2785_v61 = vadd.f32 %v4714_v39, %v2784_v53 }
 0x7d0   : > { %v2812_v62 = vmul.f32 %v4718_v60, %v2780_v38  ;;  %v2800_v4 = vadd.f32 %v4716_v41, %v2799_v58  ;;  %v4720_v10 = vpop.eup %4719  ;;  %vm2817_vm5 = vweird.f32 %v4718_v60  ;;  %v6917_v38 = vld [vmem:[%s5202_s6 + $0x120] sm:$0xff]  ;;  %3188 = vmatpush.msrb.mxu2 %v6939_v48 }
 0x7d1   : > { %v2789_v9 = vsel %vm2788_vm1, %v4714_v39, %v2785_v61  ;;  %vm2818_vm7 = vmor %vm2816_vm6, %vm2817_vm5  ;;  %v6920_v39 = vld [vmem:[%s5202_s6 + $0x128] sm:$0xff]  ;;  %3147 = vmatpush.msrb.mxu0 %v6917_v38 }
 0x7d2   : > { %v2813_v43 = vsub.f32 1.0, %v2812_v62  ;;  %v2794_v13 = vsel %vm2791_vm3, %v2793_v63, %v2789_v9  ;;  %v2804_v14 = vsel %vm2803_vm2, %v4716_v41, %v2800_v4  ;;  %3167 = vmatpush.msrb.mxu1 %v6920_v39  ;;  %v6928_v41 = vld [vmem:[%s5202_s6 + $0x138] sm:$0xff]  ;;  %v6952_v61 = vld [vmem:[%s5202_s6 + $0xe8] sm:$0xff]  ;;  %v6955_v62 = vld [vmem:[%s5202_s6 + $0xf0] sm:$0xff] }
 0x7d3   : > { %v2809_v16 = vsel %vm2806_vm4, %v2808_v8, %v2804_v14  ;;  %v2831_v20 = vmul.f32 %v4720_v10, %v2794_v13  ;;  %3207 = vmatpush.msrb.mxu3 %v6928_v41  ;;  %3148 = vmatpush.msrb.mxu0 %v6933_v42  ;;  %v6960_v63 = vld [vmem:[%s5202_s6 + $0xf8] sm:$0xff]  ;;  %v6965_v8 = vld [vmem:[%s5202_s6 + $0xc0] sm:$0xff]  ;;  %v6968_v9 = vld [vmem:[%s5202_s6 + $0xc8] sm:$0xff] }
 0x7d4   : > { %v2830_v21 = vmul.f32 %v2828_v7, %v2809_v16  ;;  %v2814_v28 = vmul.f32 %v4718_v60, %v2813_v43  ;;  %3168 = vmatpush.msrb.mxu1 %v6936_v47  ;;  %3189 = vmatpush.msrb.mxu2 %v6955_v62  ;;  %v6971_v10 = vld [vmem:[%s5202_s6 + $0xd0] sm:$0xff]  ;;  %v6976_v43 = vld [vmem:[%s5202_s6 + $0xd8] sm:$0xff]  ;;  %v2838_v16 = vld [vmem:[#allocation2 + $0x28] sm:$0xc] }
 0x7d5   : > { %3208 = vmatpush.msrb.mxu3 %v6944_v57 }
 0x7d6   : > { %v6816_v2 = vadd.f32 %v2831_v20, %v2830_v21  ;;  %v2815_v11 = vadd.f32 %v4718_v60, %v2814_v28  ;;  %3169 = vmatpush.msrb.mxu1 %v6952_v61  ;;  %3190 = vmatpush.msrb.mxu2 %v6971_v10  ;;  %v6981_v20 = vld [vmem:[%s5202_s6 + $0xa0] sm:$0xff]  ;;  %v6984_v21 = vld [vmem:[%s5202_s6 + $0xa8] sm:$0xff]  ;;  %v6989_v28 = vld [vmem:[%s5202_s6 + $0xb0] sm:$0xff] }
 0x7d7   : > { %3209 = vmatpush.msrb.mxu3 %v6960_v63 }
 0x7d8   : > { %4721 = vtanh.f32 %v6816_v2  ;;  %v2819_v15 = vsel %vm2818_vm7, %v4718_v60, %v2815_v11  ;;  %v6949_v60 = vld [vmem:[%s5202_s6 + $0xe0] sm:$0xff]  ;;  %3170 = vmatpush.msrb.mxu1 %v6968_v9  ;;  %v6992_v11 = vld [vmem:[%s5202_s6 + $0xb8] sm:$0xff]  ;;  %3191 = vmatpush.msrb.mxu2 %v6989_v28 }
 0x7d9   : > { %v2824_v0 = vsel %vm2821_vm8, %v2823_v12, %v2819_v15  ;;  %3149 = vmatpush.msrb.mxu0 %v6949_v60  ;;  %3210 = vmatpush.msrb.mxu3 %v6976_v43  ;;  %v7000_v15 = vld [vmem:[%s5202_s6 + $0x88] sm:$0xff]  ;;  %v7003_v12 = vld [vmem:[%s5202_s6 + $0x90] sm:$0xff] }
 0x7da   : > { %3171 = vmatpush.msrb.mxu1 %v6984_v21  ;;  %3192 = vmatpush.msrb.mxu2 %v7003_v12 }
 0x7db   : > { %3150 = vmatpush.msrb.mxu0 %v6965_v8  ;;  %3211 = vmatpush.msrb.mxu3 %v6992_v11 }
 0x7dc   : > { %3172 = vmatpush.msrb.mxu1 %v7000_v15 }
 0x7dd   : > { %3151 = vmatpush.msrb.mxu0 %v6981_v20 }
 0x7de   : > { %v4722_v6 = vpop.eup %4721 }
 0x7df   : > { %v2834_v44 = vmul.f32 %v4722_v6, %v2824_v0  ;;  %v7006_v6 = vld [vmem:[%s5202_s6 + $0x98] sm:$0xff]  ;;  %3152 = vmatpush.msrb.mxu0 %v6995_v3 }
 0x7e0   : > { %3212 = vmatpush.msrb.mxu3 %v7006_v6 }
 0x7e1   : > { %2835 = vst [vmem:[%s5239_s27 + $0x8] sm:$0x30] %v2834_v44  ;;  %v2905_v5 = vrot.slane %v2834_v44, 4  ;;  %v7011_v44 = vld [vmem:[%s5202_s6 + $0x60] sm:$0xff] }
 0x7e2   : > { %7823 = vst [vmem:[#allocation56_spill] sm:$0xff] %v7011_v44  ;;  %3153 = vmatpush.msrb.mxu0 %v7011_v44 }
 0x7e3   : > { %2923 = vmatmul.f32.vlgmr.msra.gmra.mxu0 %v2905_v5  ;;  %2943 = vmatmul.f32.vlgmr.msra.gmra.mxu1 %v2905_v5 }
 0x7e4   : > { %2963 = vmatmul.f32.vlgmr.msra.gmra.mxu2 %v2905_v5  ;;  %2983 = vmatmul.f32.vlgmr.msra.gmra.mxu3 %v2905_v5  ;;  %v7014_v5 = vld [vmem:[%s5202_s6 + $0x68] sm:$0xff] }
 0x7e5   : > { %7824 = vst [vmem:[#allocation57_spill] sm:$0xff] %v7014_v5  ;;  %3173 = vmatpush.msrb.mxu1 %v7014_v5 }
 0x860   : > { %v2924_v50 = vpop.f32.mrf.mxu0  ;;  %v2944_v53 = vpop.f32.mrf.mxu1 }
 0x861   : > { %v2991_v58 = vrot.slane %v2924_v50, 6  ;;  %v2992_v59 = vrot.slane %v2944_v53, 6  ;;  %v7022_v50 = vld [vmem:[%s5202_s6 + $0x78] sm:$0xff]  ;;  %v7028_v53 = vld [vmem:[%s5202_s6 + $0x48] sm:$0xff] }
 0x862   : > { %7826 = vst [vmem:[#allocation59_spill] sm:$0xff] %v7022_v50  ;;  %3213 = vmatpush.msrb.mxu3 %v7022_v50  ;;  %3174 = vmatpush.msrb.mxu1 %v7028_v53  ;;  %v7057_v50 = vld [vmem:[%s5202_s6] sm:$0xff] }
 0x863   : > { %v2999_v4 = vadd.f32 %v2991_v58, %v2836_v49  ;;  %v3000_v7 = vadd.f32 %v2992_v59, %v2837_v52  ;;  %v7017_v49 = vld [vmem:[%s5202_s6 + $0x70] sm:$0xff]  ;;  %v7025_v52 = vld [vmem:[%s5202_s6 + $0x40] sm:$0xff]  ;;  %7828 = vst [vmem:[#allocation61_spill] sm:$0xff] %v7028_v53 }
 0x864   : > { %7825 = vst [vmem:[#allocation58_spill] sm:$0xff] %v7017_v49  ;;  %v7033_v59 = vld [vmem:[%s5202_s6 + $0x50] sm:$0xff]  ;;  %3193 = vmatpush.msrb.mxu2 %v7017_v49  ;;  %3154 = vmatpush.msrb.mxu0 %v7025_v52  ;;  %v7060_v49 = vld [vmem:[%s5202_s6 + $0x8] sm:$0xff] }
 0x865   : > { %v4448_v13 = vmul.f32 -1.442695, %v2999_v4  ;;  %v4449_v14 = vmul.f32 -1.442695, %v3000_v7  ;;  %7827 = vst [vmem:[#allocation60_spill] sm:$0xff] %v7025_v52  ;;  %v7036_v4 = vld [vmem:[%s5202_s6 + $0x58] sm:$0xff] }
 0x866   : > { %7829 = vst [vmem:[#allocation62_spill] sm:$0xff] %v7033_v59  ;;  %v7041_v7 = vld [vmem:[%s5202_s6 + $0x20] sm:$0xff]  ;;  %3194 = vmatpush.msrb.mxu2 %v7033_v59  ;;  %3214 = vmatpush.msrb.mxu3 %v7036_v4  ;;  %v7067_v53 = vld [vmem:[%s5202_s6 + $0x10] sm:$0xff]  ;;  %v7070_v52 = vld [vmem:[%s5202_s6 + $0x18] sm:$0xff] }
 0x867   : > { %4723 = vpow2.f32 %v4448_v13  ;;  %v2964_v26 = vpop.f32.mrf.mxu2  ;;  %v7044_v13 = vld [vmem:[%s5202_s6 + $0x28] sm:$0xff]  ;;  %7830 = vst [vmem:[#allocation63_spill] sm:$0xff] %v7060_v49  ;;  %3155 = vmatpush.msrb.mxu0 %v7041_v7  ;;  %v2984_v59 = vpop.f32.mrf.mxu3 }
 0x868   : > { %4725 = vpow2.f32 %v4449_v14  ;;  %v2993_v0 = vrot.slane %v2964_v26, 6  ;;  %v7052_v26 = vld [vmem:[%s5202_s6 + $0x38] sm:$0xff]  ;;  %3175 = vmatpush.msrb.mxu1 %v7044_v13 }
 0x869   : > { %3215 = vmatpush.msrb.mxu3 %v7052_v26  ;;  %3156 = vmatpush.msrb.mxu0 %v7057_v50 }
 0x86a   : > { %v3001_v58 = vadd.f32 %v2993_v0, %v2838_v16  ;;  %v7049_v16 = vld [vmem:[%s5202_s6 + $0x30] sm:$0xff]  ;;  %3176 = vmatpush.msrb.mxu1 %v7060_v49 }
 0x86b   : > { %3195 = vmatpush.msrb.mxu2 %v7049_v16  ;;  %3216 = vmatpush.msrb.mxu3 %v7070_v52 }
 0x86c   : > { %v4450_v14 = vmul.f32 -1.442695, %v3001_v58  ;;  %3360 = vmatpush.msra.mxu0 %v6821_v40  ;;  %3380 = vmatpush.msra.mxu1 %v6824_v31 }
 0x86d   : > { %v4724_v0 = vpop.eup %4723  ;;  %3196 = vmatpush.msrb.mxu2 %v7067_v53  ;;  %3420 = vmatpush.msra.mxu3 %v6832_v45 }
 0x86e   : > { %v4726_v5 = vpop.eup %4725  ;;  %v7062_v58 = vadd.f32 1.0, %v4724_v0  ;;  %4727 = vpow2.f32 %v4450_v14  ;;  %v2994_v14 = vrot.slane %v2984_v59, 6  ;;  %3361 = vmatpush.msra.mxu0 %v6837_v46  ;;  %3381 = vmatpush.msra.mxu1 %v6840_v51 }
 0x86f   : > { %v7072_v44 = vadd.f32 1.0, %v4726_v5  ;;  %v2839_v5 = vld [vmem:[#allocation2 + $0x38] sm:$0xc]  ;;  %3400 = vmatpush.msra.mxu2 %v6827_v37  ;;  %3421 = vmatpush.msra.mxu3 %v6848_v22 }
 0x870   : > { %4729 = vrcp.f32 %v7062_v58  ;;  %v3002_v40 = vadd.f32 %v2994_v14, %v2839_v5  ;;  %3362 = vmatpush.msra.mxu0 %v6853_v17  ;;  %3382 = vmatpush.msra.mxu1 %v6856_v19  ;;  %v3026_v19 = vand.u32 2147483648, %v7062_v58  ;;  %vm3020_vm11 = vweird.f32 %v7062_v58 }
 0x871   : > { %4731 = vrcp.f32 %v7072_v44  ;;  %3401 = vmatpush.msra.mxu2 %v6843_v36  ;;  %3422 = vmatpush.msra.mxu3 %v6864_v32  ;;  %v3041_v32 = vand.u32 2147483648, %v7072_v44  ;;  %vm3035_vm12 = vweird.f32 %v7072_v44 }
 0x872   : > { %3363 = vmatpush.msra.mxu0 %v6869_v24  ;;  %3383 = vmatpush.msra.mxu1 %v6872_v23  ;;  %v3024_v24 = vand.u32 2147483647, %v7062_v58 }
 0x873   : > { %3402 = vmatpush.msra.mxu2 %v6859_v30  ;;  %3423 = vmatpush.msra.mxu3 %v6880_v18 }
 0x874   : > { %v4728_v0 = vpop.eup %4727  ;;  %3364 = vmatpush.msra.mxu0 %v6885_v55  ;;  %3384 = vmatpush.msra.mxu1 %v6888_v54  ;;  %vm3025_vm15 = vcmp.eq.f32.partialorder %v3024_v24, 8.507059e+37 }
 0x875   : > { %v7088_v49 = vadd.f32 1.0, %v4728_v0  ;;  %3403 = vmatpush.msra.mxu2 %v6875_v29  ;;  %3424 = vmatpush.msra.mxu3 %v6896_v27 }
 0x876   : > { %v4730_v59 = vpop.eup %4729  ;;  %3365 = vmatpush.msra.mxu0 %v6901_v1  ;;  %3385 = vmatpush.msra.mxu1 %v6904_v25 }
 0x877   : > { %v4732_v37 = vpop.eup %4731  ;;  %v3016_v45 = vmul.f32 %v4730_v59, %v7062_v58  ;;  %4733 = vrcp.f32 %v7088_v49  ;;  %vm3021_vm9 = vweird.f32 %v4730_v59  ;;  %3404 = vmatpush.msra.mxu2 %v6891_v33  ;;  %3425 = vmatpush.msra.mxu3 %v6912_v34  ;;  %v3042_v58 = vor.u32 1.1754944e-38, %v3041_v32 }
 0x878   : > { %v3031_v0 = vmul.f32 %v4732_v37, %v7072_v44  ;;  %4735 = vtanh.f32 %v3002_v40  ;;  %vm3036_vm10 = vweird.f32 %v4732_v37  ;;  %vm3022_vm13 = vmor %vm3020_vm11, %vm3021_vm9  ;;  %3366 = vmatpush.msra.mxu0 %v6917_v38  ;;  %3386 = vmatpush.msra.mxu1 %v6920_v39  ;;  %vm3050_vm2 = vweird.f32 %v7088_v49 }
 0x879   : > { %v3017_v14 = vsub.f32 1.0, %v3016_v45  ;;  %3405 = vmatpush.msra.mxu2 %v6907_v56  ;;  %vm3037_vm14 = vmor %vm3035_vm12, %vm3036_vm10  ;;  %3426 = vmatpush.msra.mxu3 %v6928_v41 }
 0x87a   : > { %v3032_v5 = vsub.f32 1.0, %v3031_v0  ;;  %v3039_v0 = vand.u32 2147483647, %v7072_v44  ;;  %3367 = vmatpush.msra.mxu0 %v6933_v42  ;;  %3387 = vmatpush.msra.mxu1 %v6936_v47 }
 0x87b   : > { %v3018_v30 = vmul.f32 %v4730_v59, %v3017_v14  ;;  %3406 = vmatpush.msra.mxu2 %v6923_v35  ;;  %3427 = vmatpush.msra.mxu3 %v6944_v57 }
 0x87c   : > { %v3033_v45 = vmul.f32 %v4732_v37, %v3032_v5  ;;  %v3027_v5 = vor.u32 1.1754944e-38, %v3026_v19  ;;  %vm3040_vm0 = vcmp.eq.f32.partialorder %v3039_v0, 8.507059e+37  ;;  %3368 = vmatpush.msra.mxu0 %v6949_v60  ;;  %3388 = vmatpush.msra.mxu1 %v6952_v61  ;;  %v7833_v0 = vld [vmem:[#allocation58_spill] sm:$0xff] }
 0x87d   : > { %v7113_v40 = vpop.eup %4733  ;;  %v3019_v54 = vadd.f32 %v4730_v59, %v3018_v30  ;;  %v3062_v30 = vrot.slane %v6816_v2, 2  ;;  %3407 = vmatpush.msra.mxu2 %v6939_v48  ;;  %3428 = vmatpush.msra.mxu3 %v6960_v63 }
 0x87e   : > { %v3046_v14 = vmul.f32 %v7113_v40, %v7088_v49  ;;  %v3034_v1 = vadd.f32 %v4732_v37, %v3033_v45  ;;  %v4736_v44 = vpop.eup %4735  ;;  %3369 = vmatpush.msra.mxu0 %v6965_v8  ;;  %3389 = vmatpush.msra.mxu1 %v6968_v9  ;;  %vm3051_vm1 = vweird.f32 %v7113_v40 }
 0x87f   : > { %v3023_v56 = vsel %vm3022_vm13, %v4730_v59, %v3019_v54  ;;  %3408 = vmatpush.msra.mxu2 %v6955_v62  ;;  %3429 = vmatpush.msra.mxu3 %v6976_v43  ;;  %vm3052_vm3 = vmor %vm3050_vm2, %vm3051_vm1  ;;  %v7831_v59 = vld [vmem:[#allocation56_spill] sm:$0xff] }
 0x880   : > { %v3047_v34 = vsub.f32 1.0, %v3046_v14  ;;  %v3028_v25 = vsel %vm3025_vm15, %v3027_v5, %v3023_v56  ;;  %v3038_v19 = vsel %vm3037_vm14, %v4732_v37, %v3034_v1  ;;  %v3056_v1 = vand.u32 2147483648, %v7088_v49  ;;  %3370 = vmatpush.msra.mxu0 %v6981_v20  ;;  %3390 = vmatpush.msra.mxu1 %v6984_v21  ;;  %v7834_v14 = vld [vmem:[#allocation59_spill] sm:$0xff] }
 0x881   : > { %v3043_v45 = vsel %vm3040_vm0, %v3042_v58, %v3038_v19  ;;  %v3065_v2 = vmul.f32 %v4736_v44, %v3028_v25  ;;  %3409 = vmatpush.msra.mxu2 %v6971_v10  ;;  %v3054_v25 = vand.u32 2147483647, %v7088_v49  ;;  %3430 = vmatpush.msra.mxu3 %v6992_v11  ;;  %v7832_v49 = vld [vmem:[#allocation57_spill] sm:$0xff]  ;;  %v7835_v58 = vld [vmem:[#allocation60_spill] sm:$0xff]  ;;  %v7837_v19 = vld [vmem:[#allocation62_spill] sm:$0xff] }
 0x882   : > { %v3064_v32 = vmul.f32 %v3062_v30, %v3043_v45  ;;  %v3048_v24 = vmul.f32 %v7113_v40, %v3047_v34  ;;  %3371 = vmatpush.msra.mxu0 %v6995_v3  ;;  %3391 = vmatpush.msra.mxu1 %v7000_v15  ;;  %v3057_v34 = vor.u32 1.1754944e-38, %v3056_v1  ;;  %v7842_v1 = vld [vmem:[#allocation47_spill] sm:$0xff] }
 0x883   : > { %3410 = vmatpush.msra.mxu2 %v6989_v28  ;;  %3431 = vmatpush.msra.mxu3 %v7006_v6  ;;  %vm3055_vm4 = vcmp.eq.f32.partialorder %v3054_v25, 8.507059e+37  ;;  %v7843_v25 = vld [vmem:[#allocation48_spill] sm:$0xff] }
 0x884   : > { %v7137_v37 = vadd.f32 %v3065_v2, %v3064_v32  ;;  %v3049_v54 = vadd.f32 %v7113_v40, %v3048_v24  ;;  %3372 = vmatpush.msra.mxu0 %v7831_v59  ;;  %3392 = vmatpush.msra.mxu1 %v7832_v49  ;;  %v7838_v2 = vld [vmem:[#allocation63_spill] sm:$0xff]  ;;  %v7839_v32 = vld [vmem:[#allocation44_spill] sm:$0xff]  ;;  %v7840_v24 = vld [vmem:[#allocation45_spill] sm:$0xff] }
 0x885   : > { %3411 = vmatpush.msra.mxu2 %v7003_v12  ;;  %3432 = vmatpush.msra.mxu3 %v7834_v14 }
 0x886   : > { %4737 = vtanh.f32 %v7137_v37  ;;  %v3053_v56 = vsel %vm3052_vm3, %v7113_v40, %v3049_v54  ;;  %3373 = vmatpush.msra.mxu0 %v7835_v58  ;;  %v7836_v40 = vld [vmem:[#allocation61_spill] sm:$0xff]  ;;  %v7841_v54 = vld [vmem:[#allocation46_spill] sm:$0xff] }
 0x887   : > { %3412 = vmatpush.msra.mxu2 %v7833_v0  ;;  %v3058_v30 = vsel %vm3055_vm4, %v3057_v34, %v3053_v56  ;;  %3393 = vmatpush.msra.mxu1 %v7836_v40  ;;  %v7844_v56 = vld [vmem:[#allocation49_spill] sm:$0xff] }
 0x888   : > { %3433 = vmatpush.msra.mxu3 %v7036_v4  ;;  %3374 = vmatpush.msra.mxu0 %v7041_v7 }
 0x889   : > { %3413 = vmatpush.msra.mxu2 %v7837_v19  ;;  %3394 = vmatpush.msra.mxu1 %v7044_v13 }
 0x88a   : > { %3434 = vmatpush.msra.mxu3 %v7052_v26  ;;  %3375 = vmatpush.msra.mxu0 %v7057_v50 }
 0x88b   : > { %3414 = vmatpush.msra.mxu2 %v7049_v16  ;;  %3395 = vmatpush.msra.mxu1 %v7838_v2 }
 0x88c   : > { %v4738_v5 = vpop.eup %4737  ;;  %3435 = vmatpush.msra.mxu3 %v7070_v52 }
 0x88d   : > { %v3068_v44 = vmul.f32 %v4738_v5, %v3058_v30  ;;  %3415 = vmatpush.msra.mxu2 %v7067_v53 }
 0x88f   : > { %3069 = vst [vmem:[%s5239_s27 + $0x8] sm:$0xc] %v3068_v44  ;;  %v3139_v45 = vrot.slane %v3068_v44, 2 }
 0x891   : > { %3157 = vmatmul.f32.vlgmr.msrb.gmra.mxu0 %v3139_v45  ;;  %3177 = vmatmul.f32.vlgmr.msrb.gmra.mxu1 %v3139_v45 }
 0x892   : > { %3197 = vmatmul.f32.vlgmr.msrb.gmra.mxu2 %v3139_v45  ;;  %3217 = vmatmul.f32.vlgmr.msrb.gmra.mxu3 %v3139_v45 }
 0x893   : > { %3594 = vmatpush.msrb.mxu0 %v7839_v32  ;;  %3614 = vmatpush.msrb.mxu1 %v6824_v31  ;;  %v7845_v31 = vld [vmem:[#allocation50_spill] sm:$0xff] }
 0x894   : > { %3634 = vmatpush.msrb.mxu2 %v7840_v24  ;;  %3654 = vmatpush.msrb.mxu3 %v7841_v54 }
 0x895   : > { %3595 = vmatpush.msrb.mxu0 %v6837_v46  ;;  %3615 = vmatpush.msrb.mxu1 %v6840_v51  ;;  %v7846_v46 = vld [vmem:[#allocation51_spill] sm:$0xff]  ;;  %v7847_v51 = vld [vmem:[#allocation52_spill] sm:$0xff] }
 0x896   : > { %3635 = vmatpush.msrb.mxu2 %v6843_v36  ;;  %3655 = vmatpush.msrb.mxu3 %v6848_v22  ;;  %v7848_v36 = vld [vmem:[#allocation53_spill] sm:$0xff]  ;;  %v7849_v22 = vld [vmem:[#allocation54_spill] sm:$0xff] }
 0x897   : > { %3596 = vmatpush.msrb.mxu0 %v6853_v17  ;;  %3616 = vmatpush.msrb.mxu1 %v7842_v1  ;;  %v7850_v17 = vld [vmem:[#allocation55_spill] sm:$0xff] }
 0x898   : > { %3636 = vmatpush.msrb.mxu2 %v7843_v25  ;;  %3656 = vmatpush.msrb.mxu3 %v7844_v56 }
 0x899   : > { %3597 = vmatpush.msrb.mxu0 %v7845_v31  ;;  %3617 = vmatpush.msrb.mxu1 %v6872_v23  ;;  %v3070_v23 = vld [vmem:[#allocation2 + $0x8] sm:$0x3]  ;;  %v3292_v31 = vld [vmem:[#allocation2 + $0x30] sm:$0xc0] }
 0x89a   : > { %3637 = vmatpush.msrb.mxu2 %v6875_v29  ;;  %3657 = vmatpush.msrb.mxu3 %v6880_v18  ;;  %v3071_v29 = vld [vmem:[#allocation2 + $0x20] sm:$0x3] }
 0x89b   : > { %3598 = vmatpush.msrb.mxu0 %v6885_v55  ;;  %3618 = vmatpush.msrb.mxu1 %v7846_v46 }
 0x89c   : > { %3638 = vmatpush.msrb.mxu2 %v6891_v33  ;;  %3658 = vmatpush.msrb.mxu3 %v6896_v27 }
 0x89d   : > { %3599 = vmatpush.msrb.mxu0 %v7847_v51  ;;  %3619 = vmatpush.msrb.mxu1 %v7848_v36  ;;  %v3293_v51 = vld [vmem:[#allocation2] sm:$0xc0] }
 0x89e   : > { %3639 = vmatpush.msrb.mxu2 %v7849_v22  ;;  %3659 = vmatpush.msrb.mxu3 %v7850_v17 }
 0x89f   : > { %3600 = vmatpush.msrb.mxu0 %v6917_v38  ;;  %3620 = vmatpush.msrb.mxu1 %v6920_v39 }
 0x8a0   : > { %3640 = vmatpush.msrb.mxu2 %v6923_v35  ;;  %3660 = vmatpush.msrb.mxu3 %v6928_v41  ;;  %v3072_v35 = vld [vmem:[#allocation2 + $0x28] sm:$0x3] }
 0x8a1   : > { %3601 = vmatpush.msrb.mxu0 %v6933_v42  ;;  %3621 = vmatpush.msrb.mxu1 %v6936_v47 }
 0x8a2   : > { %3641 = vmatpush.msrb.mxu2 %v6939_v48  ;;  %3661 = vmatpush.msrb.mxu3 %v6944_v57 }
 0x8a3   : > { %3602 = vmatpush.msrb.mxu0 %v6949_v60  ;;  %3622 = vmatpush.msrb.mxu1 %v6952_v61 }
 0x8a4   : > { %3642 = vmatpush.msrb.mxu2 %v6955_v62  ;;  %3662 = vmatpush.msrb.mxu3 %v6960_v63  ;;  %v3073_v62 = vld [vmem:[#allocation2 + $0x38] sm:$0x3] }
 0x8a5   : > { %3603 = vmatpush.msrb.mxu0 %v6965_v8  ;;  %3623 = vmatpush.msrb.mxu1 %v6968_v9 }
 0x8a6   : > { %3643 = vmatpush.msrb.mxu2 %v6971_v10  ;;  %3663 = vmatpush.msrb.mxu3 %v6976_v43 }
 0x8a7   : > { %3604 = vmatpush.msrb.mxu0 %v6981_v20  ;;  %3624 = vmatpush.msrb.mxu1 %v6984_v21 }
 0x8a8   : > { %3644 = vmatpush.msrb.mxu2 %v6989_v28  ;;  %3664 = vmatpush.msrb.mxu3 %v6992_v11 }
 0x8a9   : > { %3605 = vmatpush.msrb.mxu0 %v6995_v3  ;;  %3625 = vmatpush.msrb.mxu1 %v7000_v15 }
 0x8aa   : > { %3645 = vmatpush.msrb.mxu2 %v7003_v12  ;;  %3665 = vmatpush.msrb.mxu3 %v7006_v6 }
 0x8ab   : > { %3606 = vmatpush.msrb.mxu0 %v7831_v59  ;;  %3626 = vmatpush.msrb.mxu1 %v7832_v49  ;;  %v3284_v49 = vrot.slane %v7137_v37, 2 }
 0x8ac   : > { %3646 = vmatpush.msrb.mxu2 %v7833_v0  ;;  %3666 = vmatpush.msrb.mxu3 %v7834_v14 }
 0x8ad   : > { %3607 = vmatpush.msrb.mxu0 %v7835_v58  ;;  %3627 = vmatpush.msrb.mxu1 %v7836_v40 }
 0x8ae   : > { %3647 = vmatpush.msrb.mxu2 %v7837_v19  ;;  %3667 = vmatpush.msrb.mxu3 %v7036_v4 }
 0x8af   : > { %3608 = vmatpush.msrb.mxu0 %v7041_v7  ;;  %3628 = vmatpush.msrb.mxu1 %v7044_v13 }
 0x8b0   : > { %3648 = vmatpush.msrb.mxu2 %v7049_v16  ;;  %3668 = vmatpush.msrb.mxu3 %v7052_v26 }
 0x8b1   : > { %3609 = vmatpush.msrb.mxu0 %v7057_v50  ;;  %3629 = vmatpush.msrb.mxu1 %v7838_v2 }
 0x8b2   : > { %3649 = vmatpush.msrb.mxu2 %v7067_v53  ;;  %3669 = vmatpush.msrb.mxu3 %v7070_v52 }
 0x90e   : > { %v3158_v18 = vpop.f32.mrf.mxu0  ;;  %v3178_v55 = vpop.f32.mrf.mxu1 }
 0x90f   : > { %v3221_v33 = vadd.f32 %v3158_v18, %v3070_v23  ;;  %v3222_v27 = vadd.f32 %v3178_v55, %v3071_v29 }
 0x911   : > { %v4451_v38 = vmul.f32 -1.442695, %v3221_v33  ;;  %v4452_v39 = vmul.f32 -1.442695, %v3222_v27  ;;  %v3294_v33 = vld [vmem:[#allocation2 + $0x18] sm:$0xc0] }
 0x913   : > { %4739 = vpow2.f32 %v4451_v38 }
 0x914   : > { %4741 = vpow2.f32 %v4452_v39 }
 0x915   : > { %v3198_v41 = vpop.f32.mrf.mxu2  ;;  %v3218_v63 = vpop.f32.mrf.mxu3 }
 0x916   : > { %v3223_v42 = vadd.f32 %v3198_v41, %v3072_v35  ;;  %v3224_v43 = vadd.f32 %v3218_v63, %v3073_v62 }
 0x918   : > { %v4453_v47 = vmul.f32 -1.442695, %v3223_v42 }
 0x919   : > { %v4740_v48 = vpop.eup %4739 }
 0x91a   : > { %v4742_v57 = vpop.eup %4741  ;;  %v3234_v60 = vadd.f32 1.0, %v4740_v48  ;;  %4743 = vpow2.f32 %v4453_v47 }
 0x91b   : > { %v3235_v61 = vadd.f32 1.0, %v4742_v57 }
 0x91c   : > { %4745 = vrcp.f32 %v3234_v60  ;;  %v3248_v15 = vand.u32 2147483648, %v3234_v60  ;;  %v3246_v50 = vand.u32 2147483647, %v3234_v60  ;;  %vm3242_vm7 = vweird.f32 %v3234_v60 }
 0x91d   : > { %4747 = vrcp.f32 %v3235_v61  ;;  %v3263_v12 = vand.u32 2147483648, %v3235_v61  ;;  %v3261_v53 = vand.u32 2147483647, %v3235_v61  ;;  %vm3257_vm8 = vweird.f32 %v3235_v61 }
 0x91e   : > { %v3249_v16 = vor.u32 1.1754944e-38, %v3248_v15  ;;  %vm3247_vm11 = vcmp.eq.f32.partialorder %v3246_v50, 8.507059e+37 }
 0x91f   : > { %v3264_v34 = vor.u32 1.1754944e-38, %v3263_v12  ;;  %vm3262_vm12 = vcmp.eq.f32.partialorder %v3261_v53, 8.507059e+37 }
 0x920   : > { %v4744_v8 = vpop.eup %4743 }
 0x921   : > { %v3236_v9 = vadd.f32 1.0, %v4744_v8 }
 0x922   : > { %v4746_v10 = vpop.eup %4745 }
 0x923   : > { %v4748_v20 = vpop.eup %4747  ;;  %v3238_v21 = vmul.f32 %v4746_v10, %v3234_v60  ;;  %4749 = vrcp.f32 %v3236_v9  ;;  %vm3243_vm5 = vweird.f32 %v4746_v10  ;;  %v3278_v32 = vand.u32 2147483648, %v3236_v9 }
 0x924   : > { %v3253_v28 = vmul.f32 %v4748_v20, %v3235_v61  ;;  %4751 = vtanh.f32 %v3224_v43  ;;  %vm3258_vm6 = vweird.f32 %v4748_v20  ;;  %vm3244_vm9 = vmor %vm3242_vm7, %vm3243_vm5  ;;  %vm3272_vm14 = vweird.f32 %v3236_v9  ;;  %v3295_v61 = vld [vmem:[#allocation2 + $0x10] sm:$0xc0] }
 0x925   : > { %v3239_v11 = vsub.f32 1.0, %v3238_v21  ;;  %vm3259_vm10 = vmor %vm3257_vm8, %vm3258_vm6  ;;  %v3276_v24 = vand.u32 2147483647, %v3236_v9  ;;  %v3279_v54 = vor.u32 1.1754944e-38, %v3278_v32 }
 0x926   : > { %v3254_v3 = vsub.f32 1.0, %v3253_v28 }
 0x927   : > { %v3240_v6 = vmul.f32 %v4746_v10, %v3239_v11  ;;  %vm3277_vm0 = vcmp.eq.f32.partialorder %v3276_v24, 8.507059e+37 }
 0x928   : > { %v3255_v52 = vmul.f32 %v4748_v20, %v3254_v3 }
 0x929   : > { %v4750_v4 = vpop.eup %4749  ;;  %v3241_v7 = vadd.f32 %v4746_v10, %v3240_v6 }
 0x92a   : > { %v3268_v13 = vmul.f32 %v4750_v4, %v3236_v9  ;;  %v3256_v26 = vadd.f32 %v4748_v20, %v3255_v52  ;;  %v4752_v0 = vpop.eup %4751  ;;  %vm3273_vm13 = vweird.f32 %v4750_v4 }
 0x92b   : > { %v3245_v59 = vsel %vm3244_vm9, %v4746_v10, %v3241_v7  ;;  %vm3274_vm15 = vmor %vm3272_vm14, %vm3273_vm13 }
 0x92c   : > { %v3269_v14 = vsub.f32 1.0, %v3268_v13  ;;  %v3250_v5 = vsel %vm3247_vm11, %v3249_v16, %v3245_v59  ;;  %v3260_v30 = vsel %vm3259_vm10, %v4748_v20, %v3256_v26 }
 0x92d   : > { %v3265_v58 = vsel %vm3262_vm12, %v3264_v34, %v3260_v30  ;;  %v3287_v40 = vmul.f32 %v4752_v0, %v3250_v5 }
 0x92e   : > { %v3270_v44 = vmul.f32 %v4750_v4, %v3269_v14  ;;  %v3286_v19 = vmul.f32 %v3284_v49, %v3265_v58 }
 0x930   : > { %v7240_v45 = vadd.f32 %v3287_v40, %v3286_v19  ;;  %v3271_v2 = vadd.f32 %v4750_v4, %v3270_v44 }
 0x932   : > { %4753 = vtanh.f32 %v7240_v45  ;;  %v3275_v37 = vsel %vm3274_vm15, %v4750_v4, %v3271_v2  ;;  %v3515_v16 = vrot.slane %v7240_v45, 2 }
 0x933   : > { %v3280_v25 = vsel %vm3277_vm0, %v3279_v54, %v3275_v37 }
 0x938   : > { %v4754_v1 = vpop.eup %4753 }
 0x939   : > { %v3290_v56 = vmul.f32 %v4754_v1, %v3280_v25 }
 0x93b   : > { %3291 = vst [vmem:[%s5239_s27 + $0x8] sm:$0x3] %v3290_v56  ;;  %3376 = vmatmul.f32.vlgmr.msra.gmra.mxu0 %v3290_v56  ;;  %3396 = vmatmul.f32.vlgmr.msra.gmra.mxu1 %v3290_v56 }
 0x93c   : > { %3416 = vmatmul.f32.vlgmr.msra.gmra.mxu2 %v3290_v56  ;;  %3436 = vmatmul.f32.vlgmr.msra.gmra.mxu3 %v3290_v56  ;;  %v7250_v56 = vld [vmem:[%s5202_s6 + $0x1e0] sm:$0xff] }
 0x93d   : > { %3828 = vmatpush.msra.mxu0 %v7250_v56 }
 0x9b8   : > { %v3377_v46 = vpop.f32.mrf.mxu0  ;;  %v3397_v36 = vpop.f32.mrf.mxu1 }
 0x9b9   : > { %v3444_v22 = vrot.slane %v3377_v46, 2  ;;  %v3445_v17 = vrot.slane %v3397_v36, 2  ;;  %v7256_v46 = vld [vmem:[%s5202_s6 + $0x1f0] sm:$0xff]  ;;  %v7266_v36 = vld [vmem:[%s5202_s6 + $0x1c0] sm:$0xff] }
 0x9ba   : > { %3868 = vmatpush.msra.mxu2 %v7256_v46  ;;  %3829 = vmatpush.msra.mxu0 %v7266_v36 }
 0x9bb   : > { %v3452_v23 = vadd.f32 %v3444_v22, %v3292_v31  ;;  %v3453_v29 = vadd.f32 %v3445_v17, %v3293_v51  ;;  %v7253_v31 = vld [vmem:[%s5202_s6 + $0x1e8] sm:$0xff]  ;;  %v7261_v51 = vld [vmem:[%s5202_s6 + $0x1f8] sm:$0xff]  ;;  %v7272_v17 = vld [vmem:[%s5202_s6 + $0x1d0] sm:$0xff] }
 0x9bc   : > { %3848 = vmatpush.msra.mxu1 %v7253_v31  ;;  %3888 = vmatpush.msra.mxu3 %v7261_v51  ;;  %v7269_v22 = vld [vmem:[%s5202_s6 + $0x1c8] sm:$0xff] }
 0x9bd   : > { %v4454_v18 = vmul.f32 -1.442695, %v3452_v23  ;;  %v4455_v55 = vmul.f32 -1.442695, %v3453_v29  ;;  %v7277_v23 = vld [vmem:[%s5202_s6 + $0x1d8] sm:$0xff]  ;;  %3869 = vmatpush.msra.mxu2 %v7272_v17  ;;  %v7282_v29 = vld [vmem:[%s5202_s6 + $0x1a0] sm:$0xff] }
 0x9be   : > { %3849 = vmatpush.msra.mxu1 %v7269_v22  ;;  %3889 = vmatpush.msra.mxu3 %v7277_v23 }
 0x9bf   : > { %4755 = vpow2.f32 %v4454_v18  ;;  %v3417_v27 = vpop.f32.mrf.mxu2  ;;  %v3437_v57 = vpop.f32.mrf.mxu3  ;;  %v7285_v18 = vld [vmem:[%s5202_s6 + $0x1a8] sm:$0xff]  ;;  %3830 = vmatpush.msra.mxu0 %v7282_v29 }
 0x9c0   : > { %4757 = vpow2.f32 %v4455_v55  ;;  %v3446_v38 = vrot.slane %v3417_v27, 2  ;;  %v3447_v60 = vrot.slane %v3437_v57, 2  ;;  %v7288_v55 = vld [vmem:[%s5202_s6 + $0x1b0] sm:$0xff]  ;;  %3850 = vmatpush.msra.mxu1 %v7285_v18  ;;  %v7298_v27 = vld [vmem:[%s5202_s6 + $0x180] sm:$0xff] }
 0x9c1   : > { %3870 = vmatpush.msra.mxu2 %v7288_v55  ;;  %3831 = vmatpush.msra.mxu0 %v7298_v27  ;;  %v7330_v57 = vld [vmem:[%s5202_s6 + $0x140] sm:$0xff] }
 0x9c2   : > { %v3454_v39 = vadd.f32 %v3446_v38, %v3294_v33  ;;  %v3455_v9 = vadd.f32 %v3447_v60, %v3295_v61  ;;  %v7293_v33 = vld [vmem:[%s5202_s6 + $0x1b8] sm:$0xff]  ;;  %v7301_v38 = vld [vmem:[%s5202_s6 + $0x188] sm:$0xff]  ;;  %v7336_v61 = vld [vmem:[%s5202_s6 + $0x150] sm:$0xff] }
 0x9c3   : > { %3890 = vmatpush.msra.mxu3 %v7293_v33  ;;  %3851 = vmatpush.msra.mxu1 %v7301_v38  ;;  %v7333_v60 = vld [vmem:[%s5202_s6 + $0x148] sm:$0xff] }
 0x9c4   : > { %v4456_v35 = vmul.f32 -1.442695, %v3454_v39  ;;  %v7304_v39 = vld [vmem:[%s5202_s6 + $0x190] sm:$0xff] }
 0x9c5   : > { %v4756_v41 = vpop.eup %4755  ;;  %3871 = vmatpush.msra.mxu2 %v7304_v39 }
 0x9c6   : > { %v4758_v42 = vpop.eup %4757  ;;  %v3465_v47 = vadd.f32 1.0, %v4756_v41  ;;  %4759 = vpow2.f32 %v4456_v35  ;;  %v7309_v35 = vld [vmem:[%s5202_s6 + $0x198] sm:$0xff]  ;;  %v7314_v41 = vld [vmem:[%s5202_s6 + $0x160] sm:$0xff] }
 0x9c7   : > { %v3466_v48 = vadd.f32 1.0, %v4758_v42  ;;  %3891 = vmatpush.msra.mxu3 %v7309_v35  ;;  %v7317_v42 = vld [vmem:[%s5202_s6 + $0x168] sm:$0xff]  ;;  %3832 = vmatpush.msra.mxu0 %v7314_v41 }
 0x9c8   : > { %4761 = vrcp.f32 %v3465_v47  ;;  %v3479_v11 = vand.u32 2147483648, %v3465_v47  ;;  %v3477_v12 = vand.u32 2147483647, %v3465_v47  ;;  %vm3473_vm3 = vweird.f32 %v3465_v47  ;;  %3852 = vmatpush.msra.mxu1 %v7317_v42 }
 0x9c9   : > { %4763 = vrcp.f32 %v3466_v48  ;;  %v3494_v3 = vand.u32 2147483648, %v3466_v48  ;;  %v3492_v50 = vand.u32 2147483647, %v3466_v48  ;;  %vm3488_vm4 = vweird.f32 %v3466_v48  ;;  %3833 = vmatpush.msra.mxu0 %v7330_v57 }
 0x9ca   : > { %v3480_v7 = vor.u32 1.1754944e-38, %v3479_v11  ;;  %vm3478_vm7 = vcmp.eq.f32.partialorder %v3477_v12, 8.507059e+37  ;;  %3853 = vmatpush.msra.mxu1 %v7333_v60  ;;  %v7373_v12 = vld [vmem:[%s5202_s6 + $0x118] sm:$0xff] }
 0x9cb   : > { %v3495_v26 = vor.u32 1.1754944e-38, %v3494_v3  ;;  %vm3493_vm8 = vcmp.eq.f32.partialorder %v3492_v50, 8.507059e+37  ;;  %v3524_v3 = vld [vmem:[#allocation2] sm:$0x30] }
 0x9cc   : > { %v4760_v62 = vpop.eup %4759 }
 0x9cd   : > { %v3467_v63 = vadd.f32 1.0, %v4760_v62  ;;  %v7341_v62 = vld [vmem:[%s5202_s6 + $0x158] sm:$0xff] }
 0x9ce   : > { %v4762_v8 = vpop.eup %4761 }
 0x9cf   : > { %v4764_v10 = vpop.eup %4763  ;;  %v3469_v43 = vmul.f32 %v4762_v8, %v3465_v47  ;;  %4765 = vrcp.f32 %v3467_v63  ;;  %vm3474_vm1 = vweird.f32 %v4762_v8  ;;  %v3509_v45 = vand.u32 2147483648, %v3467_v63  ;;  %v7320_v47 = vld [vmem:[%s5202_s6 + $0x170] sm:$0xff] }
 0x9d0   : > { %v3484_v20 = vmul.f32 %v4764_v10, %v3466_v48  ;;  %4767 = vtanh.f32 %v3455_v9  ;;  %vm3489_vm2 = vweird.f32 %v4764_v10  ;;  %vm3475_vm5 = vmor %vm3473_vm3, %vm3474_vm1  ;;  %vm3503_vm10 = vweird.f32 %v3467_v63  ;;  %v7325_v48 = vld [vmem:[%s5202_s6 + $0x178] sm:$0xff]  ;;  %3872 = vmatpush.msra.mxu2 %v7320_v47  ;;  %v7352_v9 = vld [vmem:[%s5202_s6 + $0x130] sm:$0xff] }
 0x9d1   : > { %v3470_v21 = vsub.f32 1.0, %v3469_v43  ;;  %vm3490_vm6 = vmor %vm3488_vm4, %vm3489_vm2  ;;  %v3507_v2 = vand.u32 2147483647, %v3467_v63  ;;  %v3510_v24 = vor.u32 1.1754944e-38, %v3509_v45  ;;  %3892 = vmatpush.msra.mxu3 %v7325_v48  ;;  %v7362_v43 = vld [vmem:[%s5202_s6 + $0x100] sm:$0xff] }
 0x9d2   : > { %v3485_v28 = vsub.f32 1.0, %v3484_v20  ;;  %3873 = vmatpush.msra.mxu2 %v7336_v61  ;;  %v7365_v20 = vld [vmem:[%s5202_s6 + $0x108] sm:$0xff]  ;;  %v7424_v45 = vld [vmem:[%s5202_s6 + $0x80] sm:$0xff] }
 0x9d3   : > { %v3471_v15 = vmul.f32 %v4762_v8, %v3470_v21  ;;  %vm3508_vm12 = vcmp.eq.f32.partialorder %v3507_v2, 8.507059e+37  ;;  %3893 = vmatpush.msra.mxu3 %v7341_v62  ;;  %v7368_v21 = vld [vmem:[%s5202_s6 + $0x110] sm:$0xff] }
 0x9d4   : > { %v3486_v6 = vmul.f32 %v4764_v10, %v3485_v28  ;;  %3874 = vmatpush.msra.mxu2 %v7352_v9  ;;  %v3523_v28 = vld [vmem:[#allocation2 + $0x30] sm:$0x30] }
 0x9d5   : > { %v4766_v52 = vpop.eup %4765  ;;  %v3472_v53 = vadd.f32 %v4762_v8, %v3471_v15 }
 0x9d6   : > { %v3499_v4 = vmul.f32 %v4766_v52, %v3467_v63  ;;  %v3487_v13 = vadd.f32 %v4764_v10, %v3486_v6  ;;  %v4768_v59 = vpop.eup %4767  ;;  %vm3504_vm9 = vweird.f32 %v4766_v52  ;;  %v7346_v63 = vld [vmem:[%s5202_s6 + $0x120] sm:$0xff]  ;;  %3875 = vmatpush.msra.mxu2 %v7368_v21 }
 0x9d7   : > { %v3476_v34 = vsel %vm3475_vm5, %v4762_v8, %v3472_v53  ;;  %vm3505_vm11 = vmor %vm3503_vm10, %vm3504_vm9  ;;  %v7349_v8 = vld [vmem:[%s5202_s6 + $0x128] sm:$0xff]  ;;  %3834 = vmatpush.msra.mxu0 %v7346_v63 }
 0x9d8   : > { %v3500_v49 = vsub.f32 1.0, %v3499_v4  ;;  %v3481_v0 = vsel %vm3478_vm7, %v3480_v7, %v3476_v34  ;;  %v3491_v14 = vsel %vm3490_vm6, %v4764_v10, %v3487_v13  ;;  %3854 = vmatpush.msra.mxu1 %v7349_v8  ;;  %v7357_v10 = vld [vmem:[%s5202_s6 + $0x138] sm:$0xff]  ;;  %v7381_v53 = vld [vmem:[%s5202_s6 + $0xe8] sm:$0xff]  ;;  %v7384_v4 = vld [vmem:[%s5202_s6 + $0xf0] sm:$0xff] }
 0x9d9   : > { %v3496_v5 = vsel %vm3493_vm8, %v3495_v26, %v3491_v14  ;;  %v3518_v30 = vmul.f32 %v4768_v59, %v3481_v0  ;;  %3894 = vmatpush.msra.mxu3 %v7357_v10  ;;  %3835 = vmatpush.msra.mxu0 %v7362_v43  ;;  %v7389_v7 = vld [vmem:[%s5202_s6 + $0xf8] sm:$0xff]  ;;  %v7394_v26 = vld [vmem:[%s5202_s6 + $0xc0] sm:$0xff]  ;;  %v7397_v34 = vld [vmem:[%s5202_s6 + $0xc8] sm:$0xff] }
 0x9da   : > { %v3517_v58 = vmul.f32 %v3515_v16, %v3496_v5  ;;  %v3501_v40 = vmul.f32 %v4766_v52, %v3500_v49  ;;  %3855 = vmatpush.msra.mxu1 %v7365_v20  ;;  %3876 = vmatpush.msra.mxu2 %v7384_v4  ;;  %v7400_v59 = vld [vmem:[%s5202_s6 + $0xd0] sm:$0xff]  ;;  %v7405_v49 = vld [vmem:[%s5202_s6 + $0xd8] sm:$0xff] }
 0x9db   : > { %3895 = vmatpush.msra.mxu3 %v7373_v12  ;;  %v3525_v5 = vld [vmem:[#allocation2 + $0x18] sm:$0x30] }
 0x9dc   : > { %v7245_v44 = vadd.f32 %v3518_v30, %v3517_v58  ;;  %v3502_v19 = vadd.f32 %v4766_v52, %v3501_v40  ;;  %3856 = vmatpush.msra.mxu1 %v7381_v53  ;;  %3877 = vmatpush.msra.mxu2 %v7400_v59  ;;  %v7410_v30 = vld [vmem:[%s5202_s6 + $0xa0] sm:$0xff]  ;;  %v7413_v58 = vld [vmem:[%s5202_s6 + $0xa8] sm:$0xff]  ;;  %v7418_v40 = vld [vmem:[%s5202_s6 + $0xb0] sm:$0xff] }
 0x9dd   : > { %3896 = vmatpush.msra.mxu3 %v7389_v7 }
 0x9de   : > { %4769 = vtanh.f32 %v7245_v44  ;;  %v3506_v32 = vsel %vm3505_vm11, %v4766_v52, %v3502_v19  ;;  %v7378_v52 = vld [vmem:[%s5202_s6 + $0xe0] sm:$0xff]  ;;  %3857 = vmatpush.msra.mxu1 %v7397_v34  ;;  %v7421_v19 = vld [vmem:[%s5202_s6 + $0xb8] sm:$0xff]  ;;  %3878 = vmatpush.msra.mxu2 %v7418_v40 }
 0x9df   : > { %v3511_v54 = vsel %vm3508_vm12, %v3510_v24, %v3506_v32  ;;  %3836 = vmatpush.msra.mxu0 %v7378_v52  ;;  %3897 = vmatpush.msra.mxu3 %v7405_v49  ;;  %v7429_v32 = vld [vmem:[%s5202_s6 + $0x88] sm:$0xff]  ;;  %v7432_v24 = vld [vmem:[%s5202_s6 + $0x90] sm:$0xff] }
 0x9e0   : > { %3858 = vmatpush.msra.mxu1 %v7413_v58  ;;  %3879 = vmatpush.msra.mxu2 %v7432_v24 }
 0x9e1   : > { %3837 = vmatpush.msra.mxu0 %v7394_v26  ;;  %3898 = vmatpush.msra.mxu3 %v7421_v19 }
 0x9e2   : > { %3859 = vmatpush.msra.mxu1 %v7429_v32 }
 0x9e3   : > { %3838 = vmatpush.msra.mxu0 %v7410_v30 }
 0x9e4   : > { %v4770_v37 = vpop.eup %4769 }
 0x9e5   : > { %v3521_v1 = vmul.f32 %v4770_v37, %v3511_v54  ;;  %v7435_v37 = vld [vmem:[%s5202_s6 + $0x98] sm:$0xff]  ;;  %3839 = vmatpush.msra.mxu0 %v7424_v45 }
 0x9e6   : > { %3899 = vmatpush.msra.mxu3 %v7435_v37 }
 0x9e7   : > { %3522 = vst [vmem:[%s5239_s27] sm:$0xc0] %v3521_v1  ;;  %v3592_v25 = vrot.slane %v3521_v1, 6  ;;  %v7440_v1 = vld [vmem:[%s5202_s6 + $0x60] sm:$0xff] }
 0x9e8   : > { %7851 = vst [vmem:[#allocation56_spill] sm:$0xff] %v7440_v1  ;;  %3840 = vmatpush.msra.mxu0 %v7440_v1 }
 0x9e9   : > { %3610 = vmatmul.f32.vlgmr.msrb.gmra.mxu0 %v3592_v25  ;;  %3630 = vmatmul.f32.vlgmr.msrb.gmra.mxu1 %v3592_v25 }
 0x9ea   : > { %3650 = vmatmul.f32.vlgmr.msrb.gmra.mxu2 %v3592_v25  ;;  %3670 = vmatmul.f32.vlgmr.msrb.gmra.mxu3 %v3592_v25  ;;  %v7443_v25 = vld [vmem:[%s5202_s6 + $0x68] sm:$0xff] }
 0x9eb   : > { %7852 = vst [vmem:[#allocation57_spill] sm:$0xff] %v7443_v25  ;;  %3860 = vmatpush.msra.mxu1 %v7443_v25 }
 0xa66   : > { %v3611_v11 = vpop.f32.mrf.mxu0  ;;  %v3631_v15 = vpop.f32.mrf.mxu1 }
 0xa67   : > { %v3678_v6 = vrot.slane %v3611_v11, 4  ;;  %v3679_v50 = vrot.slane %v3631_v15, 4  ;;  %v7451_v11 = vld [vmem:[%s5202_s6 + $0x78] sm:$0xff]  ;;  %v7457_v15 = vld [vmem:[%s5202_s6 + $0x48] sm:$0xff] }
 0xa68   : > { %7854 = vst [vmem:[#allocation59_spill] sm:$0xff] %v7451_v11  ;;  %3900 = vmatpush.msra.mxu3 %v7451_v11  ;;  %3861 = vmatpush.msra.mxu1 %v7457_v15  ;;  %v7486_v11 = vld [vmem:[%s5202_s6] sm:$0xff] }
 0xa69   : > { %v3686_v13 = vadd.f32 %v3678_v6, %v3523_v28  ;;  %v3687_v16 = vadd.f32 %v3679_v50, %v3524_v3  ;;  %v7446_v28 = vld [vmem:[%s5202_s6 + $0x70] sm:$0xff]  ;;  %v7454_v3 = vld [vmem:[%s5202_s6 + $0x40] sm:$0xff]  ;;  %7856 = vst [vmem:[#allocation61_spill] sm:$0xff] %v7457_v15 }
 0xa6a   : > { %7853 = vst [vmem:[#allocation58_spill] sm:$0xff] %v7446_v28  ;;  %v7462_v50 = vld [vmem:[%s5202_s6 + $0x50] sm:$0xff]  ;;  %3880 = vmatpush.msra.mxu2 %v7446_v28  ;;  %3841 = vmatpush.msra.mxu0 %v7454_v3  ;;  %v7489_v28 = vld [vmem:[%s5202_s6 + $0x8] sm:$0xff] }
 0xa6b   : > { %v4457_v0 = vmul.f32 -1.442695, %v3686_v13  ;;  %v4458_v14 = vmul.f32 -1.442695, %v3687_v16  ;;  %7855 = vst [vmem:[#allocation60_spill] sm:$0xff] %v7454_v3  ;;  %v7465_v13 = vld [vmem:[%s5202_s6 + $0x58] sm:$0xff] }
 0xa6c   : > { %7857 = vst [vmem:[#allocation62_spill] sm:$0xff] %v7462_v50  ;;  %v7470_v16 = vld [vmem:[%s5202_s6 + $0x20] sm:$0xff]  ;;  %3881 = vmatpush.msra.mxu2 %v7462_v50  ;;  %3901 = vmatpush.msra.mxu3 %v7465_v13  ;;  %v7496_v15 = vld [vmem:[%s5202_s6 + $0x10] sm:$0xff]  ;;  %v7499_v3 = vld [vmem:[%s5202_s6 + $0x18] sm:$0xff] }
 0xa6d   : > { %4771 = vpow2.f32 %v4457_v0  ;;  %v3651_v2 = vpop.f32.mrf.mxu2  ;;  %v7473_v0 = vld [vmem:[%s5202_s6 + $0x28] sm:$0xff]  ;;  %7858 = vst [vmem:[#allocation63_spill] sm:$0xff] %v7489_v28  ;;  %3842 = vmatpush.msra.mxu0 %v7470_v16  ;;  %v3671_v50 = vpop.f32.mrf.mxu3 }
 0xa6e   : > { %4773 = vpow2.f32 %v4458_v14  ;;  %v3680_v54 = vrot.slane %v3651_v2, 4  ;;  %v7481_v2 = vld [vmem:[%s5202_s6 + $0x38] sm:$0xff]  ;;  %3862 = vmatpush.msra.mxu1 %v7473_v0 }
 0xa6f   : > { %3902 = vmatpush.msra.mxu3 %v7481_v2  ;;  %3843 = vmatpush.msra.mxu0 %v7486_v11 }
 0xa70   : > { %v3688_v6 = vadd.f32 %v3680_v54, %v3525_v5  ;;  %v7478_v5 = vld [vmem:[%s5202_s6 + $0x30] sm:$0xff]  ;;  %3863 = vmatpush.msra.mxu1 %v7489_v28 }
 0xa71   : > { %3882 = vmatpush.msra.mxu2 %v7478_v5  ;;  %3903 = vmatpush.msra.mxu3 %v7499_v3 }
 0xa72   : > { %v4459_v14 = vmul.f32 -1.442695, %v3688_v6  ;;  %4062 = vmatpush.msrb.mxu0 %v7250_v56  ;;  %4082 = vmatpush.msrb.mxu1 %v7253_v31 }
 0xa73   : > { %v4772_v54 = vpop.eup %4771  ;;  %3883 = vmatpush.msra.mxu2 %v7496_v15  ;;  %4122 = vmatpush.msrb.mxu3 %v7261_v51 }
 0xa74   : > { %v4774_v25 = vpop.eup %4773  ;;  %v7491_v6 = vadd.f32 1.0, %v4772_v54  ;;  %4775 = vpow2.f32 %v4459_v14  ;;  %v3681_v14 = vrot.slane %v3671_v50, 4  ;;  %4063 = vmatpush.msrb.mxu0 %v7266_v36  ;;  %4083 = vmatpush.msrb.mxu1 %v7269_v22 }
 0xa75   : > { %v7501_v1 = vadd.f32 1.0, %v4774_v25  ;;  %v3526_v25 = vld [vmem:[#allocation2 + $0x10] sm:$0x30]  ;;  %4102 = vmatpush.msrb.mxu2 %v7256_v46  ;;  %4123 = vmatpush.msrb.mxu3 %v7277_v23 }
 0xa76   : > { %4777 = vrcp.f32 %v7491_v6  ;;  %v3689_v56 = vadd.f32 %v3681_v14, %v3526_v25  ;;  %4064 = vmatpush.msrb.mxu0 %v7282_v29  ;;  %4084 = vmatpush.msrb.mxu1 %v7285_v18  ;;  %v3711_v18 = vand.u32 2147483647, %v7491_v6  ;;  %vm3707_vm15 = vweird.f32 %v7491_v6 }
 0xa77   : > { %4779 = vrcp.f32 %v7501_v1  ;;  %4103 = vmatpush.msrb.mxu2 %v7272_v17  ;;  %4124 = vmatpush.msrb.mxu3 %v7293_v33  ;;  %v3713_v17 = vand.u32 2147483648, %v7491_v6  ;;  %v3728_v23 = vand.u32 2147483648, %v7501_v1  ;;  %v3726_v33 = vand.u32 2147483647, %v7501_v1 }
 0xa78   : > { %4065 = vmatpush.msrb.mxu0 %v7298_v27  ;;  %4085 = vmatpush.msrb.mxu1 %v7301_v38  ;;  %vm3722_vm0 = vweird.f32 %v7501_v1  ;;  %vm3712_vm3 = vcmp.eq.f32.partialorder %v3711_v18, 8.507059e+37 }
 0xa79   : > { %4104 = vmatpush.msrb.mxu2 %v7288_v55  ;;  %4125 = vmatpush.msrb.mxu3 %v7309_v35  ;;  %v3714_v35 = vor.u32 1.1754944e-38, %v3713_v17  ;;  %vm3727_vm4 = vcmp.eq.f32.partialorder %v3726_v33, 8.507059e+37 }
 0xa7a   : > { %v4776_v54 = vpop.eup %4775  ;;  %4066 = vmatpush.msrb.mxu0 %v7314_v41  ;;  %4086 = vmatpush.msrb.mxu1 %v7317_v42  ;;  %v3749_v42 = vrot.slane %v7245_v44, 2 }
 0xa7b   : > { %v7517_v28 = vadd.f32 1.0, %v4776_v54  ;;  %4105 = vmatpush.msrb.mxu2 %v7304_v39  ;;  %4126 = vmatpush.msrb.mxu3 %v7325_v48 }
 0xa7c   : > { %v4778_v50 = vpop.eup %4777  ;;  %4067 = vmatpush.msrb.mxu0 %v7330_v57  ;;  %4087 = vmatpush.msrb.mxu1 %v7333_v60 }
 0xa7d   : > { %v4780_v31 = vpop.eup %4779  ;;  %v3703_v46 = vmul.f32 %v4778_v50, %v7491_v6  ;;  %4781 = vrcp.f32 %v7517_v28  ;;  %vm3708_vm13 = vweird.f32 %v4778_v50  ;;  %4106 = vmatpush.msrb.mxu2 %v7320_v47  ;;  %4127 = vmatpush.msrb.mxu3 %v7341_v62  ;;  %v3729_v47 = vor.u32 1.1754944e-38, %v3728_v23 }
 0xa7e   : > { %v3718_v51 = vmul.f32 %v4780_v31, %v7501_v1  ;;  %4783 = vtanh.f32 %v3689_v56  ;;  %vm3723_vm14 = vweird.f32 %v4780_v31  ;;  %vm3709_vm1 = vmor %vm3707_vm15, %vm3708_vm13  ;;  %4068 = vmatpush.msrb.mxu0 %v7346_v63  ;;  %4088 = vmatpush.msrb.mxu1 %v7349_v8  ;;  %vm3737_vm6 = vweird.f32 %v7517_v28 }
 0xa7f   : > { %v3704_v36 = vsub.f32 1.0, %v3703_v46  ;;  %4107 = vmatpush.msrb.mxu2 %v7336_v61  ;;  %vm3724_vm2 = vmor %vm3722_vm0, %vm3723_vm14  ;;  %4128 = vmatpush.msrb.mxu3 %v7357_v10 }
 0xa80   : > { %v3719_v22 = vsub.f32 1.0, %v3718_v51  ;;  %4069 = vmatpush.msrb.mxu0 %v7362_v43  ;;  %4089 = vmatpush.msrb.mxu1 %v7365_v20  ;;  %v3743_v20 = vand.u32 2147483648, %v7517_v28  ;;  %v3760_v51 = vld [vmem:[#allocation2 + $0x10] sm:$0xc] }
 0xa81   : > { %v3705_v29 = vmul.f32 %v4778_v50, %v3704_v36  ;;  %4108 = vmatpush.msrb.mxu2 %v7352_v9  ;;  %4129 = vmatpush.msrb.mxu3 %v7373_v12 }
 0xa82   : > { %v3720_v55 = vmul.f32 %v4780_v31, %v3719_v22  ;;  %4070 = vmatpush.msrb.mxu0 %v7378_v52  ;;  %4090 = vmatpush.msrb.mxu1 %v7381_v53  ;;  %v3744_v52 = vor.u32 1.1754944e-38, %v3743_v20  ;;  %v7859_v53 = vld [vmem:[#allocation56_spill] sm:$0xff] }
 0xa83   : > { %v7542_v27 = vpop.eup %4781  ;;  %v3706_v38 = vadd.f32 %v4778_v50, %v3705_v29  ;;  %4109 = vmatpush.msrb.mxu2 %v7368_v21  ;;  %4130 = vmatpush.msrb.mxu3 %v7389_v7  ;;  %v3741_v21 = vand.u32 2147483647, %v7517_v28  ;;  %v7861_v7 = vld [vmem:[#allocation58_spill] sm:$0xff] }
 0xa84   : > { %v3733_v39 = vmul.f32 %v7542_v27, %v7517_v28  ;;  %v3721_v41 = vadd.f32 %v4780_v31, %v3720_v55  ;;  %v4784_v57 = vpop.eup %4783  ;;  %4071 = vmatpush.msrb.mxu0 %v7394_v26  ;;  %4091 = vmatpush.msrb.mxu1 %v7397_v34  ;;  %vm3738_vm5 = vweird.f32 %v7542_v27  ;;  %v7862_v26 = vld [vmem:[#allocation59_spill] sm:$0xff] }
 0xa85   : > { %v3710_v48 = vsel %vm3709_vm1, %v4778_v50, %v3706_v38  ;;  %4110 = vmatpush.msrb.mxu2 %v7384_v4  ;;  %4131 = vmatpush.msrb.mxu3 %v7405_v49  ;;  %vm3739_vm7 = vmor %vm3737_vm6, %vm3738_vm5  ;;  %v7860_v4 = vld [vmem:[#allocation57_spill] sm:$0xff]  ;;  %vm3742_vm8 = vcmp.eq.f32.partialorder %v3741_v21, 8.507059e+37  ;;  %v7863_v49 = vld [vmem:[#allocation60_spill] sm:$0xff] }
 0xa86   : > { %v3734_v60 = vsub.f32 1.0, %v3733_v39  ;;  %v3715_v61 = vsel %vm3712_vm3, %v3714_v35, %v3710_v48  ;;  %v3725_v62 = vsel %vm3724_vm2, %v4780_v31, %v3721_v41  ;;  %4072 = vmatpush.msrb.mxu0 %v7410_v30  ;;  %4092 = vmatpush.msrb.mxu1 %v7413_v58  ;;  %v7864_v30 = vld [vmem:[#allocation61_spill] sm:$0xff] }
 0xa87   : > { %v3730_v63 = vsel %vm3727_vm4, %v3729_v47, %v3725_v62  ;;  %v3752_v44 = vmul.f32 %v4784_v57, %v3715_v61  ;;  %4111 = vmatpush.msrb.mxu2 %v7400_v59  ;;  %4132 = vmatpush.msrb.mxu3 %v7421_v19 }
 0xa88   : > { %v3751_v8 = vmul.f32 %v3749_v42, %v3730_v63  ;;  %v3735_v9 = vmul.f32 %v7542_v27, %v3734_v60  ;;  %4073 = vmatpush.msrb.mxu0 %v7424_v45  ;;  %4093 = vmatpush.msrb.mxu1 %v7429_v32  ;;  %v7866_v45 = vld [vmem:[#allocation63_spill] sm:$0xff]  ;;  %v3757_v32 = vld [vmem:[#allocation2 + $0x30] sm:$0xc] }
 0xa89   : > { %4112 = vmatpush.msrb.mxu2 %v7418_v40  ;;  %4133 = vmatpush.msrb.mxu3 %v7435_v37  ;;  %v7865_v40 = vld [vmem:[#allocation62_spill] sm:$0xff] }
 0xa8a   : > { %v7566_v10 = vadd.f32 %v3752_v44, %v3751_v8  ;;  %v3736_v43 = vadd.f32 %v7542_v27, %v3735_v9  ;;  %4074 = vmatpush.msrb.mxu0 %v7859_v53  ;;  %4094 = vmatpush.msrb.mxu1 %v7860_v4  ;;  %v3758_v37 = vld [vmem:[#allocation2] sm:$0xc] }
 0xa8b   : > { %4113 = vmatpush.msrb.mxu2 %v7432_v24  ;;  %4134 = vmatpush.msrb.mxu3 %v7862_v26 }
 0xa8c   : > { %4785 = vtanh.f32 %v7566_v10  ;;  %v3740_v12 = vsel %vm3739_vm7, %v7542_v27, %v3736_v43  ;;  %4075 = vmatpush.msrb.mxu0 %v7863_v49  ;;  %4095 = vmatpush.msrb.mxu1 %v7864_v30  ;;  %v3983_v63 = vrot.slane %v7566_v10, 2 }
 0xa8d   : > { %4114 = vmatpush.msrb.mxu2 %v7861_v7  ;;  %v3745_v59 = vsel %vm3742_vm8, %v3744_v52, %v3740_v12  ;;  %4135 = vmatpush.msrb.mxu3 %v7465_v13 }
 0xa8e   : > { %4076 = vmatpush.msrb.mxu0 %v7470_v16  ;;  %4096 = vmatpush.msrb.mxu1 %v7473_v0 }
 0xa8f   : > { %4115 = vmatpush.msrb.mxu2 %v7865_v40  ;;  %4136 = vmatpush.msrb.mxu3 %v7481_v2  ;;  %v3759_v2 = vld [vmem:[#allocation2 + $0x18] sm:$0xc] }
 0xa90   : > { %4077 = vmatpush.msrb.mxu0 %v7486_v11  ;;  %4097 = vmatpush.msrb.mxu1 %v7866_v45  ;;  %v3991_v45 = vld [vmem:[#allocation2 + $0x30] sm:$0x3] }
 0xa91   : > { %4116 = vmatpush.msrb.mxu2 %v7478_v5  ;;  %4137 = vmatpush.msrb.mxu3 %v7499_v3 }
 0xa92   : > { %v4786_v34 = vpop.eup %4785 }
 0xa93   : > { %v3755_v58 = vmul.f32 %v4786_v34, %v3745_v59  ;;  %4117 = vmatpush.msrb.mxu2 %v7496_v15 }
 0xa95   : > { %3756 = vst [vmem:[%s5239_s27] sm:$0x30] %v3755_v58  ;;  %v3826_v19 = vrot.slane %v3755_v58, 4 }
 0xa97   : > { %3844 = vmatmul.f32.vlgmr.msra.gmra.mxu0 %v3826_v19  ;;  %3864 = vmatmul.f32.vlgmr.msra.gmra.mxu1 %v3826_v19 }
 0xa98   : > { %3884 = vmatmul.f32.vlgmr.msra.gmra.mxu2 %v3826_v19  ;;  %3904 = vmatmul.f32.vlgmr.msra.gmra.mxu3 %v3826_v19 }
 0xb14   : > { %v3845_v24 = vpop.f32.mrf.mxu0  ;;  %v3865_v1 = vpop.f32.mrf.mxu1 }
 0xb15   : > { %v3912_v28 = vrot.slane %v3845_v24, 6  ;;  %v3913_v13 = vrot.slane %v3865_v1, 6 }
 0xb17   : > { %v3920_v16 = vadd.f32 %v3912_v28, %v3757_v32  ;;  %v3921_v0 = vadd.f32 %v3913_v13, %v3758_v37  ;;  %v3992_v32 = vld [vmem:[#allocation2] sm:$0x3] }
 0xb19   : > { %v4460_v5 = vmul.f32 -1.442695, %v3920_v16  ;;  %v4461_v11 = vmul.f32 -1.442695, %v3921_v0  ;;  %v3993_v0 = vld [vmem:[#allocation2 + $0x18] sm:$0x3] }
 0xb1b   : > { %4787 = vpow2.f32 %v4460_v5  ;;  %v3885_v6 = vpop.f32.mrf.mxu2  ;;  %v3905_v31 = vpop.f32.mrf.mxu3 }
 0xb1c   : > { %4789 = vpow2.f32 %v4461_v11  ;;  %v3914_v14 = vrot.slane %v3885_v6, 6  ;;  %v3915_v46 = vrot.slane %v3905_v31, 6 }
 0xb1e   : > { %v3922_v25 = vadd.f32 %v3914_v14, %v3759_v2  ;;  %v3923_v23 = vadd.f32 %v3915_v46, %v3760_v51 }
 0xb20   : > { %v4462_v54 = vmul.f32 -1.442695, %v3922_v25 }
 0xb21   : > { %v4788_v15 = vpop.eup %4787 }
 0xb22   : > { %v4790_v50 = vpop.eup %4789  ;;  %v3933_v3 = vadd.f32 1.0, %v4788_v15  ;;  %4791 = vpow2.f32 %v4462_v54  ;;  %v3994_v15 = vld [vmem:[#allocation2 + $0x10] sm:$0x3] }
 0xb23   : > { %v3934_v56 = vadd.f32 1.0, %v4790_v50 }
 0xb24   : > { %4793 = vrcp.f32 %v3933_v3  ;;  %v3947_v38 = vand.u32 2147483648, %v3933_v3  ;;  %v3945_v41 = vand.u32 2147483647, %v3933_v3  ;;  %vm3941_vm11 = vweird.f32 %v3933_v3 }
 0xb25   : > { %4795 = vrcp.f32 %v3934_v56  ;;  %v3962_v39 = vand.u32 2147483648, %v3934_v56  ;;  %v3960_v47 = vand.u32 2147483647, %v3934_v56  ;;  %vm3956_vm12 = vweird.f32 %v3934_v56 }
 0xb26   : > { %v3948_v61 = vor.u32 1.1754944e-38, %v3947_v38  ;;  %vm3946_vm15 = vcmp.eq.f32.partialorder %v3945_v41, 8.507059e+37 }
 0xb27   : > { %v3963_v44 = vor.u32 1.1754944e-38, %v3962_v39  ;;  %vm3961_vm0 = vcmp.eq.f32.partialorder %v3960_v47, 8.507059e+37 }
 0xb28   : > { %v4792_v36 = vpop.eup %4791 }
 0xb29   : > { %v3935_v22 = vadd.f32 1.0, %v4792_v36 }
 0xb2a   : > { %v4794_v17 = vpop.eup %4793 }
 0xb2b   : > { %v4796_v29 = vpop.eup %4795  ;;  %v3937_v18 = vmul.f32 %v4794_v17, %v3933_v3  ;;  %4797 = vrcp.f32 %v3935_v22  ;;  %vm3942_vm9 = vweird.f32 %v4794_v17  ;;  %v3977_v10 = vand.u32 2147483648, %v3935_v22 }
 0xb2c   : > { %v3952_v55 = vmul.f32 %v4796_v29, %v3934_v56  ;;  %4799 = vtanh.f32 %v3923_v23  ;;  %vm3957_vm10 = vweird.f32 %v4796_v29  ;;  %vm3943_vm13 = vmor %vm3941_vm11, %vm3942_vm9  ;;  %vm3971_vm2 = vweird.f32 %v3935_v22 }
 0xb2d   : > { %v3938_v33 = vsub.f32 1.0, %v3937_v18  ;;  %vm3958_vm14 = vmor %vm3956_vm12, %vm3957_vm10  ;;  %v3975_v34 = vand.u32 2147483647, %v3935_v22  ;;  %v3978_v49 = vor.u32 1.1754944e-38, %v3977_v10 }
 0xb2e   : > { %v3953_v27 = vsub.f32 1.0, %v3952_v55 }
 0xb2f   : > { %v3939_v35 = vmul.f32 %v4794_v17, %v3938_v33  ;;  %vm3976_vm4 = vcmp.eq.f32.partialorder %v3975_v34, 8.507059e+37 }
 0xb30   : > { %v3954_v42 = vmul.f32 %v4796_v29, %v3953_v27 }
 0xb31   : > { %v4798_v48 = vpop.eup %4797  ;;  %v3940_v57 = vadd.f32 %v4794_v17, %v3939_v35 }
 0xb32   : > { %v3967_v60 = vmul.f32 %v4798_v48, %v3935_v22  ;;  %v3955_v62 = vadd.f32 %v4796_v29, %v3954_v42  ;;  %v4800_v9 = vpop.eup %4799  ;;  %vm3972_vm1 = vweird.f32 %v4798_v48 }
 0xb33   : > { %v3944_v8 = vsel %vm3943_vm13, %v4794_v17, %v3940_v57  ;;  %vm3973_vm3 = vmor %vm3971_vm2, %vm3972_vm1 }
 0xb34   : > { %v3968_v43 = vsub.f32 1.0, %v3967_v60  ;;  %v3949_v20 = vsel %vm3946_vm15, %v3948_v61, %v3944_v8  ;;  %v3959_v21 = vsel %vm3958_vm14, %v4796_v29, %v3955_v62 }
 0xb35   : > { %v3964_v12 = vsel %vm3961_vm0, %v3963_v44, %v3959_v21  ;;  %v3986_v52 = vmul.f32 %v4800_v9, %v3949_v20 }
 0xb36   : > { %v3985_v53 = vmul.f32 %v3983_v63, %v3964_v12  ;;  %v3969_v4 = vmul.f32 %v4798_v48, %v3968_v43 }
 0xb38   : > { %v7605_v7 = vadd.f32 %v3986_v52, %v3985_v53  ;;  %v3970_v26 = vadd.f32 %v4798_v48, %v3969_v4 }
 0xb3a   : > { %4801 = vtanh.f32 %v7605_v7  ;;  %v3974_v59 = vsel %vm3973_vm3, %v4798_v48, %v3970_v26  ;;  %v4205_v60 = vrot.slane %v7605_v7, 2 }
 0xb3b   : > { %v3979_v58 = vsel %vm3976_vm4, %v3978_v49, %v3974_v59 }
 0xb40   : > { %v4802_v30 = vpop.eup %4801 }
 0xb41   : > { %v3989_v40 = vmul.f32 %v4802_v30, %v3979_v58 }
 0xb43   : > { %3990 = vst [vmem:[%s5239_s27] sm:$0xc] %v3989_v40  ;;  %v4060_v19 = vrot.slane %v3989_v40, 2 }
 0xb45   : > { %4078 = vmatmul.f32.vlgmr.msrb.gmra.mxu0 %v4060_v19  ;;  %4098 = vmatmul.f32.vlgmr.msrb.gmra.mxu1 %v4060_v19 }
 0xb46   : > { %4118 = vmatmul.f32.vlgmr.msrb.gmra.mxu2 %v4060_v19  ;;  %4138 = vmatmul.f32.vlgmr.msrb.gmra.mxu3 %v4060_v19 }
 0xbc2   : > { %v4079_v24 = vpop.f32.mrf.mxu0  ;;  %v4099_v37 = vpop.f32.mrf.mxu1 }
 0xbc3   : > { %v4142_v1 = vadd.f32 %v4079_v24, %v3991_v45  ;;  %v4143_v28 = vadd.f32 %v4099_v37, %v3992_v32 }
 0xbc5   : > { %v4463_v13 = vmul.f32 -1.442695, %v4142_v1  ;;  %v4464_v16 = vmul.f32 -1.442695, %v4143_v28 }
 0xbc7   : > { %4803 = vpow2.f32 %v4463_v13 }
 0xbc8   : > { %4805 = vpow2.f32 %v4464_v16 }
 0xbc9   : > { %v4119_v5 = vpop.f32.mrf.mxu2  ;;  %v4139_v50 = vpop.f32.mrf.mxu3 }
 0xbca   : > { %v4144_v11 = vadd.f32 %v4119_v5, %v3993_v0  ;;  %v4145_v46 = vadd.f32 %v4139_v50, %v3994_v15 }
 0xbcc   : > { %v4465_v2 = vmul.f32 -1.442695, %v4144_v11 }
 0xbcd   : > { %v4804_v6 = vpop.eup %4803 }
 0xbce   : > { %v4806_v14 = vpop.eup %4805  ;;  %v4155_v25 = vadd.f32 1.0, %v4804_v6  ;;  %4807 = vpow2.f32 %v4465_v2 }
 0xbcf   : > { %v4156_v54 = vadd.f32 1.0, %v4806_v14 }
 0xbd0   : > { %4809 = vrcp.f32 %v4155_v25  ;;  %v4169_v29 = vand.u32 2147483648, %v4155_v25  ;;  %v4167_v33 = vand.u32 2147483647, %v4155_v25  ;;  %vm4163_vm7 = vweird.f32 %v4155_v25 }
 0xbd1   : > { %4811 = vrcp.f32 %v4156_v54  ;;  %v4184_v18 = vand.u32 2147483648, %v4156_v54  ;;  %v4182_v38 = vand.u32 2147483647, %v4156_v54  ;;  %vm4178_vm8 = vweird.f32 %v4156_v54 }
 0xbd2   : > { %v4170_v42 = vor.u32 1.1754944e-38, %v4169_v29  ;;  %vm4168_vm11 = vcmp.eq.f32.partialorder %v4167_v33, 8.507059e+37 }
 0xbd3   : > { %v4185_v48 = vor.u32 1.1754944e-38, %v4184_v18  ;;  %vm4183_vm12 = vcmp.eq.f32.partialorder %v4182_v38, 8.507059e+37 }
 0xbd4   : > { %v4808_v3 = vpop.eup %4807 }
 0xbd5   : > { %v4157_v56 = vadd.f32 1.0, %v4808_v3 }
 0xbd6   : > { %v4810_v31 = vpop.eup %4809 }
 0xbd7   : > { %v4812_v51 = vpop.eup %4811  ;;  %v4159_v36 = vmul.f32 %v4810_v31, %v4155_v25  ;;  %4813 = vrcp.f32 %v4157_v56  ;;  %vm4164_vm5 = vweird.f32 %v4810_v31  ;;  %v4199_v52 = vand.u32 2147483648, %v4157_v56 }
 0xbd8   : > { %v4174_v22 = vmul.f32 %v4812_v51, %v4156_v54  ;;  %4815 = vtanh.f32 %v4145_v46  ;;  %vm4179_vm6 = vweird.f32 %v4812_v51  ;;  %vm4165_vm9 = vmor %vm4163_vm7, %vm4164_vm5  ;;  %vm4193_vm14 = vweird.f32 %v4157_v56 }
 0xbd9   : > { %v4160_v17 = vsub.f32 1.0, %v4159_v36  ;;  %vm4180_vm10 = vmor %vm4178_vm8, %vm4179_vm6  ;;  %v4197_v53 = vand.u32 2147483647, %v4157_v56  ;;  %v4200_v7 = vor.u32 1.1754944e-38, %v4199_v52 }
 0xbda   : > { %v4175_v23 = vsub.f32 1.0, %v4174_v22 }
 0xbdb   : > { %v4161_v55 = vmul.f32 %v4810_v31, %v4160_v17  ;;  %vm4198_vm0 = vcmp.eq.f32.partialorder %v4197_v53, 8.507059e+37 }
 0xbdc   : > { %v4176_v27 = vmul.f32 %v4812_v51, %v4175_v23 }
 0xbdd   : > { %v4814_v39 = vpop.eup %4813  ;;  %v4162_v35 = vadd.f32 %v4810_v31, %v4161_v55 }
 0xbde   : > { %v4189_v41 = vmul.f32 %v4814_v39, %v4157_v56  ;;  %v4177_v47 = vadd.f32 %v4812_v51, %v4176_v27  ;;  %v4816_v61 = vpop.eup %4815  ;;  %vm4194_vm13 = vweird.f32 %v4814_v39 }
 0xbdf   : > { %v4166_v57 = vsel %vm4165_vm9, %v4810_v31, %v4162_v35  ;;  %vm4195_vm15 = vmor %vm4193_vm14, %vm4194_vm13 }
 0xbe0   : > { %v4190_v62 = vsub.f32 1.0, %v4189_v41  ;;  %v4171_v63 = vsel %vm4168_vm11, %v4170_v42, %v4166_v57  ;;  %v4181_v44 = vsel %vm4180_vm10, %v4812_v51, %v4177_v47 }
 0xbe1   : > { %v4186_v8 = vsel %vm4183_vm12, %v4185_v48, %v4181_v44  ;;  %v4208_v9 = vmul.f32 %v4816_v61, %v4171_v63 }
 0xbe2   : > { %v4191_v43 = vmul.f32 %v4814_v39, %v4190_v62  ;;  %v4207_v20 = vmul.f32 %v4205_v60, %v4186_v8 }
 0xbe4   : > { %v4209_v21 = vadd.f32 %v4208_v9, %v4207_v20  ;;  %v4192_v12 = vadd.f32 %v4814_v39, %v4191_v43 }
 0xbe6   : > { %4817 = vtanh.f32 %v4209_v21  ;;  %4214 = vst [vmem:[#allocation4] sm:$0x3] %v4209_v21  ;;  %v4196_v4 = vsel %vm4195_vm15, %v4814_v39, %v4192_v12 }
 0xbe7   : > { %v4201_v10 = vsel %vm4198_vm0, %v4200_v7, %v4196_v4 }
 0xbec   : > { %v4818_v26 = vpop.eup %4817 }
 0xbed   : > { %v4211_v34 = vmul.f32 %v4818_v26, %v4201_v10 }
 0xbef   : > { %4212 = vst [vmem:[%s5239_s27] sm:$0x3] %v4211_v34 }
 0xbf0   : > { %4213 = vst [vmem:[#allocation3] sm:$0x3] %v4211_v34 }
 0xbf1 PF: > { %s4473_s26 = sshll.u32 %s5021_s18, 4  ;;  %s4234_s7 = sshll.u32 %s5239_s27, 4  ;;  %s4235_s7 = int_to_ptr.vmem [resolvable:$true] %s4234_s7 }
 0xbf2   : > { %s4233_s12 = scalar_lea.hbm %s7654_s4, %s4473_s26  ;;  %s4216_s5 = scalar_lea.sflag [#allocation7], %s5191_s15 }
 0xbf3   : > { %s4236_s9 = sshll.u32 %s4233_s12, 4  ;;  %s4959_s18 = scalar_lea.hbm %s7654_s4, 32  ;;  %s4237_s9 = int_to_ptr.hbm [resolvable:$true] %s4236_s9 }
 0xbf4   : > { %s4953_s10 = sshra.s32 %s4237_s9, 4  ;;  %s4954_s10 = int_to_ptr.hbm [resolvable:$true] %s4953_s10 }
 0xbf5   : > { %s4955_s11 = scalar_lea.hbm %s4954_s10, 16  ;;  %p4960_p13 = scmp.lt.s32.totalorder %s4954_s10, %s7654_s4 }
 0xbf6   : > { %p4956_p7 = scmp.ne.s32.totalorder %s4954_s10, %s4955_s11  ;;  %p4961_p0 = scmp.lt.s32.totalorder %s4959_s18, %s4955_s11 }
 0xbf8   : > { %p4957_p8 = pnand %p4956_p7, %p5123_p9  ;;  %p4962_p1 = por %p4961_p0, %p4960_p13 }
 0xbfa   : > { %p4958_p10 = pneg %p4957_p8 }
 0xbfc   : > { %p4963_p3 = pnand %p4962_p1, %p4958_p10 }
 0xbfe   : > { %4966 = shalt.err (!%p4963_p3)
}
 0xbff   : > { %s5037_s15 = smov 128   ;;  %s5038_s17 = smov 8  }
 0xc00   : > { %4484 = dma.vmem_to_hbm [thread:$0]  (%p5123_p9), %s4235_s7, 256, %s4237_s9, %s4216_s5, %s5037_s15, %s5037_s15, %s5038_s17  }
 0xc01 PF: > { %s7867_s20 = sld [smem:[#allocation18_spill]]  ;;  %p4500_p6 = pnand %p4392_p12, %p5130_p11 }
 0xc02   : > { %s7869_s29 = sld [smem:[#allocation20_spill]] }
 0xc03   : > { %p4501_p4 = pneg %p4500_p6 }
 0xc07   : > { %s4251_s30 = sand.u32 1, %s7867_s20  }
 0xc08   : > { %s4252_s6 = scalar_lea.sflag [#allocation7], %s4251_s30 }
 0xc09   : > { %5004 = dma.done.wait (%p4501_p4), %s4252_s6, 256  }
 0xc0a   : > { %5006 = vsyncadd (%p4501_p4), %s4252_s6, 4294967040  ;;  %s26_s20 = sadd.s32 1, %s7869_s29   ;;  %s7870_s21 = sld [smem:[#allocation19_spill]] }
 0xc0b   : > { %p23_p2 = scmp.ge.s32.totalorder %s26_s20, 4   ;;  %s7871_s17 = sld [smem:[#allocation22_spill]] }
 0xc0c   : > { %s7872_s28 = sld [smem:[#allocation21_spill]]  ;;  %s7873_s15 = smov %s5013_s16 }
 0xc0d   : > { %s7875_s18 = smov %s5025_s19 }
 0xc0e   :  { %25 = sbr.rel (!%p23_p2) target bundleno = 13 (0xd), region = 130 }
 0xc10   : > { %s7874_s16 = smov %s7870_s21 }
 0xc12   : > { %s7876_s19 = smov %s7872_s28 }
 0xc13   :  { %4258 = vsyncpa [#allocation6], 1 }
 0xc14   :  { %4260 = vsyncpa [#allocation6 + $0x1], 1 }
 0xc15   :  { %4261 = vsyncpa [#allocation9], 1 }
 0xc16   :  { %4263 = vsyncpa [#allocation9 + $0x1], 1 }
 0xc17   :  { %4264 = vsyncpa [#allocation12], 1 }
 0xc18   :  { %4266 = vsyncpa [#allocation12 + $0x1], 1 }
 0xc19   :  { %4267 = vsyncpa [#allocation7], 1 }
 0xc1a   :  { %4269 = vsyncpa [#allocation7 + $0x1], 1 }

</bundles_post_ra>
